<compile_context>
chip_gen: v7x
topology: tpu7x:2x2x1
jax: 0.10.0
libtpu: 0.0.40
codegen_flags: <defaults>
</compile_context>

<pallas_src>
import functools
import math

import jax
import jax.numpy as jnp
from jax import lax
from jax.experimental import pallas as pl
from jax.experimental.pallas import tpu as pltpu


CFG = dict(
    in_dim=12,            # args.in_dim
    hidden_size=32,       # args.hidden_size
    num_hidden_layers=2,  # args.num_hidden_layers
    num_attention_heads=4,
    intermediate_size=64,
    quant_factor=2,       # -> squasher: [conv s2] + [conv s1 + maxpool2]
    neg=0.2,              # LeakyReLU negative slope
    INaffine=False,       # InstanceNorm1d(affine=False)
)


# ----------------------------------------------------------------------------
# Parameter init (deterministic, synthetic).  All layout prep (QKV concat,
# conv-weight flattening to (5*Cin, Cout), PE table) is hoisted here.
# ----------------------------------------------------------------------------
def sinusoid_pe(max_len, d):
    pos = jnp.arange(max_len, dtype=jnp.float32)[:, None]
    div = jnp.exp(jnp.arange(0, d, 2, dtype=jnp.float32) * (-math.log(10000.0) / d))
    pe = jnp.zeros((max_len, d), jnp.float32)
    pe = pe.at[:, 0::2].set(jnp.sin(pos * div))
    pe = pe.at[:, 1::2].set(jnp.cos(pos * div))
    return pe


def init_params(key, cfg):
    D = cfg["hidden_size"]
    I = cfg["intermediate_size"]
    Din = cfg["in_dim"]
    L = cfg["num_hidden_layers"]
    keys = iter(jax.random.split(key, 128))

    def w(shape, scale=0.02):
        return (scale * jax.random.normal(next(keys), shape)).astype(jnp.float32)

    p = {}
    p["vm_w"] = w((Din, D))                       # vertice_mapping Linear (in,out)
    p["vm_b"] = w((1, D))

    n_conv = max(cfg["quant_factor"], 1)
    # Conv1d weights pre-flattened to (K*Cin, Cout) for a single K=5*C contraction;
    # row order is (tap k, cin) to match the in-kernel im2col column order.
    p["conv_w"] = jnp.stack([w((5 * D, D)) for _ in range(n_conv)])      # (n_conv, 5D, D)
    p["conv_b"] = jnp.stack([w((1, D)) for _ in range(n_conv)])          # (n_conv, 1, D)

    p["le_w"] = w((D, D))                         # LinearEmbedding
    p["le_b"] = w((1, D))
    p["pe"] = sinusoid_pe(600, D)                 # PositionalEncoding table (hoisted)

    # Transformer layers, stacked over the layer axis; Q/K/V pre-concatenated.
    p["wqkv"] = jnp.stack([jnp.concatenate([w((D, D)), w((D, D)), w((D, D))], axis=1)
                           for _ in range(L)])                           # (L, D, 3D)
    p["bqkv"] = jnp.stack([jnp.concatenate([w((1, D)), w((1, D)), w((1, D))], axis=1)
                           for _ in range(L)])                           # (L, 1, 3D)
    p["wo"] = jnp.stack([w((D, D)) for _ in range(L)])
    p["bo"] = jnp.stack([w((1, D)) for _ in range(L)])
    p["ln1_g"] = jnp.ones((L, 1, D), jnp.float32)
    p["ln1_b"] = jnp.zeros((L, 1, D), jnp.float32)
    p["wi"] = jnp.stack([w((D, I)) for _ in range(L)])
    p["bi"] = jnp.stack([w((1, I)) for _ in range(L)])
    p["w2"] = jnp.stack([w((I, D)) for _ in range(L)])
    p["b2"] = jnp.stack([w((1, D)) for _ in range(L)])
    p["ln2_g"] = jnp.ones((L, 1, D), jnp.float32)
    p["ln2_b"] = jnp.zeros((L, 1, D), jnp.float32)
    return p


# ----------------------------------------------------------------------------
# The single fused kernel
# ----------------------------------------------------------------------------
def _iota2(shape, dim):
    return lax.broadcasted_iota(jnp.int32, shape, dim)


def _encoder_kernel(x_ref, vm_w_ref, vm_b_ref, cw_ref, cb_ref, le_w_ref, le_b_ref,
                    pe_ref, wqkv_ref, bqkv_ref, wo_ref, bo_ref, g1_ref, be1_ref,
                    wi_ref, bi_ref, w2_ref, b2_ref, g2_ref, be2_ref, o_ref,
                    *, batch, num_heads, quant_factor, neg):
    f32 = jnp.float32
    B = batch

    def leaky(v):
        return jnp.where(v >= 0.0, v, neg * v)

    def layer_norm(v, g, b, eps=1e-12):
        mu = jnp.mean(v, axis=-1, keepdims=True)
        var = jnp.mean((v - mu) ** 2, axis=-1, keepdims=True)
        return (v - mu) * lax.rsqrt(var + eps) * g + b

    def gelu(v):
        # TODO(synk): reference BERT uses exact erf-GELU; tanh approximation used here.
        return 0.5 * v * (1.0 + jnp.tanh(0.7978845608028654 * (v + 0.044715 * v * v * v)))

    def block_ids(idx, block, n_blocks):
        # division-free `idx // block` for iota matrices (block structure is static)
        bid = jnp.zeros_like(idx)
        for j in range(1, n_blocks):
            bid = bid + jnp.where(idx >= j * block, 1, 0)
        return bid

    # ---- vertice_mapping: Linear + LeakyReLU on the flattened (B*T0, in_dim) slab ----
    T0 = x_ref.shape[0] // B
    h = jnp.dot(x_ref[...], vm_w_ref[...], preferred_element_type=f32) + vm_b_ref[...]
    h = leaky(h)                                                          # (B*T0, D)

    # ---- squasher: Conv1d(k=5, replicate pad) + LeakyReLU + InstanceNorm (+MaxPool) ----
    # Batch and time stay flattened.  Replicate-pad / stride / im2col row-gather,
    # the per-batch InstanceNorm mean and the MaxPool even/odd selection are constant
    # matrices built in-kernel from 2-D iota (no extra inputs, no strided slices).
    def conv_block(v, w, bias, L, stride, pool):
        Lo = (L + 4 - 5) // stride + 1
        r = _iota2((B * Lo, B * L), 0)
        c = _iota2((B * Lo, B * L), 1)
        bt = block_ids(r, Lo, B)                  # output-row batch id
        t = r - bt * Lo                           # output-row time index
        taps = []
        for k in range(5):
            src = bt * L + jnp.clip(stride * t + k - 2, 0, L - 1)        # replicate pad
            gk = jnp.where(c == src, 1.0, 0.0)
            taps.append(jnp.dot(gk, v, preferred_element_type=f32))      # (B*Lo, C)
        cols = jnp.concatenate(taps, axis=-1)                            # (B*Lo, 5*C)
        y = jnp.dot(cols, w, preferred_element_type=f32) + bias          # one K=5*C matmul
        y = leaky(y)
        # InstanceNorm1d(affine=False): per-(batch, channel) stats over time via a
        # constant block-averaging matmul (keeps everything flattened).
        ra = _iota2((B * Lo, B * Lo), 0)
        ca = _iota2((B * Lo, B * Lo), 1)
        avg = jnp.where(block_ids(ra, Lo, B) == block_ids(ca, Lo, B), 1.0 / Lo, 0.0)
        mu = jnp.dot(avg, y, preferred_element_type=f32)
        var = jnp.dot(avg, (y - mu) ** 2, preferred_element_type=f32)
        y = (y - mu) * lax.rsqrt(var + 1e-5)
        if not pool:
            return y, Lo
        # MaxPool1d(2): even/odd row selection with in-kernel constant matrices.
        Lp = Lo // 2
        rp = _iota2((B * Lp, B * Lo), 0)
        cp = _iota2((B * Lp, B * Lo), 1)
        bp = block_ids(rp, Lp, B)
        tp = rp - bp * Lp
        even = jnp.dot(jnp.where(cp == bp * Lo + 2 * tp, 1.0, 0.0), y,
                       preferred_element_type=f32)
        odd = jnp.dot(jnp.where(cp == bp * Lo + 2 * tp + 1, 1.0, 0.0), y,
                      preferred_element_type=f32)
        return jnp.maximum(even, odd), Lp

    L = T0
    if quant_factor == 0:
        h, L = conv_block(h, cw_ref[0], cb_ref[0], L, stride=1, pool=False)
    else:
        h, L = conv_block(h, cw_ref[0], cb_ref[0], L, stride=2, pool=False)
        for ci in range(1, quant_factor):
            h, L = conv_block(h, cw_ref[ci], cb_ref[ci], L, stride=1, pool=True)

    # ---- LinearEmbedding + PositionalEncoding (dropout = eval identity) ----
    h = jnp.dot(h, le_w_ref[...], preferred_element_type=f32) + le_b_ref[...] + pe_ref[...]

    # ---- transformer stack (post-LN BERT layers); batch stays flattened, cross-batch
    #      attention removed with a block-diagonal mask ----
    BT, D = h.shape
    T = BT // B
    dh = D // num_heads
    scale = 1.0 / math.sqrt(dh)
    same_batch = (block_ids(_iota2((BT, BT), 0), T, B) ==
                  block_ids(_iota2((BT, BT), 1), T, B))

    num_layers = wqkv_ref.shape[0]
    for l in range(num_layers):
        qkv = jnp.dot(h, wqkv_ref[l], preferred_element_type=f32) + bqkv_ref[l]   # (BT,3D)
        ctx = []
        for hd in range(num_heads):
            q = qkv[:, hd * dh:(hd + 1) * dh]
            k = qkv[:, D + hd * dh:D + (hd + 1) * dh]
            v = qkv[:, 2 * D + hd * dh:2 * D + (hd + 1) * dh]
            s = lax.dot_general(q, k, (((1,), (1,)), ((), ())),
                                preferred_element_type=f32) * scale               # (BT,BT)
            s = jnp.where(same_batch, s, -1e30)
            s = s - jnp.max(s, axis=-1, keepdims=True)
            p = jnp.exp(s)
            p = p * pl.reciprocal(jnp.sum(p, axis=-1, keepdims=True), approx=True)
            ctx.append(jnp.dot(p, v, preferred_element_type=f32))                 # (BT,dh)
        ctx = jnp.concatenate(ctx, axis=-1)                                       # (BT, D)
        attn = jnp.dot(ctx, wo_ref[l], preferred_element_type=f32) + bo_ref[l]
        x1 = layer_norm(h + attn, g1_ref[l], be1_ref[l])                          # SelfOutput
        inter = gelu(jnp.dot(x1, wi_ref[l], preferred_element_type=f32) + bi_ref[l])
        ffn = jnp.dot(inter, w2_ref[l], preferred_element_type=f32) + b2_ref[l]
        h = layer_norm(x1 + ffn, g2_ref[l], be2_ref[l])                           # Output

    o_ref[...] = h


# ----------------------------------------------------------------------------
# Wrapper (mirrors TransformerEncoder.forward) — one pallas_call, tiny JAX glue.
# ----------------------------------------------------------------------------
def transformer_encoder_forward(params, x, cfg):
    B, T0, Din = x.shape
    D = cfg["hidden_size"]
    qf = cfg["quant_factor"]
    H = cfg["num_attention_heads"]
    neg = cfg["neg"]

    # final sequence length after the squasher (matches in-kernel arithmetic)
    if qf == 0:
        Tf = T0
    else:
        Tf = (T0 - 1) // 2 + 1
        for _ in range(1, qf):
            Tf = Tf // 2

    x2d = x.reshape(B * T0, Din)
    pe = jnp.tile(params["pe"][:Tf], (B, 1))                 # (B*Tf, D)

    args = (x2d, params["vm_w"], params["vm_b"], params["conv_w"], params["conv_b"],
            params["le_w"], params["le_b"], pe,
            params["wqkv"], params["bqkv"], params["wo"], params["bo"],
            params["ln1_g"], params["ln1_b"], params["wi"], params["bi"],
            params["w2"], params["b2"], params["ln2_g"], params["ln2_b"])

    in_specs = [pl.BlockSpec(a.shape, lambda i, nd=a.ndim: (0,) * nd) for a in args]

    out = pl.pallas_call(
        functools.partial(_encoder_kernel, batch=B, num_heads=H,
                          quant_factor=qf, neg=neg),
        grid=(1,),
        out_shape=jax.ShapeDtypeStruct((B * Tf, D), jnp.float32),
        in_specs=in_specs,
        out_specs=pl.BlockSpec((B * Tf, D), lambda i: (0, 0)),
        compiler_params=pltpu.CompilerParams(dimension_semantics=("arbitrary",)),
    )(*args)
    return out.reshape(B, Tf, D)


if __name__ == "__main__":
    key = jax.random.PRNGKey(0)
    kp, kx = jax.random.split(key)
    params = init_params(kp, CFG)

    B, T = 2, 16
    x = jax.random.normal(kx, (B, T, CFG["in_dim"]), dtype=jnp.float32)

    out = transformer_encoder_forward(params, x, CFG)
    out = jax.block_until_ready(out)

    expected_T = T // (2 ** CFG["quant_factor"])
    assert out.shape == (B, expected_T, CFG["hidden_size"]), out.shape
    assert bool(jnp.all(jnp.isfinite(out)))
    print("KERNEL_OK")
</pallas_src>

<mosaic_0001>
module attributes {stable_mosaic.version = 11 : i64} {
  func.func @_encoder_kernel(%arg0: i32, %arg1: memref<32x12xf32, #tpu.memory_space<vmem>>, %arg2: memref<12x32xf32, #tpu.memory_space<vmem>>, %arg3: memref<1x32xf32, #tpu.memory_space<vmem>>, %arg4: memref<2x160x32xf32, #tpu.memory_space<vmem>>, %arg5: memref<2x1x32xf32, #tpu.memory_space<vmem>>, %arg6: memref<32x32xf32, #tpu.memory_space<vmem>>, %arg7: memref<1x32xf32, #tpu.memory_space<vmem>>, %arg8: memref<8x32xf32, #tpu.memory_space<vmem>>, %arg9: memref<2x32x96xf32, #tpu.memory_space<vmem>>, %arg10: memref<2x1x96xf32, #tpu.memory_space<vmem>>, %arg11: memref<2x32x32xf32, #tpu.memory_space<vmem>>, %arg12: memref<2x1x32xf32, #tpu.memory_space<vmem>>, %arg13: memref<2x1x32xf32, #tpu.memory_space<vmem>>, %arg14: memref<2x1x32xf32, #tpu.memory_space<vmem>>, %arg15: memref<2x32x64xf32, #tpu.memory_space<vmem>>, %arg16: memref<2x1x64xf32, #tpu.memory_space<vmem>>, %arg17: memref<2x64x32xf32, #tpu.memory_space<vmem>>, %arg18: memref<2x1x32xf32, #tpu.memory_space<vmem>>, %arg19: memref<2x1x32xf32, #tpu.memory_space<vmem>>, %arg20: memref<2x1x32xf32, #tpu.memory_space<vmem>>, %arg21: memref<8x32xf32, #tpu.memory_space<vmem>>) attributes {dimension_semantics = [#tpu.dimension_semantics<arbitrary>], iteration_bounds = array<i64: 1>, scalar_prefetch = 0 : i64, scratch_operands = 0 : i64, tpu.core_type = #tpu.core_type<tc>, window_params = [{pipeline_mode = #tpu.pipeline_mode<synchronous>, transform_indices = @transform_0, window_bounds = array<i64: 32, 12>}, {pipeline_mode = #tpu.pipeline_mode<synchronous>, transform_indices = @transform_1, window_bounds = array<i64: 12, 32>}, {pipeline_mode = #tpu.pipeline_mode<synchronous>, transform_indices = @transform_2, window_bounds = array<i64: 1, 32>}, {pipeline_mode = #tpu.pipeline_mode<synchronous>, transform_indices = @transform_3, window_bounds = array<i64: 2, 160, 32>}, {pipeline_mode = #tpu.pipeline_mode<synchronous>, transform_indices = @transform_4, window_bounds = array<i64: 2, 1, 32>}, {pipeline_mode = #tpu.pipeline_mode<synchronous>, transform_indices = @transform_5, window_bounds = array<i64: 32, 32>}, {pipeline_mode = #tpu.pipeline_mode<synchronous>, transform_indices = @transform_6, window_bounds = array<i64: 1, 32>}, {pipeline_mode = #tpu.pipeline_mode<synchronous>, transform_indices = @transform_7, window_bounds = array<i64: 8, 32>}, {pipeline_mode = #tpu.pipeline_mode<synchronous>, transform_indices = @transform_8, window_bounds = array<i64: 2, 32, 96>}, {pipeline_mode = #tpu.pipeline_mode<synchronous>, transform_indices = @transform_9, window_bounds = array<i64: 2, 1, 96>}, {pipeline_mode = #tpu.pipeline_mode<synchronous>, transform_indices = @transform_10, window_bounds = array<i64: 2, 32, 32>}, {pipeline_mode = #tpu.pipeline_mode<synchronous>, transform_indices = @transform_11, window_bounds = array<i64: 2, 1, 32>}, {pipeline_mode = #tpu.pipeline_mode<synchronous>, transform_indices = @transform_12, window_bounds = array<i64: 2, 1, 32>}, {pipeline_mode = #tpu.pipeline_mode<synchronous>, transform_indices = @transform_13, window_bounds = array<i64: 2, 1, 32>}, {pipeline_mode = #tpu.pipeline_mode<synchronous>, transform_indices = @transform_14, window_bounds = array<i64: 2, 32, 64>}, {pipeline_mode = #tpu.pipeline_mode<synchronous>, transform_indices = @transform_15, window_bounds = array<i64: 2, 1, 64>}, {pipeline_mode = #tpu.pipeline_mode<synchronous>, transform_indices = @transform_16, window_bounds = array<i64: 2, 64, 32>}, {pipeline_mode = #tpu.pipeline_mode<synchronous>, transform_indices = @transform_17, window_bounds = array<i64: 2, 1, 32>}, {pipeline_mode = #tpu.pipeline_mode<synchronous>, transform_indices = @transform_18, window_bounds = array<i64: 2, 1, 32>}, {pipeline_mode = #tpu.pipeline_mode<synchronous>, transform_indices = @transform_19, window_bounds = array<i64: 2, 1, 32>}, {pipeline_mode = #tpu.pipeline_mode<synchronous>, transform_indices = @transform_20, window_bounds = array<i64: 8, 32>}]} {
    %c0 = arith.constant 0 : index
    %c0_0 = arith.constant 0 : index
    %0 = vector.load %arg1[%c0, %c0_0] : memref<32x12xf32, #tpu.memory_space<vmem>>, vector<32x12xf32>
    %c0_1 = arith.constant 0 : index
    %c0_2 = arith.constant 0 : index
    %1 = vector.load %arg2[%c0_1, %c0_2] : memref<12x32xf32, #tpu.memory_space<vmem>>, vector<12x32xf32>
    %cst = arith.constant dense<0.000000e+00> : vector<32x32xf32>
    %2 = tpu.matmul %0, %1, %cst {dimension_numbers = #tpu.dot_dimension_numbers<[1], [0], [0], [1], [0, 0, 1, 1], [], []>} : vector<32x12xf32>, vector<12x32xf32>, vector<32x32xf32> -> vector<32x32xf32>
    %c0_3 = arith.constant 0 : index
    %c0_4 = arith.constant 0 : index
    %3 = vector.load %arg3[%c0_3, %c0_4] : memref<1x32xf32, #tpu.memory_space<vmem>>, vector<1x32xf32>
    %4 = vector.broadcast %3 : vector<1x32xf32> to vector<32x32xf32>
    %5 = arith.addf %2, %4 : vector<32x32xf32>
    %cst_5 = arith.constant 0.000000e+00 : f32
    %6 = vector.broadcast %cst_5 : f32 to vector<32x32xf32>
    %7 = arith.cmpf oge, %5, %6 : vector<32x32xf32>
    %cst_6 = arith.constant 2.000000e-01 : f32
    %8 = vector.broadcast %cst_6 : f32 to vector<32x32xf32>
    %9 = arith.mulf %8, %5 : vector<32x32xf32>
    %10 = arith.select %7, %5, %9 : vector<32x32xi1>, vector<32x32xf32>
    %c0_7 = arith.constant 0 : index
    %c0_8 = arith.constant 0 : index
    %c0_9 = arith.constant 0 : index
    %11 = vector.load %arg4[%c0_7, %c0_8, %c0_9] : memref<2x160x32xf32, #tpu.memory_space<vmem>>, vector<1x160x32xf32>
    %12 = vector.shape_cast %11 : vector<1x160x32xf32> to vector<160x32xf32>
    %c0_10 = arith.constant 0 : index
    %c0_11 = arith.constant 0 : index
    %c0_12 = arith.constant 0 : index
    %13 = vector.load %arg5[%c0_10, %c0_11, %c0_12] : memref<2x1x32xf32, #tpu.memory_space<vmem>>, vector<1x1x32xf32>
    %14 = vector.shape_cast %13 : vector<1x1x32xf32> to vector<1x32xf32>
    %15 = tpu.iota {dimensions = array<i32: 0>} : vector<16x32xi32>
    %16 = tpu.iota {dimensions = array<i32: 1>} : vector<16x32xi32>
    %c0_i32 = arith.constant 0 : i32
    %17 = vector.broadcast %c0_i32 : i32 to vector<16x32xi32>
    %c8_i32 = arith.constant 8 : i32
    %18 = vector.broadcast %c8_i32 : i32 to vector<16x32xi32>
    %19 = arith.cmpi sge, %15, %18 : vector<16x32xi32>
    %c1_i32 = arith.constant 1 : i32
    %c0_i32_13 = arith.constant 0 : i32
    %20 = vector.broadcast %c1_i32 : i32 to vector<16x32xi32>
    %21 = vector.broadcast %c0_i32_13 : i32 to vector<16x32xi32>
    %22 = arith.select %19, %20, %21 : vector<16x32xi1>, vector<16x32xi32>
    %23 = arith.addi %17, %22 : vector<16x32xi32>
    %c8_i32_14 = arith.constant 8 : i32
    %24 = vector.broadcast %c8_i32_14 : i32 to vector<16x32xi32>
    %25 = arith.muli %23, %24 : vector<16x32xi32>
    %26 = arith.subi %15, %25 : vector<16x32xi32>
    %c16_i32 = arith.constant 16 : i32
    %27 = vector.broadcast %c16_i32 : i32 to vector<16x32xi32>
    %28 = arith.muli %23, %27 : vector<16x32xi32>
    %c2_i32 = arith.constant 2 : i32
    %29 = vector.broadcast %c2_i32 : i32 to vector<16x32xi32>
    %30 = arith.muli %29, %26 : vector<16x32xi32>
    %c0_i32_15 = arith.constant 0 : i32
    %31 = vector.broadcast %c0_i32_15 : i32 to vector<16x32xi32>
    %32 = arith.addi %30, %31 : vector<16x32xi32>
    %c2_i32_16 = arith.constant 2 : i32
    %33 = vector.broadcast %c2_i32_16 : i32 to vector<16x32xi32>
    %34 = arith.subi %32, %33 : vector<16x32xi32>
    %c0_i32_17 = arith.constant 0 : i32
    %c15_i32 = arith.constant 15 : i32
    %35 = vector.broadcast %c0_i32_17 : i32 to vector<16x32xi32>
    %36 = arith.maxsi %35, %34 : vector<16x32xi32>
    %37 = vector.broadcast %c15_i32 : i32 to vector<16x32xi32>
    %38 = arith.minsi %37, %36 : vector<16x32xi32>
    %39 = arith.addi %28, %38 : vector<16x32xi32>
    %40 = arith.cmpi eq, %16, %39 : vector<16x32xi32>
    %cst_18 = arith.constant 1.000000e+00 : f32
    %cst_19 = arith.constant 0.000000e+00 : f32
    %41 = vector.broadcast %cst_18 : f32 to vector<16x32xf32>
    %42 = vector.broadcast %cst_19 : f32 to vector<16x32xf32>
    %43 = arith.select %40, %41, %42 : vector<16x32xi1>, vector<16x32xf32>
    %cst_20 = arith.constant dense<0.000000e+00> : vector<16x32xf32>
    %44 = tpu.matmul %43, %10, %cst_20 {dimension_numbers = #tpu.dot_dimension_numbers<[1], [0], [0], [1], [0, 0, 1, 1], [], []>} : vector<16x32xf32>, vector<32x32xf32>, vector<16x32xf32> -> vector<16x32xf32>
    %c16_i32_21 = arith.constant 16 : i32
    %45 = vector.broadcast %c16_i32_21 : i32 to vector<16x32xi32>
    %46 = arith.muli %23, %45 : vector<16x32xi32>
    %c2_i32_22 = arith.constant 2 : i32
    %47 = vector.broadcast %c2_i32_22 : i32 to vector<16x32xi32>
    %48 = arith.muli %47, %26 : vector<16x32xi32>
    %c1_i32_23 = arith.constant 1 : i32
    %49 = vector.broadcast %c1_i32_23 : i32 to vector<16x32xi32>
    %50 = arith.addi %48, %49 : vector<16x32xi32>
    %c2_i32_24 = arith.constant 2 : i32
    %51 = vector.broadcast %c2_i32_24 : i32 to vector<16x32xi32>
    %52 = arith.subi %50, %51 : vector<16x32xi32>
    %c0_i32_25 = arith.constant 0 : i32
    %c15_i32_26 = arith.constant 15 : i32
    %53 = vector.broadcast %c0_i32_25 : i32 to vector<16x32xi32>
    %54 = arith.maxsi %53, %52 : vector<16x32xi32>
    %55 = vector.broadcast %c15_i32_26 : i32 to vector<16x32xi32>
    %56 = arith.minsi %55, %54 : vector<16x32xi32>
    %57 = arith.addi %46, %56 : vector<16x32xi32>
    %58 = arith.cmpi eq, %16, %57 : vector<16x32xi32>
    %cst_27 = arith.constant 1.000000e+00 : f32
    %cst_28 = arith.constant 0.000000e+00 : f32
    %59 = vector.broadcast %cst_27 : f32 to vector<16x32xf32>
    %60 = vector.broadcast %cst_28 : f32 to vector<16x32xf32>
    %61 = arith.select %58, %59, %60 : vector<16x32xi1>, vector<16x32xf32>
    %cst_29 = arith.constant dense<0.000000e+00> : vector<16x32xf32>
    %62 = tpu.matmul %61, %10, %cst_29 {dimension_numbers = #tpu.dot_dimension_numbers<[1], [0], [0], [1], [0, 0, 1, 1], [], []>} : vector<16x32xf32>, vector<32x32xf32>, vector<16x32xf32> -> vector<16x32xf32>
    %c16_i32_30 = arith.constant 16 : i32
    %63 = vector.broadcast %c16_i32_30 : i32 to vector<16x32xi32>
    %64 = arith.muli %23, %63 : vector<16x32xi32>
    %c2_i32_31 = arith.constant 2 : i32
    %65 = vector.broadcast %c2_i32_31 : i32 to vector<16x32xi32>
    %66 = arith.muli %65, %26 : vector<16x32xi32>
    %c2_i32_32 = arith.constant 2 : i32
    %67 = vector.broadcast %c2_i32_32 : i32 to vector<16x32xi32>
    %68 = arith.addi %66, %67 : vector<16x32xi32>
    %c2_i32_33 = arith.constant 2 : i32
    %69 = vector.broadcast %c2_i32_33 : i32 to vector<16x32xi32>
    %70 = arith.subi %68, %69 : vector<16x32xi32>
    %c0_i32_34 = arith.constant 0 : i32
    %c15_i32_35 = arith.constant 15 : i32
    %71 = vector.broadcast %c0_i32_34 : i32 to vector<16x32xi32>
    %72 = arith.maxsi %71, %70 : vector<16x32xi32>
    %73 = vector.broadcast %c15_i32_35 : i32 to vector<16x32xi32>
    %74 = arith.minsi %73, %72 : vector<16x32xi32>
    %75 = arith.addi %64, %74 : vector<16x32xi32>
    %76 = arith.cmpi eq, %16, %75 : vector<16x32xi32>
    %cst_36 = arith.constant 1.000000e+00 : f32
    %cst_37 = arith.constant 0.000000e+00 : f32
    %77 = vector.broadcast %cst_36 : f32 to vector<16x32xf32>
    %78 = vector.broadcast %cst_37 : f32 to vector<16x32xf32>
    %79 = arith.select %76, %77, %78 : vector<16x32xi1>, vector<16x32xf32>
    %cst_38 = arith.constant dense<0.000000e+00> : vector<16x32xf32>
    %80 = tpu.matmul %79, %10, %cst_38 {dimension_numbers = #tpu.dot_dimension_numbers<[1], [0], [0], [1], [0, 0, 1, 1], [], []>} : vector<16x32xf32>, vector<32x32xf32>, vector<16x32xf32> -> vector<16x32xf32>
    %c16_i32_39 = arith.constant 16 : i32
    %81 = vector.broadcast %c16_i32_39 : i32 to vector<16x32xi32>
    %82 = arith.muli %23, %81 : vector<16x32xi32>
    %c2_i32_40 = arith.constant 2 : i32
    %83 = vector.broadcast %c2_i32_40 : i32 to vector<16x32xi32>
    %84 = arith.muli %83, %26 : vector<16x32xi32>
    %c3_i32 = arith.constant 3 : i32
    %85 = vector.broadcast %c3_i32 : i32 to vector<16x32xi32>
    %86 = arith.addi %84, %85 : vector<16x32xi32>
    %c2_i32_41 = arith.constant 2 : i32
    %87 = vector.broadcast %c2_i32_41 : i32 to vector<16x32xi32>
    %88 = arith.subi %86, %87 : vector<16x32xi32>
    %c0_i32_42 = arith.constant 0 : i32
    %c15_i32_43 = arith.constant 15 : i32
    %89 = vector.broadcast %c0_i32_42 : i32 to vector<16x32xi32>
    %90 = arith.maxsi %89, %88 : vector<16x32xi32>
    %91 = vector.broadcast %c15_i32_43 : i32 to vector<16x32xi32>
    %92 = arith.minsi %91, %90 : vector<16x32xi32>
    %93 = arith.addi %82, %92 : vector<16x32xi32>
    %94 = arith.cmpi eq, %16, %93 : vector<16x32xi32>
    %cst_44 = arith.constant 1.000000e+00 : f32
    %cst_45 = arith.constant 0.000000e+00 : f32
    %95 = vector.broadcast %cst_44 : f32 to vector<16x32xf32>
    %96 = vector.broadcast %cst_45 : f32 to vector<16x32xf32>
    %97 = arith.select %94, %95, %96 : vector<16x32xi1>, vector<16x32xf32>
    %cst_46 = arith.constant dense<0.000000e+00> : vector<16x32xf32>
    %98 = tpu.matmul %97, %10, %cst_46 {dimension_numbers = #tpu.dot_dimension_numbers<[1], [0], [0], [1], [0, 0, 1, 1], [], []>} : vector<16x32xf32>, vector<32x32xf32>, vector<16x32xf32> -> vector<16x32xf32>
    %c16_i32_47 = arith.constant 16 : i32
    %99 = vector.broadcast %c16_i32_47 : i32 to vector<16x32xi32>
    %100 = arith.muli %23, %99 : vector<16x32xi32>
    %c2_i32_48 = arith.constant 2 : i32
    %101 = vector.broadcast %c2_i32_48 : i32 to vector<16x32xi32>
    %102 = arith.muli %101, %26 : vector<16x32xi32>
    %c4_i32 = arith.constant 4 : i32
    %103 = vector.broadcast %c4_i32 : i32 to vector<16x32xi32>
    %104 = arith.addi %102, %103 : vector<16x32xi32>
    %c2_i32_49 = arith.constant 2 : i32
    %105 = vector.broadcast %c2_i32_49 : i32 to vector<16x32xi32>
    %106 = arith.subi %104, %105 : vector<16x32xi32>
    %c0_i32_50 = arith.constant 0 : i32
    %c15_i32_51 = arith.constant 15 : i32
    %107 = vector.broadcast %c0_i32_50 : i32 to vector<16x32xi32>
    %108 = arith.maxsi %107, %106 : vector<16x32xi32>
    %109 = vector.broadcast %c15_i32_51 : i32 to vector<16x32xi32>
    %110 = arith.minsi %109, %108 : vector<16x32xi32>
    %111 = arith.addi %100, %110 : vector<16x32xi32>
    %112 = arith.cmpi eq, %16, %111 : vector<16x32xi32>
    %cst_52 = arith.constant 1.000000e+00 : f32
    %cst_53 = arith.constant 0.000000e+00 : f32
    %113 = vector.broadcast %cst_52 : f32 to vector<16x32xf32>
    %114 = vector.broadcast %cst_53 : f32 to vector<16x32xf32>
    %115 = arith.select %112, %113, %114 : vector<16x32xi1>, vector<16x32xf32>
    %cst_54 = arith.constant dense<0.000000e+00> : vector<16x32xf32>
    %116 = tpu.matmul %115, %10, %cst_54 {dimension_numbers = #tpu.dot_dimension_numbers<[1], [0], [0], [1], [0, 0, 1, 1], [], []>} : vector<16x32xf32>, vector<32x32xf32>, vector<16x32xf32> -> vector<16x32xf32>
    %117 = tpu.concatenate %44, %62, %80, %98, %116 in 1 : vector<16x32xf32>, vector<16x32xf32>, vector<16x32xf32>, vector<16x32xf32>, vector<16x32xf32> -> vector<16x160xf32>
    %cst_55 = arith.constant dense<0.000000e+00> : vector<16x32xf32>
    %118 = tpu.matmul %117, %12, %cst_55 {dimension_numbers = #tpu.dot_dimension_numbers<[1], [0], [0], [1], [0, 0, 1, 1], [], []>} : vector<16x160xf32>, vector<160x32xf32>, vector<16x32xf32> -> vector<16x32xf32>
    %119 = vector.broadcast %14 : vector<1x32xf32> to vector<16x32xf32>
    %120 = arith.addf %118, %119 : vector<16x32xf32>
    %cst_56 = arith.constant 0.000000e+00 : f32
    %121 = vector.broadcast %cst_56 : f32 to vector<16x32xf32>
    %122 = arith.cmpf oge, %120, %121 : vector<16x32xf32>
    %cst_57 = arith.constant 2.000000e-01 : f32
    %123 = vector.broadcast %cst_57 : f32 to vector<16x32xf32>
    %124 = arith.mulf %123, %120 : vector<16x32xf32>
    %125 = arith.select %122, %120, %124 : vector<16x32xi1>, vector<16x32xf32>
    %126 = tpu.iota {dimensions = array<i32: 0>} : vector<16x16xi32>
    %127 = tpu.iota {dimensions = array<i32: 1>} : vector<16x16xi32>
    %c0_i32_58 = arith.constant 0 : i32
    %128 = vector.broadcast %c0_i32_58 : i32 to vector<16x16xi32>
    %c8_i32_59 = arith.constant 8 : i32
    %129 = vector.broadcast %c8_i32_59 : i32 to vector<16x16xi32>
    %130 = arith.cmpi sge, %126, %129 : vector<16x16xi32>
    %c1_i32_60 = arith.constant 1 : i32
    %c0_i32_61 = arith.constant 0 : i32
    %131 = vector.broadcast %c1_i32_60 : i32 to vector<16x16xi32>
    %132 = vector.broadcast %c0_i32_61 : i32 to vector<16x16xi32>
    %133 = arith.select %130, %131, %132 : vector<16x16xi1>, vector<16x16xi32>
    %134 = arith.addi %128, %133 : vector<16x16xi32>
    %c0_i32_62 = arith.constant 0 : i32
    %135 = vector.broadcast %c0_i32_62 : i32 to vector<16x16xi32>
    %c8_i32_63 = arith.constant 8 : i32
    %136 = vector.broadcast %c8_i32_63 : i32 to vector<16x16xi32>
    %137 = arith.cmpi sge, %127, %136 : vector<16x16xi32>
    %c1_i32_64 = arith.constant 1 : i32
    %c0_i32_65 = arith.constant 0 : i32
    %138 = vector.broadcast %c1_i32_64 : i32 to vector<16x16xi32>
    %139 = vector.broadcast %c0_i32_65 : i32 to vector<16x16xi32>
    %140 = arith.select %137, %138, %139 : vector<16x16xi1>, vector<16x16xi32>
    %141 = arith.addi %135, %140 : vector<16x16xi32>
    %142 = arith.cmpi eq, %134, %141 : vector<16x16xi32>
    %cst_66 = arith.constant 1.250000e-01 : f32
    %cst_67 = arith.constant 0.000000e+00 : f32
    %143 = vector.broadcast %cst_66 : f32 to vector<16x16xf32>
    %144 = vector.broadcast %cst_67 : f32 to vector<16x16xf32>
    %145 = arith.select %142, %143, %144 : vector<16x16xi1>, vector<16x16xf32>
    %cst_68 = arith.constant dense<0.000000e+00> : vector<16x32xf32>
    %146 = tpu.matmul %145, %125, %cst_68 {dimension_numbers = #tpu.dot_dimension_numbers<[1], [0], [0], [1], [0, 0, 1, 1], [], []>} : vector<16x16xf32>, vector<16x32xf32>, vector<16x32xf32> -> vector<16x32xf32>
    %147 = arith.subf %125, %146 : vector<16x32xf32>
    %148 = arith.mulf %147, %147 : vector<16x32xf32>
    %cst_69 = arith.constant dense<0.000000e+00> : vector<16x32xf32>
    %149 = tpu.matmul %145, %148, %cst_69 {dimension_numbers = #tpu.dot_dimension_numbers<[1], [0], [0], [1], [0, 0, 1, 1], [], []>} : vector<16x16xf32>, vector<16x32xf32>, vector<16x32xf32> -> vector<16x32xf32>
    %150 = arith.subf %125, %146 : vector<16x32xf32>
    %cst_70 = arith.constant 9.99999974E-6 : f32
    %151 = vector.broadcast %cst_70 : f32 to vector<16x32xf32>
    %152 = arith.addf %149, %151 : vector<16x32xf32>
    %153 = math.rsqrt %152 : vector<16x32xf32>
    %154 = arith.mulf %150, %153 : vector<16x32xf32>
    %c1 = arith.constant 1 : index
    %c0_71 = arith.constant 0 : index
    %c0_72 = arith.constant 0 : index
    %155 = vector.load %arg4[%c1, %c0_71, %c0_72] : memref<2x160x32xf32, #tpu.memory_space<vmem>>, vector<1x160x32xf32>
    %156 = vector.shape_cast %155 : vector<1x160x32xf32> to vector<160x32xf32>
    %c1_73 = arith.constant 1 : index
    %c0_74 = arith.constant 0 : index
    %c0_75 = arith.constant 0 : index
    %157 = vector.load %arg5[%c1_73, %c0_74, %c0_75] : memref<2x1x32xf32, #tpu.memory_space<vmem>>, vector<1x1x32xf32>
    %158 = vector.shape_cast %157 : vector<1x1x32xf32> to vector<1x32xf32>
    %159 = tpu.iota {dimensions = array<i32: 0>} : vector<16x16xi32>
    %160 = tpu.iota {dimensions = array<i32: 1>} : vector<16x16xi32>
    %c0_i32_76 = arith.constant 0 : i32
    %161 = vector.broadcast %c0_i32_76 : i32 to vector<16x16xi32>
    %c8_i32_77 = arith.constant 8 : i32
    %162 = vector.broadcast %c8_i32_77 : i32 to vector<16x16xi32>
    %163 = arith.cmpi sge, %159, %162 : vector<16x16xi32>
    %c1_i32_78 = arith.constant 1 : i32
    %c0_i32_79 = arith.constant 0 : i32
    %164 = vector.broadcast %c1_i32_78 : i32 to vector<16x16xi32>
    %165 = vector.broadcast %c0_i32_79 : i32 to vector<16x16xi32>
    %166 = arith.select %163, %164, %165 : vector<16x16xi1>, vector<16x16xi32>
    %167 = arith.addi %161, %166 : vector<16x16xi32>
    %c8_i32_80 = arith.constant 8 : i32
    %168 = vector.broadcast %c8_i32_80 : i32 to vector<16x16xi32>
    %169 = arith.muli %167, %168 : vector<16x16xi32>
    %170 = arith.subi %159, %169 : vector<16x16xi32>
    %c8_i32_81 = arith.constant 8 : i32
    %171 = vector.broadcast %c8_i32_81 : i32 to vector<16x16xi32>
    %172 = arith.muli %167, %171 : vector<16x16xi32>
    %c1_i32_82 = arith.constant 1 : i32
    %173 = vector.broadcast %c1_i32_82 : i32 to vector<16x16xi32>
    %174 = arith.muli %173, %170 : vector<16x16xi32>
    %c0_i32_83 = arith.constant 0 : i32
    %175 = vector.broadcast %c0_i32_83 : i32 to vector<16x16xi32>
    %176 = arith.addi %174, %175 : vector<16x16xi32>
    %c2_i32_84 = arith.constant 2 : i32
    %177 = vector.broadcast %c2_i32_84 : i32 to vector<16x16xi32>
    %178 = arith.subi %176, %177 : vector<16x16xi32>
    %c0_i32_85 = arith.constant 0 : i32
    %c7_i32 = arith.constant 7 : i32
    %179 = vector.broadcast %c0_i32_85 : i32 to vector<16x16xi32>
    %180 = arith.maxsi %179, %178 : vector<16x16xi32>
    %181 = vector.broadcast %c7_i32 : i32 to vector<16x16xi32>
    %182 = arith.minsi %181, %180 : vector<16x16xi32>
    %183 = arith.addi %172, %182 : vector<16x16xi32>
    %184 = arith.cmpi eq, %160, %183 : vector<16x16xi32>
    %cst_86 = arith.constant 1.000000e+00 : f32
    %cst_87 = arith.constant 0.000000e+00 : f32
    %185 = vector.broadcast %cst_86 : f32 to vector<16x16xf32>
    %186 = vector.broadcast %cst_87 : f32 to vector<16x16xf32>
    %187 = arith.select %184, %185, %186 : vector<16x16xi1>, vector<16x16xf32>
    %cst_88 = arith.constant dense<0.000000e+00> : vector<16x32xf32>
    %188 = tpu.matmul %187, %154, %cst_88 {dimension_numbers = #tpu.dot_dimension_numbers<[1], [0], [0], [1], [0, 0, 1, 1], [], []>} : vector<16x16xf32>, vector<16x32xf32>, vector<16x32xf32> -> vector<16x32xf32>
    %c8_i32_89 = arith.constant 8 : i32
    %189 = vector.broadcast %c8_i32_89 : i32 to vector<16x16xi32>
    %190 = arith.muli %167, %189 : vector<16x16xi32>
    %c1_i32_90 = arith.constant 1 : i32
    %191 = vector.broadcast %c1_i32_90 : i32 to vector<16x16xi32>
    %192 = arith.muli %191, %170 : vector<16x16xi32>
    %c1_i32_91 = arith.constant 1 : i32
    %193 = vector.broadcast %c1_i32_91 : i32 to vector<16x16xi32>
    %194 = arith.addi %192, %193 : vector<16x16xi32>
    %c2_i32_92 = arith.constant 2 : i32
    %195 = vector.broadcast %c2_i32_92 : i32 to vector<16x16xi32>
    %196 = arith.subi %194, %195 : vector<16x16xi32>
    %c0_i32_93 = arith.constant 0 : i32
    %c7_i32_94 = arith.constant 7 : i32
    %197 = vector.broadcast %c0_i32_93 : i32 to vector<16x16xi32>
    %198 = arith.maxsi %197, %196 : vector<16x16xi32>
    %199 = vector.broadcast %c7_i32_94 : i32 to vector<16x16xi32>
    %200 = arith.minsi %199, %198 : vector<16x16xi32>
    %201 = arith.addi %190, %200 : vector<16x16xi32>
    %202 = arith.cmpi eq, %160, %201 : vector<16x16xi32>
    %cst_95 = arith.constant 1.000000e+00 : f32
    %cst_96 = arith.constant 0.000000e+00 : f32
    %203 = vector.broadcast %cst_95 : f32 to vector<16x16xf32>
    %204 = vector.broadcast %cst_96 : f32 to vector<16x16xf32>
    %205 = arith.select %202, %203, %204 : vector<16x16xi1>, vector<16x16xf32>
    %cst_97 = arith.constant dense<0.000000e+00> : vector<16x32xf32>
    %206 = tpu.matmul %205, %154, %cst_97 {dimension_numbers = #tpu.dot_dimension_numbers<[1], [0], [0], [1], [0, 0, 1, 1], [], []>} : vector<16x16xf32>, vector<16x32xf32>, vector<16x32xf32> -> vector<16x32xf32>
    %c8_i32_98 = arith.constant 8 : i32
    %207 = vector.broadcast %c8_i32_98 : i32 to vector<16x16xi32>
    %208 = arith.muli %167, %207 : vector<16x16xi32>
    %c1_i32_99 = arith.constant 1 : i32
    %209 = vector.broadcast %c1_i32_99 : i32 to vector<16x16xi32>
    %210 = arith.muli %209, %170 : vector<16x16xi32>
    %c2_i32_100 = arith.constant 2 : i32
    %211 = vector.broadcast %c2_i32_100 : i32 to vector<16x16xi32>
    %212 = arith.addi %210, %211 : vector<16x16xi32>
    %c2_i32_101 = arith.constant 2 : i32
    %213 = vector.broadcast %c2_i32_101 : i32 to vector<16x16xi32>
    %214 = arith.subi %212, %213 : vector<16x16xi32>
    %c0_i32_102 = arith.constant 0 : i32
    %c7_i32_103 = arith.constant 7 : i32
    %215 = vector.broadcast %c0_i32_102 : i32 to vector<16x16xi32>
    %216 = arith.maxsi %215, %214 : vector<16x16xi32>
    %217 = vector.broadcast %c7_i32_103 : i32 to vector<16x16xi32>
    %218 = arith.minsi %217, %216 : vector<16x16xi32>
    %219 = arith.addi %208, %218 : vector<16x16xi32>
    %220 = arith.cmpi eq, %160, %219 : vector<16x16xi32>
    %cst_104 = arith.constant 1.000000e+00 : f32
    %cst_105 = arith.constant 0.000000e+00 : f32
    %221 = vector.broadcast %cst_104 : f32 to vector<16x16xf32>
    %222 = vector.broadcast %cst_105 : f32 to vector<16x16xf32>
    %223 = arith.select %220, %221, %222 : vector<16x16xi1>, vector<16x16xf32>
    %cst_106 = arith.constant dense<0.000000e+00> : vector<16x32xf32>
    %224 = tpu.matmul %223, %154, %cst_106 {dimension_numbers = #tpu.dot_dimension_numbers<[1], [0], [0], [1], [0, 0, 1, 1], [], []>} : vector<16x16xf32>, vector<16x32xf32>, vector<16x32xf32> -> vector<16x32xf32>
    %c8_i32_107 = arith.constant 8 : i32
    %225 = vector.broadcast %c8_i32_107 : i32 to vector<16x16xi32>
    %226 = arith.muli %167, %225 : vector<16x16xi32>
    %c1_i32_108 = arith.constant 1 : i32
    %227 = vector.broadcast %c1_i32_108 : i32 to vector<16x16xi32>
    %228 = arith.muli %227, %170 : vector<16x16xi32>
    %c3_i32_109 = arith.constant 3 : i32
    %229 = vector.broadcast %c3_i32_109 : i32 to vector<16x16xi32>
    %230 = arith.addi %228, %229 : vector<16x16xi32>
    %c2_i32_110 = arith.constant 2 : i32
    %231 = vector.broadcast %c2_i32_110 : i32 to vector<16x16xi32>
    %232 = arith.subi %230, %231 : vector<16x16xi32>
    %c0_i32_111 = arith.constant 0 : i32
    %c7_i32_112 = arith.constant 7 : i32
    %233 = vector.broadcast %c0_i32_111 : i32 to vector<16x16xi32>
    %234 = arith.maxsi %233, %232 : vector<16x16xi32>
    %235 = vector.broadcast %c7_i32_112 : i32 to vector<16x16xi32>
    %236 = arith.minsi %235, %234 : vector<16x16xi32>
    %237 = arith.addi %226, %236 : vector<16x16xi32>
    %238 = arith.cmpi eq, %160, %237 : vector<16x16xi32>
    %cst_113 = arith.constant 1.000000e+00 : f32
    %cst_114 = arith.constant 0.000000e+00 : f32
    %239 = vector.broadcast %cst_113 : f32 to vector<16x16xf32>
    %240 = vector.broadcast %cst_114 : f32 to vector<16x16xf32>
    %241 = arith.select %238, %239, %240 : vector<16x16xi1>, vector<16x16xf32>
    %cst_115 = arith.constant dense<0.000000e+00> : vector<16x32xf32>
    %242 = tpu.matmul %241, %154, %cst_115 {dimension_numbers = #tpu.dot_dimension_numbers<[1], [0], [0], [1], [0, 0, 1, 1], [], []>} : vector<16x16xf32>, vector<16x32xf32>, vector<16x32xf32> -> vector<16x32xf32>
    %c8_i32_116 = arith.constant 8 : i32
    %243 = vector.broadcast %c8_i32_116 : i32 to vector<16x16xi32>
    %244 = arith.muli %167, %243 : vector<16x16xi32>
    %c1_i32_117 = arith.constant 1 : i32
    %245 = vector.broadcast %c1_i32_117 : i32 to vector<16x16xi32>
    %246 = arith.muli %245, %170 : vector<16x16xi32>
    %c4_i32_118 = arith.constant 4 : i32
    %247 = vector.broadcast %c4_i32_118 : i32 to vector<16x16xi32>
    %248 = arith.addi %246, %247 : vector<16x16xi32>
    %c2_i32_119 = arith.constant 2 : i32
    %249 = vector.broadcast %c2_i32_119 : i32 to vector<16x16xi32>
    %250 = arith.subi %248, %249 : vector<16x16xi32>
    %c0_i32_120 = arith.constant 0 : i32
    %c7_i32_121 = arith.constant 7 : i32
    %251 = vector.broadcast %c0_i32_120 : i32 to vector<16x16xi32>
    %252 = arith.maxsi %251, %250 : vector<16x16xi32>
    %253 = vector.broadcast %c7_i32_121 : i32 to vector<16x16xi32>
    %254 = arith.minsi %253, %252 : vector<16x16xi32>
    %255 = arith.addi %244, %254 : vector<16x16xi32>
    %256 = arith.cmpi eq, %160, %255 : vector<16x16xi32>
    %cst_122 = arith.constant 1.000000e+00 : f32
    %cst_123 = arith.constant 0.000000e+00 : f32
    %257 = vector.broadcast %cst_122 : f32 to vector<16x16xf32>
    %258 = vector.broadcast %cst_123 : f32 to vector<16x16xf32>
    %259 = arith.select %256, %257, %258 : vector<16x16xi1>, vector<16x16xf32>
    %cst_124 = arith.constant dense<0.000000e+00> : vector<16x32xf32>
    %260 = tpu.matmul %259, %154, %cst_124 {dimension_numbers = #tpu.dot_dimension_numbers<[1], [0], [0], [1], [0, 0, 1, 1], [], []>} : vector<16x16xf32>, vector<16x32xf32>, vector<16x32xf32> -> vector<16x32xf32>
    %261 = tpu.concatenate %188, %206, %224, %242, %260 in 1 : vector<16x32xf32>, vector<16x32xf32>, vector<16x32xf32>, vector<16x32xf32>, vector<16x32xf32> -> vector<16x160xf32>
    %cst_125 = arith.constant dense<0.000000e+00> : vector<16x32xf32>
    %262 = tpu.matmul %261, %156, %cst_125 {dimension_numbers = #tpu.dot_dimension_numbers<[1], [0], [0], [1], [0, 0, 1, 1], [], []>} : vector<16x160xf32>, vector<160x32xf32>, vector<16x32xf32> -> vector<16x32xf32>
    %263 = vector.broadcast %158 : vector<1x32xf32> to vector<16x32xf32>
    %264 = arith.addf %262, %263 : vector<16x32xf32>
    %cst_126 = arith.constant 0.000000e+00 : f32
    %265 = vector.broadcast %cst_126 : f32 to vector<16x32xf32>
    %266 = arith.cmpf oge, %264, %265 : vector<16x32xf32>
    %cst_127 = arith.constant 2.000000e-01 : f32
    %267 = vector.broadcast %cst_127 : f32 to vector<16x32xf32>
    %268 = arith.mulf %267, %264 : vector<16x32xf32>
    %269 = arith.select %266, %264, %268 : vector<16x32xi1>, vector<16x32xf32>
    %270 = tpu.iota {dimensions = array<i32: 0>} : vector<16x16xi32>
    %271 = tpu.iota {dimensions = array<i32: 1>} : vector<16x16xi32>
    %c0_i32_128 = arith.constant 0 : i32
    %272 = vector.broadcast %c0_i32_128 : i32 to vector<16x16xi32>
    %c8_i32_129 = arith.constant 8 : i32
    %273 = vector.broadcast %c8_i32_129 : i32 to vector<16x16xi32>
    %274 = arith.cmpi sge, %270, %273 : vector<16x16xi32>
    %c1_i32_130 = arith.constant 1 : i32
    %c0_i32_131 = arith.constant 0 : i32
    %275 = vector.broadcast %c1_i32_130 : i32 to vector<16x16xi32>
    %276 = vector.broadcast %c0_i32_131 : i32 to vector<16x16xi32>
    %277 = arith.select %274, %275, %276 : vector<16x16xi1>, vector<16x16xi32>
    %278 = arith.addi %272, %277 : vector<16x16xi32>
    %c0_i32_132 = arith.constant 0 : i32
    %279 = vector.broadcast %c0_i32_132 : i32 to vector<16x16xi32>
    %c8_i32_133 = arith.constant 8 : i32
    %280 = vector.broadcast %c8_i32_133 : i32 to vector<16x16xi32>
    %281 = arith.cmpi sge, %271, %280 : vector<16x16xi32>
    %c1_i32_134 = arith.constant 1 : i32
    %c0_i32_135 = arith.constant 0 : i32
    %282 = vector.broadcast %c1_i32_134 : i32 to vector<16x16xi32>
    %283 = vector.broadcast %c0_i32_135 : i32 to vector<16x16xi32>
    %284 = arith.select %281, %282, %283 : vector<16x16xi1>, vector<16x16xi32>
    %285 = arith.addi %279, %284 : vector<16x16xi32>
    %286 = arith.cmpi eq, %278, %285 : vector<16x16xi32>
    %cst_136 = arith.constant 1.250000e-01 : f32
    %cst_137 = arith.constant 0.000000e+00 : f32
    %287 = vector.broadcast %cst_136 : f32 to vector<16x16xf32>
    %288 = vector.broadcast %cst_137 : f32 to vector<16x16xf32>
    %289 = arith.select %286, %287, %288 : vector<16x16xi1>, vector<16x16xf32>
    %cst_138 = arith.constant dense<0.000000e+00> : vector<16x32xf32>
    %290 = tpu.matmul %289, %269, %cst_138 {dimension_numbers = #tpu.dot_dimension_numbers<[1], [0], [0], [1], [0, 0, 1, 1], [], []>} : vector<16x16xf32>, vector<16x32xf32>, vector<16x32xf32> -> vector<16x32xf32>
    %291 = arith.subf %269, %290 : vector<16x32xf32>
    %292 = arith.mulf %291, %291 : vector<16x32xf32>
    %cst_139 = arith.constant dense<0.000000e+00> : vector<16x32xf32>
    %293 = tpu.matmul %289, %292, %cst_139 {dimension_numbers = #tpu.dot_dimension_numbers<[1], [0], [0], [1], [0, 0, 1, 1], [], []>} : vector<16x16xf32>, vector<16x32xf32>, vector<16x32xf32> -> vector<16x32xf32>
    %294 = arith.subf %269, %290 : vector<16x32xf32>
    %cst_140 = arith.constant 9.99999974E-6 : f32
    %295 = vector.broadcast %cst_140 : f32 to vector<16x32xf32>
    %296 = arith.addf %293, %295 : vector<16x32xf32>
    %297 = math.rsqrt %296 : vector<16x32xf32>
    %298 = arith.mulf %294, %297 : vector<16x32xf32>
    %299 = tpu.iota {dimensions = array<i32: 0>} : vector<8x16xi32>
    %300 = tpu.iota {dimensions = array<i32: 1>} : vector<8x16xi32>
    %c0_i32_141 = arith.constant 0 : i32
    %301 = vector.broadcast %c0_i32_141 : i32 to vector<8x16xi32>
    %c4_i32_142 = arith.constant 4 : i32
    %302 = vector.broadcast %c4_i32_142 : i32 to vector<8x16xi32>
    %303 = arith.cmpi sge, %299, %302 : vector<8x16xi32>
    %c1_i32_143 = arith.constant 1 : i32
    %c0_i32_144 = arith.constant 0 : i32
    %304 = vector.broadcast %c1_i32_143 : i32 to vector<8x16xi32>
    %305 = vector.broadcast %c0_i32_144 : i32 to vector<8x16xi32>
    %306 = arith.select %303, %304, %305 : vector<8x16xi1>, vector<8x16xi32>
    %307 = arith.addi %301, %306 : vector<8x16xi32>
    %c4_i32_145 = arith.constant 4 : i32
    %308 = vector.broadcast %c4_i32_145 : i32 to vector<8x16xi32>
    %309 = arith.muli %307, %308 : vector<8x16xi32>
    %310 = arith.subi %299, %309 : vector<8x16xi32>
    %c8_i32_146 = arith.constant 8 : i32
    %311 = vector.broadcast %c8_i32_146 : i32 to vector<8x16xi32>
    %312 = arith.muli %307, %311 : vector<8x16xi32>
    %c2_i32_147 = arith.constant 2 : i32
    %313 = vector.broadcast %c2_i32_147 : i32 to vector<8x16xi32>
    %314 = arith.muli %313, %310 : vector<8x16xi32>
    %315 = arith.addi %312, %314 : vector<8x16xi32>
    %316 = arith.cmpi eq, %300, %315 : vector<8x16xi32>
    %cst_148 = arith.constant 1.000000e+00 : f32
    %cst_149 = arith.constant 0.000000e+00 : f32
    %317 = vector.broadcast %cst_148 : f32 to vector<8x16xf32>
    %318 = vector.broadcast %cst_149 : f32 to vector<8x16xf32>
    %319 = arith.select %316, %317, %318 : vector<8x16xi1>, vector<8x16xf32>
    %cst_150 = arith.constant dense<0.000000e+00> : vector<8x32xf32>
    %320 = tpu.matmul %319, %298, %cst_150 {dimension_numbers = #tpu.dot_dimension_numbers<[1], [0], [0], [1], [0, 0, 1, 1], [], []>} : vector<8x16xf32>, vector<16x32xf32>, vector<8x32xf32> -> vector<8x32xf32>
    %c8_i32_151 = arith.constant 8 : i32
    %321 = vector.broadcast %c8_i32_151 : i32 to vector<8x16xi32>
    %322 = arith.muli %307, %321 : vector<8x16xi32>
    %c2_i32_152 = arith.constant 2 : i32
    %323 = vector.broadcast %c2_i32_152 : i32 to vector<8x16xi32>
    %324 = arith.muli %323, %310 : vector<8x16xi32>
    %325 = arith.addi %322, %324 : vector<8x16xi32>
    %c1_i32_153 = arith.constant 1 : i32
    %326 = vector.broadcast %c1_i32_153 : i32 to vector<8x16xi32>
    %327 = arith.addi %325, %326 : vector<8x16xi32>
    %328 = arith.cmpi eq, %300, %327 : vector<8x16xi32>
    %cst_154 = arith.constant 1.000000e+00 : f32
    %cst_155 = arith.constant 0.000000e+00 : f32
    %329 = vector.broadcast %cst_154 : f32 to vector<8x16xf32>
    %330 = vector.broadcast %cst_155 : f32 to vector<8x16xf32>
    %331 = arith.select %328, %329, %330 : vector<8x16xi1>, vector<8x16xf32>
    %cst_156 = arith.constant dense<0.000000e+00> : vector<8x32xf32>
    %332 = tpu.matmul %331, %298, %cst_156 {dimension_numbers = #tpu.dot_dimension_numbers<[1], [0], [0], [1], [0, 0, 1, 1], [], []>} : vector<8x16xf32>, vector<16x32xf32>, vector<8x32xf32> -> vector<8x32xf32>
    %333 = arith.maximumf %320, %332 : vector<8x32xf32>
    %c0_157 = arith.constant 0 : index
    %c0_158 = arith.constant 0 : index
    %334 = vector.load %arg6[%c0_157, %c0_158] : memref<32x32xf32, #tpu.memory_space<vmem>>, vector<32x32xf32>
    %cst_159 = arith.constant dense<0.000000e+00> : vector<8x32xf32>
    %335 = tpu.matmul %333, %334, %cst_159 {dimension_numbers = #tpu.dot_dimension_numbers<[1], [0], [0], [1], [0, 0, 1, 1], [], []>} : vector<8x32xf32>, vector<32x32xf32>, vector<8x32xf32> -> vector<8x32xf32>
    %c0_160 = arith.constant 0 : index
    %c0_161 = arith.constant 0 : index
    %336 = vector.load %arg7[%c0_160, %c0_161] : memref<1x32xf32, #tpu.memory_space<vmem>>, vector<1x32xf32>
    %337 = vector.broadcast %336 : vector<1x32xf32> to vector<8x32xf32>
    %338 = arith.addf %335, %337 : vector<8x32xf32>
    %c0_162 = arith.constant 0 : index
    %c0_163 = arith.constant 0 : index
    %339 = vector.load %arg8[%c0_162, %c0_163] : memref<8x32xf32, #tpu.memory_space<vmem>>, vector<8x32xf32>
    %340 = arith.addf %338, %339 : vector<8x32xf32>
    %341 = tpu.iota {dimensions = array<i32: 0>} : vector<8x8xi32>
    %c0_i32_164 = arith.constant 0 : i32
    %342 = vector.broadcast %c0_i32_164 : i32 to vector<8x8xi32>
    %c4_i32_165 = arith.constant 4 : i32
    %343 = vector.broadcast %c4_i32_165 : i32 to vector<8x8xi32>
    %344 = arith.cmpi sge, %341, %343 : vector<8x8xi32>
    %c1_i32_166 = arith.constant 1 : i32
    %c0_i32_167 = arith.constant 0 : i32
    %345 = vector.broadcast %c1_i32_166 : i32 to vector<8x8xi32>
    %346 = vector.broadcast %c0_i32_167 : i32 to vector<8x8xi32>
    %347 = arith.select %344, %345, %346 : vector<8x8xi1>, vector<8x8xi32>
    %348 = arith.addi %342, %347 : vector<8x8xi32>
    %349 = tpu.iota {dimensions = array<i32: 1>} : vector<8x8xi32>
    %c0_i32_168 = arith.constant 0 : i32
    %350 = vector.broadcast %c0_i32_168 : i32 to vector<8x8xi32>
    %c4_i32_169 = arith.constant 4 : i32
    %351 = vector.broadcast %c4_i32_169 : i32 to vector<8x8xi32>
    %352 = arith.cmpi sge, %349, %351 : vector<8x8xi32>
    %c1_i32_170 = arith.constant 1 : i32
    %c0_i32_171 = arith.constant 0 : i32
    %353 = vector.broadcast %c1_i32_170 : i32 to vector<8x8xi32>
    %354 = vector.broadcast %c0_i32_171 : i32 to vector<8x8xi32>
    %355 = arith.select %352, %353, %354 : vector<8x8xi1>, vector<8x8xi32>
    %356 = arith.addi %350, %355 : vector<8x8xi32>
    %357 = arith.cmpi eq, %348, %356 : vector<8x8xi32>
    %c0_172 = arith.constant 0 : index
    %c0_173 = arith.constant 0 : index
    %c0_174 = arith.constant 0 : index
    %358 = vector.load %arg9[%c0_172, %c0_173, %c0_174] : memref<2x32x96xf32, #tpu.memory_space<vmem>>, vector<1x32x96xf32>
    %359 = vector.shape_cast %358 : vector<1x32x96xf32> to vector<32x96xf32>
    %cst_175 = arith.constant dense<0.000000e+00> : vector<8x96xf32>
    %360 = tpu.matmul %340, %359, %cst_175 {dimension_numbers = #tpu.dot_dimension_numbers<[1], [0], [0], [1], [0, 0, 1, 1], [], []>} : vector<8x32xf32>, vector<32x96xf32>, vector<8x96xf32> -> vector<8x96xf32>
    %c0_176 = arith.constant 0 : index
    %c0_177 = arith.constant 0 : index
    %c0_178 = arith.constant 0 : index
    %361 = vector.load %arg10[%c0_176, %c0_177, %c0_178] : memref<2x1x96xf32, #tpu.memory_space<vmem>>, vector<1x1x96xf32>
    %362 = vector.shape_cast %361 : vector<1x1x96xf32> to vector<1x96xf32>
    %363 = vector.broadcast %362 : vector<1x96xf32> to vector<8x96xf32>
    %364 = arith.addf %360, %363 : vector<8x96xf32>
    %365 = vector.extract_strided_slice %364 {offsets = [0, 0], sizes = [8, 8], strides = [1, 1]} : vector<8x96xf32> to vector<8x8xf32>
    %366 = vector.extract_strided_slice %364 {offsets = [0, 32], sizes = [8, 8], strides = [1, 1]} : vector<8x96xf32> to vector<8x8xf32>
    %367 = vector.extract_strided_slice %364 {offsets = [0, 64], sizes = [8, 8], strides = [1, 1]} : vector<8x96xf32> to vector<8x8xf32>
    %cst_179 = arith.constant dense<0.000000e+00> : vector<8x8xf32>
    %368 = tpu.matmul %365, %366, %cst_179 {dimension_numbers = #tpu.dot_dimension_numbers<[1], [1], [0], [0], [0, 0, 1, 0], [], []>} : vector<8x8xf32>, vector<8x8xf32>, vector<8x8xf32> -> vector<8x8xf32>
    %cst_180 = arith.constant 0.353553385 : f32
    %369 = vector.broadcast %cst_180 : f32 to vector<8x8xf32>
    %370 = arith.mulf %368, %369 : vector<8x8xf32>
    %cst_181 = arith.constant -1.000000e+30 : f32
    %371 = vector.broadcast %cst_181 : f32 to vector<8x8xf32>
    %372 = arith.select %357, %370, %371 : vector<8x8xi1>, vector<8x8xf32>
    %cst_182 = arith.constant dense<0xFF800000> : vector<8xf32>
    %373 = vector.multi_reduction <maximumf>, %372, %cst_182 [1] : vector<8x8xf32> to vector<8xf32>
    %374 = vector.shape_cast %373 : vector<8xf32> to vector<8x1xf32>
    %375 = vector.broadcast %374 : vector<8x1xf32> to vector<8x8xf32>
    %376 = arith.subf %372, %375 : vector<8x8xf32>
    %377 = math.exp %376 : vector<8x8xf32>
    %cst_183 = arith.constant dense<0.000000e+00> : vector<8xf32>
    %378 = vector.multi_reduction <add>, %377, %cst_183 [1] : vector<8x8xf32> to vector<8xf32>
    %379 = vector.shape_cast %378 : vector<8xf32> to vector<8x1xf32>
    %380 = tpu.reciprocal %379 {approx = true} : vector<8x1xf32> -> vector<8x1xf32>
    %381 = vector.broadcast %380 : vector<8x1xf32> to vector<8x8xf32>
    %382 = arith.mulf %377, %381 : vector<8x8xf32>
    %cst_184 = arith.constant dense<0.000000e+00> : vector<8x8xf32>
    %383 = tpu.matmul %382, %367, %cst_184 {dimension_numbers = #tpu.dot_dimension_numbers<[1], [0], [0], [1], [0, 0, 1, 1], [], []>} : vector<8x8xf32>, vector<8x8xf32>, vector<8x8xf32> -> vector<8x8xf32>
    %384 = vector.extract_strided_slice %364 {offsets = [0, 8], sizes = [8, 8], strides = [1, 1]} : vector<8x96xf32> to vector<8x8xf32>
    %385 = vector.extract_strided_slice %364 {offsets = [0, 40], sizes = [8, 8], strides = [1, 1]} : vector<8x96xf32> to vector<8x8xf32>
    %386 = vector.extract_strided_slice %364 {offsets = [0, 72], sizes = [8, 8], strides = [1, 1]} : vector<8x96xf32> to vector<8x8xf32>
    %cst_185 = arith.constant dense<0.000000e+00> : vector<8x8xf32>
    %387 = tpu.matmul %384, %385, %cst_185 {dimension_numbers = #tpu.dot_dimension_numbers<[1], [1], [0], [0], [0, 0, 1, 0], [], []>} : vector<8x8xf32>, vector<8x8xf32>, vector<8x8xf32> -> vector<8x8xf32>
    %cst_186 = arith.constant 0.353553385 : f32
    %388 = vector.broadcast %cst_186 : f32 to vector<8x8xf32>
    %389 = arith.mulf %387, %388 : vector<8x8xf32>
    %cst_187 = arith.constant -1.000000e+30 : f32
    %390 = vector.broadcast %cst_187 : f32 to vector<8x8xf32>
    %391 = arith.select %357, %389, %390 : vector<8x8xi1>, vector<8x8xf32>
    %cst_188 = arith.constant dense<0xFF800000> : vector<8xf32>
    %392 = vector.multi_reduction <maximumf>, %391, %cst_188 [1] : vector<8x8xf32> to vector<8xf32>
    %393 = vector.shape_cast %392 : vector<8xf32> to vector<8x1xf32>
    %394 = vector.broadcast %393 : vector<8x1xf32> to vector<8x8xf32>
    %395 = arith.subf %391, %394 : vector<8x8xf32>
    %396 = math.exp %395 : vector<8x8xf32>
    %cst_189 = arith.constant dense<0.000000e+00> : vector<8xf32>
    %397 = vector.multi_reduction <add>, %396, %cst_189 [1] : vector<8x8xf32> to vector<8xf32>
    %398 = vector.shape_cast %397 : vector<8xf32> to vector<8x1xf32>
    %399 = tpu.reciprocal %398 {approx = true} : vector<8x1xf32> -> vector<8x1xf32>
    %400 = vector.broadcast %399 : vector<8x1xf32> to vector<8x8xf32>
    %401 = arith.mulf %396, %400 : vector<8x8xf32>
    %cst_190 = arith.constant dense<0.000000e+00> : vector<8x8xf32>
    %402 = tpu.matmul %401, %386, %cst_190 {dimension_numbers = #tpu.dot_dimension_numbers<[1], [0], [0], [1], [0, 0, 1, 1], [], []>} : vector<8x8xf32>, vector<8x8xf32>, vector<8x8xf32> -> vector<8x8xf32>
    %403 = vector.extract_strided_slice %364 {offsets = [0, 16], sizes = [8, 8], strides = [1, 1]} : vector<8x96xf32> to vector<8x8xf32>
    %404 = vector.extract_strided_slice %364 {offsets = [0, 48], sizes = [8, 8], strides = [1, 1]} : vector<8x96xf32> to vector<8x8xf32>
    %405 = vector.extract_strided_slice %364 {offsets = [0, 80], sizes = [8, 8], strides = [1, 1]} : vector<8x96xf32> to vector<8x8xf32>
    %cst_191 = arith.constant dense<0.000000e+00> : vector<8x8xf32>
    %406 = tpu.matmul %403, %404, %cst_191 {dimension_numbers = #tpu.dot_dimension_numbers<[1], [1], [0], [0], [0, 0, 1, 0], [], []>} : vector<8x8xf32>, vector<8x8xf32>, vector<8x8xf32> -> vector<8x8xf32>
    %cst_192 = arith.constant 0.353553385 : f32
    %407 = vector.broadcast %cst_192 : f32 to vector<8x8xf32>
    %408 = arith.mulf %406, %407 : vector<8x8xf32>
    %cst_193 = arith.constant -1.000000e+30 : f32
    %409 = vector.broadcast %cst_193 : f32 to vector<8x8xf32>
    %410 = arith.select %357, %408, %409 : vector<8x8xi1>, vector<8x8xf32>
    %cst_194 = arith.constant dense<0xFF800000> : vector<8xf32>
    %411 = vector.multi_reduction <maximumf>, %410, %cst_194 [1] : vector<8x8xf32> to vector<8xf32>
    %412 = vector.shape_cast %411 : vector<8xf32> to vector<8x1xf32>
    %413 = vector.broadcast %412 : vector<8x1xf32> to vector<8x8xf32>
    %414 = arith.subf %410, %413 : vector<8x8xf32>
    %415 = math.exp %414 : vector<8x8xf32>
    %cst_195 = arith.constant dense<0.000000e+00> : vector<8xf32>
    %416 = vector.multi_reduction <add>, %415, %cst_195 [1] : vector<8x8xf32> to vector<8xf32>
    %417 = vector.shape_cast %416 : vector<8xf32> to vector<8x1xf32>
    %418 = tpu.reciprocal %417 {approx = true} : vector<8x1xf32> -> vector<8x1xf32>
    %419 = vector.broadcast %418 : vector<8x1xf32> to vector<8x8xf32>
    %420 = arith.mulf %415, %419 : vector<8x8xf32>
    %cst_196 = arith.constant dense<0.000000e+00> : vector<8x8xf32>
    %421 = tpu.matmul %420, %405, %cst_196 {dimension_numbers = #tpu.dot_dimension_numbers<[1], [0], [0], [1], [0, 0, 1, 1], [], []>} : vector<8x8xf32>, vector<8x8xf32>, vector<8x8xf32> -> vector<8x8xf32>
    %422 = vector.extract_strided_slice %364 {offsets = [0, 24], sizes = [8, 8], strides = [1, 1]} : vector<8x96xf32> to vector<8x8xf32>
    %423 = vector.extract_strided_slice %364 {offsets = [0, 56], sizes = [8, 8], strides = [1, 1]} : vector<8x96xf32> to vector<8x8xf32>
    %424 = vector.extract_strided_slice %364 {offsets = [0, 88], sizes = [8, 8], strides = [1, 1]} : vector<8x96xf32> to vector<8x8xf32>
    %cst_197 = arith.constant dense<0.000000e+00> : vector<8x8xf32>
    %425 = tpu.matmul %422, %423, %cst_197 {dimension_numbers = #tpu.dot_dimension_numbers<[1], [1], [0], [0], [0, 0, 1, 0], [], []>} : vector<8x8xf32>, vector<8x8xf32>, vector<8x8xf32> -> vector<8x8xf32>
    %cst_198 = arith.constant 0.353553385 : f32
    %426 = vector.broadcast %cst_198 : f32 to vector<8x8xf32>
    %427 = arith.mulf %425, %426 : vector<8x8xf32>
    %cst_199 = arith.constant -1.000000e+30 : f32
    %428 = vector.broadcast %cst_199 : f32 to vector<8x8xf32>
    %429 = arith.select %357, %427, %428 : vector<8x8xi1>, vector<8x8xf32>
    %cst_200 = arith.constant dense<0xFF800000> : vector<8xf32>
    %430 = vector.multi_reduction <maximumf>, %429, %cst_200 [1] : vector<8x8xf32> to vector<8xf32>
    %431 = vector.shape_cast %430 : vector<8xf32> to vector<8x1xf32>
    %432 = vector.broadcast %431 : vector<8x1xf32> to vector<8x8xf32>
    %433 = arith.subf %429, %432 : vector<8x8xf32>
    %434 = math.exp %433 : vector<8x8xf32>
    %cst_201 = arith.constant dense<0.000000e+00> : vector<8xf32>
    %435 = vector.multi_reduction <add>, %434, %cst_201 [1] : vector<8x8xf32> to vector<8xf32>
    %436 = vector.shape_cast %435 : vector<8xf32> to vector<8x1xf32>
    %437 = tpu.reciprocal %436 {approx = true} : vector<8x1xf32> -> vector<8x1xf32>
    %438 = vector.broadcast %437 : vector<8x1xf32> to vector<8x8xf32>
    %439 = arith.mulf %434, %438 : vector<8x8xf32>
    %cst_202 = arith.constant dense<0.000000e+00> : vector<8x8xf32>
    %440 = tpu.matmul %439, %424, %cst_202 {dimension_numbers = #tpu.dot_dimension_numbers<[1], [0], [0], [1], [0, 0, 1, 1], [], []>} : vector<8x8xf32>, vector<8x8xf32>, vector<8x8xf32> -> vector<8x8xf32>
    %441 = tpu.concatenate %383, %402, %421, %440 in 1 : vector<8x8xf32>, vector<8x8xf32>, vector<8x8xf32>, vector<8x8xf32> -> vector<8x32xf32>
    %c0_203 = arith.constant 0 : index
    %c0_204 = arith.constant 0 : index
    %c0_205 = arith.constant 0 : index
    %442 = vector.load %arg11[%c0_203, %c0_204, %c0_205] : memref<2x32x32xf32, #tpu.memory_space<vmem>>, vector<1x32x32xf32>
    %443 = vector.shape_cast %442 : vector<1x32x32xf32> to vector<32x32xf32>
    %cst_206 = arith.constant dense<0.000000e+00> : vector<8x32xf32>
    %444 = tpu.matmul %441, %443, %cst_206 {dimension_numbers = #tpu.dot_dimension_numbers<[1], [0], [0], [1], [0, 0, 1, 1], [], []>} : vector<8x32xf32>, vector<32x32xf32>, vector<8x32xf32> -> vector<8x32xf32>
    %c0_207 = arith.constant 0 : index
    %c0_208 = arith.constant 0 : index
    %c0_209 = arith.constant 0 : index
    %445 = vector.load %arg12[%c0_207, %c0_208, %c0_209] : memref<2x1x32xf32, #tpu.memory_space<vmem>>, vector<1x1x32xf32>
    %446 = vector.shape_cast %445 : vector<1x1x32xf32> to vector<1x32xf32>
    %447 = vector.broadcast %446 : vector<1x32xf32> to vector<8x32xf32>
    %448 = arith.addf %444, %447 : vector<8x32xf32>
    %449 = arith.addf %340, %448 : vector<8x32xf32>
    %c0_210 = arith.constant 0 : index
    %c0_211 = arith.constant 0 : index
    %c0_212 = arith.constant 0 : index
    %450 = vector.load %arg13[%c0_210, %c0_211, %c0_212] : memref<2x1x32xf32, #tpu.memory_space<vmem>>, vector<1x1x32xf32>
    %451 = vector.shape_cast %450 : vector<1x1x32xf32> to vector<1x32xf32>
    %c0_213 = arith.constant 0 : index
    %c0_214 = arith.constant 0 : index
    %c0_215 = arith.constant 0 : index
    %452 = vector.load %arg14[%c0_213, %c0_214, %c0_215] : memref<2x1x32xf32, #tpu.memory_space<vmem>>, vector<1x1x32xf32>
    %453 = vector.shape_cast %452 : vector<1x1x32xf32> to vector<1x32xf32>
    %cst_216 = arith.constant dense<0.000000e+00> : vector<8xf32>
    %454 = vector.multi_reduction <add>, %449, %cst_216 [1] : vector<8x32xf32> to vector<8xf32>
    %455 = vector.shape_cast %454 : vector<8xf32> to vector<8x1xf32>
    %cst_217 = arith.constant 3.200000e+01 : f32
    %456 = vector.broadcast %cst_217 : f32 to vector<8x1xf32>
    %457 = arith.divf %455, %456 : vector<8x1xf32>
    %458 = vector.broadcast %457 : vector<8x1xf32> to vector<8x32xf32>
    %459 = arith.subf %449, %458 : vector<8x32xf32>
    %460 = arith.mulf %459, %459 : vector<8x32xf32>
    %cst_218 = arith.constant dense<0.000000e+00> : vector<8xf32>
    %461 = vector.multi_reduction <add>, %460, %cst_218 [1] : vector<8x32xf32> to vector<8xf32>
    %462 = vector.shape_cast %461 : vector<8xf32> to vector<8x1xf32>
    %cst_219 = arith.constant 3.200000e+01 : f32
    %463 = vector.broadcast %cst_219 : f32 to vector<8x1xf32>
    %464 = arith.divf %462, %463 : vector<8x1xf32>
    %465 = vector.broadcast %457 : vector<8x1xf32> to vector<8x32xf32>
    %466 = arith.subf %449, %465 : vector<8x32xf32>
    %cst_220 = arith.constant 9.99999996E-13 : f32
    %467 = vector.broadcast %cst_220 : f32 to vector<8x1xf32>
    %468 = arith.addf %464, %467 : vector<8x1xf32>
    %469 = math.rsqrt %468 : vector<8x1xf32>
    %470 = vector.broadcast %469 : vector<8x1xf32> to vector<8x32xf32>
    %471 = arith.mulf %466, %470 : vector<8x32xf32>
    %472 = vector.broadcast %451 : vector<1x32xf32> to vector<8x32xf32>
    %473 = arith.mulf %471, %472 : vector<8x32xf32>
    %474 = vector.broadcast %453 : vector<1x32xf32> to vector<8x32xf32>
    %475 = arith.addf %473, %474 : vector<8x32xf32>
    %c0_221 = arith.constant 0 : index
    %c0_222 = arith.constant 0 : index
    %c0_223 = arith.constant 0 : index
    %476 = vector.load %arg15[%c0_221, %c0_222, %c0_223] : memref<2x32x64xf32, #tpu.memory_space<vmem>>, vector<1x32x64xf32>
    %477 = vector.shape_cast %476 : vector<1x32x64xf32> to vector<32x64xf32>
    %cst_224 = arith.constant dense<0.000000e+00> : vector<8x64xf32>
    %478 = tpu.matmul %475, %477, %cst_224 {dimension_numbers = #tpu.dot_dimension_numbers<[1], [0], [0], [1], [0, 0, 1, 1], [], []>} : vector<8x32xf32>, vector<32x64xf32>, vector<8x64xf32> -> vector<8x64xf32>
    %c0_225 = arith.constant 0 : index
    %c0_226 = arith.constant 0 : index
    %c0_227 = arith.constant 0 : index
    %479 = vector.load %arg16[%c0_225, %c0_226, %c0_227] : memref<2x1x64xf32, #tpu.memory_space<vmem>>, vector<1x1x64xf32>
    %480 = vector.shape_cast %479 : vector<1x1x64xf32> to vector<1x64xf32>
    %481 = vector.broadcast %480 : vector<1x64xf32> to vector<8x64xf32>
    %482 = arith.addf %478, %481 : vector<8x64xf32>
    %cst_228 = arith.constant 5.000000e-01 : f32
    %483 = vector.broadcast %cst_228 : f32 to vector<8x64xf32>
    %484 = arith.mulf %483, %482 : vector<8x64xf32>
    %cst_229 = arith.constant 4.471500e-02 : f32
    %485 = vector.broadcast %cst_229 : f32 to vector<8x64xf32>
    %486 = arith.mulf %485, %482 : vector<8x64xf32>
    %487 = arith.mulf %486, %482 : vector<8x64xf32>
    %488 = arith.mulf %487, %482 : vector<8x64xf32>
    %489 = arith.addf %482, %488 : vector<8x64xf32>
    %cst_230 = arith.constant 0.797884583 : f32
    %490 = vector.broadcast %cst_230 : f32 to vector<8x64xf32>
    %491 = arith.mulf %490, %489 : vector<8x64xf32>
    %492 = math.tanh %491 : vector<8x64xf32>
    %cst_231 = arith.constant 1.000000e+00 : f32
    %493 = vector.broadcast %cst_231 : f32 to vector<8x64xf32>
    %494 = arith.addf %493, %492 : vector<8x64xf32>
    %495 = arith.mulf %484, %494 : vector<8x64xf32>
    %c0_232 = arith.constant 0 : index
    %c0_233 = arith.constant 0 : index
    %c0_234 = arith.constant 0 : index
    %496 = vector.load %arg17[%c0_232, %c0_233, %c0_234] : memref<2x64x32xf32, #tpu.memory_space<vmem>>, vector<1x64x32xf32>
    %497 = vector.shape_cast %496 : vector<1x64x32xf32> to vector<64x32xf32>
    %cst_235 = arith.constant dense<0.000000e+00> : vector<8x32xf32>
    %498 = tpu.matmul %495, %497, %cst_235 {dimension_numbers = #tpu.dot_dimension_numbers<[1], [0], [0], [1], [0, 0, 1, 1], [], []>} : vector<8x64xf32>, vector<64x32xf32>, vector<8x32xf32> -> vector<8x32xf32>
    %c0_236 = arith.constant 0 : index
    %c0_237 = arith.constant 0 : index
    %c0_238 = arith.constant 0 : index
    %499 = vector.load %arg18[%c0_236, %c0_237, %c0_238] : memref<2x1x32xf32, #tpu.memory_space<vmem>>, vector<1x1x32xf32>
    %500 = vector.shape_cast %499 : vector<1x1x32xf32> to vector<1x32xf32>
    %501 = vector.broadcast %500 : vector<1x32xf32> to vector<8x32xf32>
    %502 = arith.addf %498, %501 : vector<8x32xf32>
    %503 = arith.addf %475, %502 : vector<8x32xf32>
    %c0_239 = arith.constant 0 : index
    %c0_240 = arith.constant 0 : index
    %c0_241 = arith.constant 0 : index
    %504 = vector.load %arg19[%c0_239, %c0_240, %c0_241] : memref<2x1x32xf32, #tpu.memory_space<vmem>>, vector<1x1x32xf32>
    %505 = vector.shape_cast %504 : vector<1x1x32xf32> to vector<1x32xf32>
    %c0_242 = arith.constant 0 : index
    %c0_243 = arith.constant 0 : index
    %c0_244 = arith.constant 0 : index
    %506 = vector.load %arg20[%c0_242, %c0_243, %c0_244] : memref<2x1x32xf32, #tpu.memory_space<vmem>>, vector<1x1x32xf32>
    %507 = vector.shape_cast %506 : vector<1x1x32xf32> to vector<1x32xf32>
    %cst_245 = arith.constant dense<0.000000e+00> : vector<8xf32>
    %508 = vector.multi_reduction <add>, %503, %cst_245 [1] : vector<8x32xf32> to vector<8xf32>
    %509 = vector.shape_cast %508 : vector<8xf32> to vector<8x1xf32>
    %cst_246 = arith.constant 3.200000e+01 : f32
    %510 = vector.broadcast %cst_246 : f32 to vector<8x1xf32>
    %511 = arith.divf %509, %510 : vector<8x1xf32>
    %512 = vector.broadcast %511 : vector<8x1xf32> to vector<8x32xf32>
    %513 = arith.subf %503, %512 : vector<8x32xf32>
    %514 = arith.mulf %513, %513 : vector<8x32xf32>
    %cst_247 = arith.constant dense<0.000000e+00> : vector<8xf32>
    %515 = vector.multi_reduction <add>, %514, %cst_247 [1] : vector<8x32xf32> to vector<8xf32>
    %516 = vector.shape_cast %515 : vector<8xf32> to vector<8x1xf32>
    %cst_248 = arith.constant 3.200000e+01 : f32
    %517 = vector.broadcast %cst_248 : f32 to vector<8x1xf32>
    %518 = arith.divf %516, %517 : vector<8x1xf32>
    %519 = vector.broadcast %511 : vector<8x1xf32> to vector<8x32xf32>
    %520 = arith.subf %503, %519 : vector<8x32xf32>
    %cst_249 = arith.constant 9.99999996E-13 : f32
    %521 = vector.broadcast %cst_249 : f32 to vector<8x1xf32>
    %522 = arith.addf %518, %521 : vector<8x1xf32>
    %523 = math.rsqrt %522 : vector<8x1xf32>
    %524 = vector.broadcast %523 : vector<8x1xf32> to vector<8x32xf32>
    %525 = arith.mulf %520, %524 : vector<8x32xf32>
    %526 = vector.broadcast %505 : vector<1x32xf32> to vector<8x32xf32>
    %527 = arith.mulf %525, %526 : vector<8x32xf32>
    %528 = vector.broadcast %507 : vector<1x32xf32> to vector<8x32xf32>
    %529 = arith.addf %527, %528 : vector<8x32xf32>
    %c1_250 = arith.constant 1 : index
    %c0_251 = arith.constant 0 : index
    %c0_252 = arith.constant 0 : index
    %530 = vector.load %arg9[%c1_250, %c0_251, %c0_252] : memref<2x32x96xf32, #tpu.memory_space<vmem>>, vector<1x32x96xf32>
    %531 = vector.shape_cast %530 : vector<1x32x96xf32> to vector<32x96xf32>
    %cst_253 = arith.constant dense<0.000000e+00> : vector<8x96xf32>
    %532 = tpu.matmul %529, %531, %cst_253 {dimension_numbers = #tpu.dot_dimension_numbers<[1], [0], [0], [1], [0, 0, 1, 1], [], []>} : vector<8x32xf32>, vector<32x96xf32>, vector<8x96xf32> -> vector<8x96xf32>
    %c1_254 = arith.constant 1 : index
    %c0_255 = arith.constant 0 : index
    %c0_256 = arith.constant 0 : index
    %533 = vector.load %arg10[%c1_254, %c0_255, %c0_256] : memref<2x1x96xf32, #tpu.memory_space<vmem>>, vector<1x1x96xf32>
    %534 = vector.shape_cast %533 : vector<1x1x96xf32> to vector<1x96xf32>
    %535 = vector.broadcast %534 : vector<1x96xf32> to vector<8x96xf32>
    %536 = arith.addf %532, %535 : vector<8x96xf32>
    %537 = vector.extract_strided_slice %536 {offsets = [0, 0], sizes = [8, 8], strides = [1, 1]} : vector<8x96xf32> to vector<8x8xf32>
    %538 = vector.extract_strided_slice %536 {offsets = [0, 32], sizes = [8, 8], strides = [1, 1]} : vector<8x96xf32> to vector<8x8xf32>
    %539 = vector.extract_strided_slice %536 {offsets = [0, 64], sizes = [8, 8], strides = [1, 1]} : vector<8x96xf32> to vector<8x8xf32>
    %cst_257 = arith.constant dense<0.000000e+00> : vector<8x8xf32>
    %540 = tpu.matmul %537, %538, %cst_257 {dimension_numbers = #tpu.dot_dimension_numbers<[1], [1], [0], [0], [0, 0, 1, 0], [], []>} : vector<8x8xf32>, vector<8x8xf32>, vector<8x8xf32> -> vector<8x8xf32>
    %cst_258 = arith.constant 0.353553385 : f32
    %541 = vector.broadcast %cst_258 : f32 to vector<8x8xf32>
    %542 = arith.mulf %540, %541 : vector<8x8xf32>
    %cst_259 = arith.constant -1.000000e+30 : f32
    %543 = vector.broadcast %cst_259 : f32 to vector<8x8xf32>
    %544 = arith.select %357, %542, %543 : vector<8x8xi1>, vector<8x8xf32>
    %cst_260 = arith.constant dense<0xFF800000> : vector<8xf32>
    %545 = vector.multi_reduction <maximumf>, %544, %cst_260 [1] : vector<8x8xf32> to vector<8xf32>
    %546 = vector.shape_cast %545 : vector<8xf32> to vector<8x1xf32>
    %547 = vector.broadcast %546 : vector<8x1xf32> to vector<8x8xf32>
    %548 = arith.subf %544, %547 : vector<8x8xf32>
    %549 = math.exp %548 : vector<8x8xf32>
    %cst_261 = arith.constant dense<0.000000e+00> : vector<8xf32>
    %550 = vector.multi_reduction <add>, %549, %cst_261 [1] : vector<8x8xf32> to vector<8xf32>
    %551 = vector.shape_cast %550 : vector<8xf32> to vector<8x1xf32>
    %552 = tpu.reciprocal %551 {approx = true} : vector<8x1xf32> -> vector<8x1xf32>
    %553 = vector.broadcast %552 : vector<8x1xf32> to vector<8x8xf32>
    %554 = arith.mulf %549, %553 : vector<8x8xf32>
    %cst_262 = arith.constant dense<0.000000e+00> : vector<8x8xf32>
    %555 = tpu.matmul %554, %539, %cst_262 {dimension_numbers = #tpu.dot_dimension_numbers<[1], [0], [0], [1], [0, 0, 1, 1], [], []>} : vector<8x8xf32>, vector<8x8xf32>, vector<8x8xf32> -> vector<8x8xf32>
    %556 = vector.extract_strided_slice %536 {offsets = [0, 8], sizes = [8, 8], strides = [1, 1]} : vector<8x96xf32> to vector<8x8xf32>
    %557 = vector.extract_strided_slice %536 {offsets = [0, 40], sizes = [8, 8], strides = [1, 1]} : vector<8x96xf32> to vector<8x8xf32>
    %558 = vector.extract_strided_slice %536 {offsets = [0, 72], sizes = [8, 8], strides = [1, 1]} : vector<8x96xf32> to vector<8x8xf32>
    %cst_263 = arith.constant dense<0.000000e+00> : vector<8x8xf32>
    %559 = tpu.matmul %556, %557, %cst_263 {dimension_numbers = #tpu.dot_dimension_numbers<[1], [1], [0], [0], [0, 0, 1, 0], [], []>} : vector<8x8xf32>, vector<8x8xf32>, vector<8x8xf32> -> vector<8x8xf32>
    %cst_264 = arith.constant 0.353553385 : f32
    %560 = vector.broadcast %cst_264 : f32 to vector<8x8xf32>
    %561 = arith.mulf %559, %560 : vector<8x8xf32>
    %cst_265 = arith.constant -1.000000e+30 : f32
    %562 = vector.broadcast %cst_265 : f32 to vector<8x8xf32>
    %563 = arith.select %357, %561, %562 : vector<8x8xi1>, vector<8x8xf32>
    %cst_266 = arith.constant dense<0xFF800000> : vector<8xf32>
    %564 = vector.multi_reduction <maximumf>, %563, %cst_266 [1] : vector<8x8xf32> to vector<8xf32>
    %565 = vector.shape_cast %564 : vector<8xf32> to vector<8x1xf32>
    %566 = vector.broadcast %565 : vector<8x1xf32> to vector<8x8xf32>
    %567 = arith.subf %563, %566 : vector<8x8xf32>
    %568 = math.exp %567 : vector<8x8xf32>
    %cst_267 = arith.constant dense<0.000000e+00> : vector<8xf32>
    %569 = vector.multi_reduction <add>, %568, %cst_267 [1] : vector<8x8xf32> to vector<8xf32>
    %570 = vector.shape_cast %569 : vector<8xf32> to vector<8x1xf32>
    %571 = tpu.reciprocal %570 {approx = true} : vector<8x1xf32> -> vector<8x1xf32>
    %572 = vector.broadcast %571 : vector<8x1xf32> to vector<8x8xf32>
    %573 = arith.mulf %568, %572 : vector<8x8xf32>
    %cst_268 = arith.constant dense<0.000000e+00> : vector<8x8xf32>
    %574 = tpu.matmul %573, %558, %cst_268 {dimension_numbers = #tpu.dot_dimension_numbers<[1], [0], [0], [1], [0, 0, 1, 1], [], []>} : vector<8x8xf32>, vector<8x8xf32>, vector<8x8xf32> -> vector<8x8xf32>
    %575 = vector.extract_strided_slice %536 {offsets = [0, 16], sizes = [8, 8], strides = [1, 1]} : vector<8x96xf32> to vector<8x8xf32>
    %576 = vector.extract_strided_slice %536 {offsets = [0, 48], sizes = [8, 8], strides = [1, 1]} : vector<8x96xf32> to vector<8x8xf32>
    %577 = vector.extract_strided_slice %536 {offsets = [0, 80], sizes = [8, 8], strides = [1, 1]} : vector<8x96xf32> to vector<8x8xf32>
    %cst_269 = arith.constant dense<0.000000e+00> : vector<8x8xf32>
    %578 = tpu.matmul %575, %576, %cst_269 {dimension_numbers = #tpu.dot_dimension_numbers<[1], [1], [0], [0], [0, 0, 1, 0], [], []>} : vector<8x8xf32>, vector<8x8xf32>, vector<8x8xf32> -> vector<8x8xf32>
    %cst_270 = arith.constant 0.353553385 : f32
    %579 = vector.broadcast %cst_270 : f32 to vector<8x8xf32>
    %580 = arith.mulf %578, %579 : vector<8x8xf32>
    %cst_271 = arith.constant -1.000000e+30 : f32
    %581 = vector.broadcast %cst_271 : f32 to vector<8x8xf32>
    %582 = arith.select %357, %580, %581 : vector<8x8xi1>, vector<8x8xf32>
    %cst_272 = arith.constant dense<0xFF800000> : vector<8xf32>
    %583 = vector.multi_reduction <maximumf>, %582, %cst_272 [1] : vector<8x8xf32> to vector<8xf32>
    %584 = vector.shape_cast %583 : vector<8xf32> to vector<8x1xf32>
    %585 = vector.broadcast %584 : vector<8x1xf32> to vector<8x8xf32>
    %586 = arith.subf %582, %585 : vector<8x8xf32>
    %587 = math.exp %586 : vector<8x8xf32>
    %cst_273 = arith.constant dense<0.000000e+00> : vector<8xf32>
    %588 = vector.multi_reduction <add>, %587, %cst_273 [1] : vector<8x8xf32> to vector<8xf32>
    %589 = vector.shape_cast %588 : vector<8xf32> to vector<8x1xf32>
    %590 = tpu.reciprocal %589 {approx = true} : vector<8x1xf32> -> vector<8x1xf32>
    %591 = vector.broadcast %590 : vector<8x1xf32> to vector<8x8xf32>
    %592 = arith.mulf %587, %591 : vector<8x8xf32>
    %cst_274 = arith.constant dense<0.000000e+00> : vector<8x8xf32>
    %593 = tpu.matmul %592, %577, %cst_274 {dimension_numbers = #tpu.dot_dimension_numbers<[1], [0], [0], [1], [0, 0, 1, 1], [], []>} : vector<8x8xf32>, vector<8x8xf32>, vector<8x8xf32> -> vector<8x8xf32>
    %594 = vector.extract_strided_slice %536 {offsets = [0, 24], sizes = [8, 8], strides = [1, 1]} : vector<8x96xf32> to vector<8x8xf32>
    %595 = vector.extract_strided_slice %536 {offsets = [0, 56], sizes = [8, 8], strides = [1, 1]} : vector<8x96xf32> to vector<8x8xf32>
    %596 = vector.extract_strided_slice %536 {offsets = [0, 88], sizes = [8, 8], strides = [1, 1]} : vector<8x96xf32> to vector<8x8xf32>
    %cst_275 = arith.constant dense<0.000000e+00> : vector<8x8xf32>
    %597 = tpu.matmul %594, %595, %cst_275 {dimension_numbers = #tpu.dot_dimension_numbers<[1], [1], [0], [0], [0, 0, 1, 0], [], []>} : vector<8x8xf32>, vector<8x8xf32>, vector<8x8xf32> -> vector<8x8xf32>
    %cst_276 = arith.constant 0.353553385 : f32
    %598 = vector.broadcast %cst_276 : f32 to vector<8x8xf32>
    %599 = arith.mulf %597, %598 : vector<8x8xf32>
    %cst_277 = arith.constant -1.000000e+30 : f32
    %600 = vector.broadcast %cst_277 : f32 to vector<8x8xf32>
    %601 = arith.select %357, %599, %600 : vector<8x8xi1>, vector<8x8xf32>
    %cst_278 = arith.constant dense<0xFF800000> : vector<8xf32>
    %602 = vector.multi_reduction <maximumf>, %601, %cst_278 [1] : vector<8x8xf32> to vector<8xf32>
    %603 = vector.shape_cast %602 : vector<8xf32> to vector<8x1xf32>
    %604 = vector.broadcast %603 : vector<8x1xf32> to vector<8x8xf32>
    %605 = arith.subf %601, %604 : vector<8x8xf32>
    %606 = math.exp %605 : vector<8x8xf32>
    %cst_279 = arith.constant dense<0.000000e+00> : vector<8xf32>
    %607 = vector.multi_reduction <add>, %606, %cst_279 [1] : vector<8x8xf32> to vector<8xf32>
    %608 = vector.shape_cast %607 : vector<8xf32> to vector<8x1xf32>
    %609 = tpu.reciprocal %608 {approx = true} : vector<8x1xf32> -> vector<8x1xf32>
    %610 = vector.broadcast %609 : vector<8x1xf32> to vector<8x8xf32>
    %611 = arith.mulf %606, %610 : vector<8x8xf32>
    %cst_280 = arith.constant dense<0.000000e+00> : vector<8x8xf32>
    %612 = tpu.matmul %611, %596, %cst_280 {dimension_numbers = #tpu.dot_dimension_numbers<[1], [0], [0], [1], [0, 0, 1, 1], [], []>} : vector<8x8xf32>, vector<8x8xf32>, vector<8x8xf32> -> vector<8x8xf32>
    %613 = tpu.concatenate %555, %574, %593, %612 in 1 : vector<8x8xf32>, vector<8x8xf32>, vector<8x8xf32>, vector<8x8xf32> -> vector<8x32xf32>
    %c1_281 = arith.constant 1 : index
    %c0_282 = arith.constant 0 : index
    %c0_283 = arith.constant 0 : index
    %614 = vector.load %arg11[%c1_281, %c0_282, %c0_283] : memref<2x32x32xf32, #tpu.memory_space<vmem>>, vector<1x32x32xf32>
    %615 = vector.shape_cast %614 : vector<1x32x32xf32> to vector<32x32xf32>
    %cst_284 = arith.constant dense<0.000000e+00> : vector<8x32xf32>
    %616 = tpu.matmul %613, %615, %cst_284 {dimension_numbers = #tpu.dot_dimension_numbers<[1], [0], [0], [1], [0, 0, 1, 1], [], []>} : vector<8x32xf32>, vector<32x32xf32>, vector<8x32xf32> -> vector<8x32xf32>
    %c1_285 = arith.constant 1 : index
    %c0_286 = arith.constant 0 : index
    %c0_287 = arith.constant 0 : index
    %617 = vector.load %arg12[%c1_285, %c0_286, %c0_287] : memref<2x1x32xf32, #tpu.memory_space<vmem>>, vector<1x1x32xf32>
    %618 = vector.shape_cast %617 : vector<1x1x32xf32> to vector<1x32xf32>
    %619 = vector.broadcast %618 : vector<1x32xf32> to vector<8x32xf32>
    %620 = arith.addf %616, %619 : vector<8x32xf32>
    %621 = arith.addf %529, %620 : vector<8x32xf32>
    %c1_288 = arith.constant 1 : index
    %c0_289 = arith.constant 0 : index
    %c0_290 = arith.constant 0 : index
    %622 = vector.load %arg13[%c1_288, %c0_289, %c0_290] : memref<2x1x32xf32, #tpu.memory_space<vmem>>, vector<1x1x32xf32>
    %623 = vector.shape_cast %622 : vector<1x1x32xf32> to vector<1x32xf32>
    %c1_291 = arith.constant 1 : index
    %c0_292 = arith.constant 0 : index
    %c0_293 = arith.constant 0 : index
    %624 = vector.load %arg14[%c1_291, %c0_292, %c0_293] : memref<2x1x32xf32, #tpu.memory_space<vmem>>, vector<1x1x32xf32>
    %625 = vector.shape_cast %624 : vector<1x1x32xf32> to vector<1x32xf32>
    %cst_294 = arith.constant dense<0.000000e+00> : vector<8xf32>
    %626 = vector.multi_reduction <add>, %621, %cst_294 [1] : vector<8x32xf32> to vector<8xf32>
    %627 = vector.shape_cast %626 : vector<8xf32> to vector<8x1xf32>
    %cst_295 = arith.constant 3.200000e+01 : f32
    %628 = vector.broadcast %cst_295 : f32 to vector<8x1xf32>
    %629 = arith.divf %627, %628 : vector<8x1xf32>
    %630 = vector.broadcast %629 : vector<8x1xf32> to vector<8x32xf32>
    %631 = arith.subf %621, %630 : vector<8x32xf32>
    %632 = arith.mulf %631, %631 : vector<8x32xf32>
    %cst_296 = arith.constant dense<0.000000e+00> : vector<8xf32>
    %633 = vector.multi_reduction <add>, %632, %cst_296 [1] : vector<8x32xf32> to vector<8xf32>
    %634 = vector.shape_cast %633 : vector<8xf32> to vector<8x1xf32>
    %cst_297 = arith.constant 3.200000e+01 : f32
    %635 = vector.broadcast %cst_297 : f32 to vector<8x1xf32>
    %636 = arith.divf %634, %635 : vector<8x1xf32>
    %637 = vector.broadcast %629 : vector<8x1xf32> to vector<8x32xf32>
    %638 = arith.subf %621, %637 : vector<8x32xf32>
    %cst_298 = arith.constant 9.99999996E-13 : f32
    %639 = vector.broadcast %cst_298 : f32 to vector<8x1xf32>
    %640 = arith.addf %636, %639 : vector<8x1xf32>
    %641 = math.rsqrt %640 : vector<8x1xf32>
    %642 = vector.broadcast %641 : vector<8x1xf32> to vector<8x32xf32>
    %643 = arith.mulf %638, %642 : vector<8x32xf32>
    %644 = vector.broadcast %623 : vector<1x32xf32> to vector<8x32xf32>
    %645 = arith.mulf %643, %644 : vector<8x32xf32>
    %646 = vector.broadcast %625 : vector<1x32xf32> to vector<8x32xf32>
    %647 = arith.addf %645, %646 : vector<8x32xf32>
    %c1_299 = arith.constant 1 : index
    %c0_300 = arith.constant 0 : index
    %c0_301 = arith.constant 0 : index
    %648 = vector.load %arg15[%c1_299, %c0_300, %c0_301] : memref<2x32x64xf32, #tpu.memory_space<vmem>>, vector<1x32x64xf32>
    %649 = vector.shape_cast %648 : vector<1x32x64xf32> to vector<32x64xf32>
    %cst_302 = arith.constant dense<0.000000e+00> : vector<8x64xf32>
    %650 = tpu.matmul %647, %649, %cst_302 {dimension_numbers = #tpu.dot_dimension_numbers<[1], [0], [0], [1], [0, 0, 1, 1], [], []>} : vector<8x32xf32>, vector<32x64xf32>, vector<8x64xf32> -> vector<8x64xf32>
    %c1_303 = arith.constant 1 : index
    %c0_304 = arith.constant 0 : index
    %c0_305 = arith.constant 0 : index
    %651 = vector.load %arg16[%c1_303, %c0_304, %c0_305] : memref<2x1x64xf32, #tpu.memory_space<vmem>>, vector<1x1x64xf32>
    %652 = vector.shape_cast %651 : vector<1x1x64xf32> to vector<1x64xf32>
    %653 = vector.broadcast %652 : vector<1x64xf32> to vector<8x64xf32>
    %654 = arith.addf %650, %653 : vector<8x64xf32>
    %cst_306 = arith.constant 5.000000e-01 : f32
    %655 = vector.broadcast %cst_306 : f32 to vector<8x64xf32>
    %656 = arith.mulf %655, %654 : vector<8x64xf32>
    %cst_307 = arith.constant 4.471500e-02 : f32
    %657 = vector.broadcast %cst_307 : f32 to vector<8x64xf32>
    %658 = arith.mulf %657, %654 : vector<8x64xf32>
    %659 = arith.mulf %658, %654 : vector<8x64xf32>
    %660 = arith.mulf %659, %654 : vector<8x64xf32>
    %661 = arith.addf %654, %660 : vector<8x64xf32>
    %cst_308 = arith.constant 0.797884583 : f32
    %662 = vector.broadcast %cst_308 : f32 to vector<8x64xf32>
    %663 = arith.mulf %662, %661 : vector<8x64xf32>
    %664 = math.tanh %663 : vector<8x64xf32>
    %cst_309 = arith.constant 1.000000e+00 : f32
    %665 = vector.broadcast %cst_309 : f32 to vector<8x64xf32>
    %666 = arith.addf %665, %664 : vector<8x64xf32>
    %667 = arith.mulf %656, %666 : vector<8x64xf32>
    %c1_310 = arith.constant 1 : index
    %c0_311 = arith.constant 0 : index
    %c0_312 = arith.constant 0 : index
    %668 = vector.load %arg17[%c1_310, %c0_311, %c0_312] : memref<2x64x32xf32, #tpu.memory_space<vmem>>, vector<1x64x32xf32>
    %669 = vector.shape_cast %668 : vector<1x64x32xf32> to vector<64x32xf32>
    %cst_313 = arith.constant dense<0.000000e+00> : vector<8x32xf32>
    %670 = tpu.matmul %667, %669, %cst_313 {dimension_numbers = #tpu.dot_dimension_numbers<[1], [0], [0], [1], [0, 0, 1, 1], [], []>} : vector<8x64xf32>, vector<64x32xf32>, vector<8x32xf32> -> vector<8x32xf32>
    %c1_314 = arith.constant 1 : index
    %c0_315 = arith.constant 0 : index
    %c0_316 = arith.constant 0 : index
    %671 = vector.load %arg18[%c1_314, %c0_315, %c0_316] : memref<2x1x32xf32, #tpu.memory_space<vmem>>, vector<1x1x32xf32>
    %672 = vector.shape_cast %671 : vector<1x1x32xf32> to vector<1x32xf32>
    %673 = vector.broadcast %672 : vector<1x32xf32> to vector<8x32xf32>
    %674 = arith.addf %670, %673 : vector<8x32xf32>
    %675 = arith.addf %647, %674 : vector<8x32xf32>
    %c1_317 = arith.constant 1 : index
    %c0_318 = arith.constant 0 : index
    %c0_319 = arith.constant 0 : index
    %676 = vector.load %arg19[%c1_317, %c0_318, %c0_319] : memref<2x1x32xf32, #tpu.memory_space<vmem>>, vector<1x1x32xf32>
    %677 = vector.shape_cast %676 : vector<1x1x32xf32> to vector<1x32xf32>
    %c1_320 = arith.constant 1 : index
    %c0_321 = arith.constant 0 : index
    %c0_322 = arith.constant 0 : index
    %678 = vector.load %arg20[%c1_320, %c0_321, %c0_322] : memref<2x1x32xf32, #tpu.memory_space<vmem>>, vector<1x1x32xf32>
    %679 = vector.shape_cast %678 : vector<1x1x32xf32> to vector<1x32xf32>
    %cst_323 = arith.constant dense<0.000000e+00> : vector<8xf32>
    %680 = vector.multi_reduction <add>, %675, %cst_323 [1] : vector<8x32xf32> to vector<8xf32>
    %681 = vector.shape_cast %680 : vector<8xf32> to vector<8x1xf32>
    %cst_324 = arith.constant 3.200000e+01 : f32
    %682 = vector.broadcast %cst_324 : f32 to vector<8x1xf32>
    %683 = arith.divf %681, %682 : vector<8x1xf32>
    %684 = vector.broadcast %683 : vector<8x1xf32> to vector<8x32xf32>
    %685 = arith.subf %675, %684 : vector<8x32xf32>
    %686 = arith.mulf %685, %685 : vector<8x32xf32>
    %cst_325 = arith.constant dense<0.000000e+00> : vector<8xf32>
    %687 = vector.multi_reduction <add>, %686, %cst_325 [1] : vector<8x32xf32> to vector<8xf32>
    %688 = vector.shape_cast %687 : vector<8xf32> to vector<8x1xf32>
    %cst_326 = arith.constant 3.200000e+01 : f32
    %689 = vector.broadcast %cst_326 : f32 to vector<8x1xf32>
    %690 = arith.divf %688, %689 : vector<8x1xf32>
    %691 = vector.broadcast %683 : vector<8x1xf32> to vector<8x32xf32>
    %692 = arith.subf %675, %691 : vector<8x32xf32>
    %cst_327 = arith.constant 9.99999996E-13 : f32
    %693 = vector.broadcast %cst_327 : f32 to vector<8x1xf32>
    %694 = arith.addf %690, %693 : vector<8x1xf32>
    %695 = math.rsqrt %694 : vector<8x1xf32>
    %696 = vector.broadcast %695 : vector<8x1xf32> to vector<8x32xf32>
    %697 = arith.mulf %692, %696 : vector<8x32xf32>
    %698 = vector.broadcast %677 : vector<1x32xf32> to vector<8x32xf32>
    %699 = arith.mulf %697, %698 : vector<8x32xf32>
    %700 = vector.broadcast %679 : vector<1x32xf32> to vector<8x32xf32>
    %701 = arith.addf %699, %700 : vector<8x32xf32>
    %c0_328 = arith.constant 0 : index
    %c0_329 = arith.constant 0 : index
    %702 = vector.load %arg21[%c0_328, %c0_329] : memref<8x32xf32, #tpu.memory_space<vmem>>, vector<8x32xf32>
    tpu.vector_store %arg21[%c0_328, %c0_329], %701 {strides = array<i32>} : memref<8x32xf32, #tpu.memory_space<vmem>>, vector<8x32xf32>,
    return
  }
  func.func @transform_0(%arg0: i32) -> (i32, i32) {
    %c0_i32 = arith.constant 0 : i32
    %c0_i32_0 = arith.constant 0 : i32
    %c0_i32_1 = arith.constant 0 : i32
    return %c0_i32, %c0_i32_0 : i32, i32
  }
  func.func @transform_1(%arg0: i32) -> (i32, i32) {
    %c0_i32 = arith.constant 0 : i32
    %c0_i32_0 = arith.constant 0 : i32
    %c0_i32_1 = arith.constant 0 : i32
    return %c0_i32, %c0_i32_0 : i32, i32
  }
  func.func @transform_2(%arg0: i32) -> (i32, i32) {
    %c0_i32 = arith.constant 0 : i32
    %c0_i32_0 = arith.constant 0 : i32
    %c0_i32_1 = arith.constant 0 : i32
    return %c0_i32, %c0_i32_0 : i32, i32
  }
  func.func @transform_3(%arg0: i32) -> (i32, i32, i32) {
    %c0_i32 = arith.constant 0 : i32
    %c0_i32_0 = arith.constant 0 : i32
    %c0_i32_1 = arith.constant 0 : i32
    %c0_i32_2 = arith.constant 0 : i32
    return %c0_i32, %c0_i32_0, %c0_i32_1 : i32, i32, i32
  }
  func.func @transform_4(%arg0: i32) -> (i32, i32, i32) {
    %c0_i32 = arith.constant 0 : i32
    %c0_i32_0 = arith.constant 0 : i32
    %c0_i32_1 = arith.constant 0 : i32
    %c0_i32_2 = arith.constant 0 : i32
    return %c0_i32, %c0_i32_0, %c0_i32_1 : i32, i32, i32
  }
  func.func @transform_5(%arg0: i32) -> (i32, i32) {
    %c0_i32 = arith.constant 0 : i32
    %c0_i32_0 = arith.constant 0 : i32
    %c0_i32_1 = arith.constant 0 : i32
    return %c0_i32, %c0_i32_0 : i32, i32
  }
  func.func @transform_6(%arg0: i32) -> (i32, i32) {
    %c0_i32 = arith.constant 0 : i32
    %c0_i32_0 = arith.constant 0 : i32
    %c0_i32_1 = arith.constant 0 : i32
    return %c0_i32, %c0_i32_0 : i32, i32
  }
  func.func @transform_7(%arg0: i32) -> (i32, i32) {
    %c0_i32 = arith.constant 0 : i32
    %c0_i32_0 = arith.constant 0 : i32
    %c0_i32_1 = arith.constant 0 : i32
    return %c0_i32, %c0_i32_0 : i32, i32
  }
  func.func @transform_8(%arg0: i32) -> (i32, i32, i32) {
    %c0_i32 = arith.constant 0 : i32
    %c0_i32_0 = arith.constant 0 : i32
    %c0_i32_1 = arith.constant 0 : i32
    %c0_i32_2 = arith.constant 0 : i32
    return %c0_i32, %c0_i32_0, %c0_i32_1 : i32, i32, i32
  }
  func.func @transform_9(%arg0: i32) -> (i32, i32, i32) {
    %c0_i32 = arith.constant 0 : i32
    %c0_i32_0 = arith.constant 0 : i32
    %c0_i32_1 = arith.constant 0 : i32
    %c0_i32_2 = arith.constant 0 : i32
    return %c0_i32, %c0_i32_0, %c0_i32_1 : i32, i32, i32
  }
  func.func @transform_10(%arg0: i32) -> (i32, i32, i32) {
    %c0_i32 = arith.constant 0 : i32
    %c0_i32_0 = arith.constant 0 : i32
    %c0_i32_1 = arith.constant 0 : i32
    %c0_i32_2 = arith.constant 0 : i32
    return %c0_i32, %c0_i32_0, %c0_i32_1 : i32, i32, i32
  }
  func.func @transform_11(%arg0: i32) -> (i32, i32, i32) {
    %c0_i32 = arith.constant 0 : i32
    %c0_i32_0 = arith.constant 0 : i32
    %c0_i32_1 = arith.constant 0 : i32
    %c0_i32_2 = arith.constant 0 : i32
    return %c0_i32, %c0_i32_0, %c0_i32_1 : i32, i32, i32
  }
  func.func @transform_12(%arg0: i32) -> (i32, i32, i32) {
    %c0_i32 = arith.constant 0 : i32
    %c0_i32_0 = arith.constant 0 : i32
    %c0_i32_1 = arith.constant 0 : i32
    %c0_i32_2 = arith.constant 0 : i32
    return %c0_i32, %c0_i32_0, %c0_i32_1 : i32, i32, i32
  }
  func.func @transform_13(%arg0: i32) -> (i32, i32, i32) {
    %c0_i32 = arith.constant 0 : i32
    %c0_i32_0 = arith.constant 0 : i32
    %c0_i32_1 = arith.constant 0 : i32
    %c0_i32_2 = arith.constant 0 : i32
    return %c0_i32, %c0_i32_0, %c0_i32_1 : i32, i32, i32
  }
  func.func @transform_14(%arg0: i32) -> (i32, i32, i32) {
    %c0_i32 = arith.constant 0 : i32
    %c0_i32_0 = arith.constant 0 : i32
    %c0_i32_1 = arith.constant 0 : i32
    %c0_i32_2 = arith.constant 0 : i32
    return %c0_i32, %c0_i32_0, %c0_i32_1 : i32, i32, i32
  }
  func.func @transform_15(%arg0: i32) -> (i32, i32, i32) {
    %c0_i32 = arith.constant 0 : i32
    %c0_i32_0 = arith.constant 0 : i32
    %c0_i32_1 = arith.constant 0 : i32
    %c0_i32_2 = arith.constant 0 : i32
    return %c0_i32, %c0_i32_0, %c0_i32_1 : i32, i32, i32
  }
  func.func @transform_16(%arg0: i32) -> (i32, i32, i32) {
    %c0_i32 = arith.constant 0 : i32
    %c0_i32_0 = arith.constant 0 : i32
    %c0_i32_1 = arith.constant 0 : i32
    %c0_i32_2 = arith.constant 0 : i32
    return %c0_i32, %c0_i32_0, %c0_i32_1 : i32, i32, i32
  }
  func.func @transform_17(%arg0: i32) -> (i32, i32, i32) {
    %c0_i32 = arith.constant 0 : i32
    %c0_i32_0 = arith.constant 0 : i32
    %c0_i32_1 = arith.constant 0 : i32
    %c0_i32_2 = arith.constant 0 : i32
    return %c0_i32, %c0_i32_0, %c0_i32_1 : i32, i32, i32
  }
  func.func @transform_18(%arg0: i32) -> (i32, i32, i32) {
    %c0_i32 = arith.constant 0 : i32
    %c0_i32_0 = arith.constant 0 : i32
    %c0_i32_1 = arith.constant 0 : i32
    %c0_i32_2 = arith.constant 0 : i32
    return %c0_i32, %c0_i32_0, %c0_i32_1 : i32, i32, i32
  }
  func.func @transform_19(%arg0: i32) -> (i32, i32, i32) {
    %c0_i32 = arith.constant 0 : i32
    %c0_i32_0 = arith.constant 0 : i32
    %c0_i32_1 = arith.constant 0 : i32
    %c0_i32_2 = arith.constant 0 : i32
    return %c0_i32, %c0_i32_0, %c0_i32_1 : i32, i32, i32
  }
  func.func @transform_20(%arg0: i32) -> (i32, i32) {
    %c0_i32 = arith.constant 0 : i32
    %c0_i32_0 = arith.constant 0 : i32
    %c0_i32_1 = arith.constant 0 : i32
    return %c0_i32, %c0_i32_0 : i32, i32
  }
}

</mosaic_0001>

<bundles_post_ra>
// kernel: tpu_custom_call.1
= control target key start
LH: loop header
LB: loop body
LE: loop exit
PB: predicated region body
PF: predicated region fallthrough
CT: control target
= control target key end

     0   :  { %s6150_s0 = inlined_call_operand.vmem [shape: f32[32,12], index: 0, kind: input, shape index: {}]   ;;  %s6151_s1 = inlined_call_operand.vmem [shape: f32[12,32], index: 1, kind: input, shape index: {}]   ;;  %s6152_s2 = inlined_call_operand.vmem [shape: f32[1,32], index: 2, kind: input, shape index: {}]   ;;  %s6153_s3 = inlined_call_operand.vmem [shape: f32[2,160,32], index: 3, kind: input, shape index: {}]   ;;  %s6154_s4 = inlined_call_operand.vmem [shape: f32[2,1,32], index: 4, kind: input, shape index: {}]   ;;  %s6155_s5 = inlined_call_operand.vmem [shape: f32[32,32], index: 5, kind: input, shape index: {}]   ;;  %s6156_s6 = inlined_call_operand.vmem [shape: f32[1,32], index: 6, kind: input, shape index: {}]   ;;  %s6157_s7 = inlined_call_operand.vmem [shape: f32[8,32], index: 7, kind: input, shape index: {}]   ;;  %s6158_s8 = inlined_call_operand.vmem [shape: f32[2,32,96], index: 8, kind: input, shape index: {}]   ;;  %s6159_s9 = inlined_call_operand.vmem [shape: f32[2,1,96], index: 9, kind: input, shape index: {}]   ;;  %s6160_s10 = inlined_call_operand.vmem [shape: f32[2,32,32], index: 10, kind: input, shape index: {}]   ;;  %s6161_s11 = inlined_call_operand.vmem [shape: f32[2,1,32], index: 11, kind: input, shape index: {}]   ;;  %s6162_s12 = inlined_call_operand.vmem [shape: f32[2,1,32], index: 12, kind: input, shape index: {}]   ;;  %s6163_s13 = inlined_call_operand.vmem [shape: f32[2,1,32], index: 13, kind: input, shape index: {}]   ;;  %s6164_s14 = inlined_call_operand.vmem [shape: f32[2,32,64], index: 14, kind: input, shape index: {}]   ;;  %s6165_s15 = inlined_call_operand.vmem [shape: f32[2,1,64], index: 15, kind: input, shape index: {}]   ;;  %s6166_s16 = inlined_call_operand.vmem [shape: f32[2,64,32], index: 16, kind: input, shape index: {}]   ;;  %s6167_s17 = inlined_call_operand.vmem [shape: f32[2,1,32], index: 17, kind: input, shape index: {}]   ;;  %s6168_s18 = inlined_call_operand.vmem [shape: f32[2,1,32], index: 18, kind: input, shape index: {}]   ;;  %s6169_s19 = inlined_call_operand.vmem [shape: f32[2,1,32], index: 19, kind: input, shape index: {}]   ;;  %s6170_s20 = inlined_call_operand.hbm [shape: f32[8,32], index: 20, kind: output, shape index: {}]  }
   0x1   :  { %6180 = sst [smem:[#allocation5_spill]] %s6150_s0 }
   0x2   :  { %6181 = sst [smem:[#allocation6_spill]] %s6151_s1 }
   0x3   :  { %6182 = sst [smem:[#allocation7_spill]] %s6152_s2 }
   0x4   :  { %6183 = sst [smem:[#allocation8_spill]] %s6153_s3 }
   0x5   :  { %6184 = sst [smem:[#allocation9_spill]] %s6154_s4 }
   0x6   :  { %s6185_s23 = sld [smem:[#allocation6_spill]]  ;;  %vm92_vm0 = vcmask 1043456   ;;  %s6186_s26 = sld [smem:[#allocation5_spill]]  ;;  %vm5244_vm1 = vmmov 1   ;;  %vm79_vm3 = vcmask 97280  }
   0x7   :  { %vm4933_vm2 = vmpackc.low %vm92_vm0, %vm5244_vm1 }
   0xc   :  { %v70_v0 = vld [vmem:[%s6185_s23] sm:$0xff]  ;;  %v71_v1 = vld [vmem:[%s6185_s23 + $0x8] sm:$0xf] }
   0xd   :  { %v66_v2 = vld [vmem:[%s6186_s26] sm:$0xff]  ;;  %v4932_v3 = vpack.c.bf16 %v71_v1, %v70_v0 }
   0xe   :  { %4599 = vmatprep.mubr.msk.f32.mxu0 %vm79_vm3, %v66_v2 }
   0xf   :  { %25 = vsyncpa [#allocation3], 0  ;;  %4934 = vmatprep.subr.msk.bf16.mxu0 %vm4933_vm2, %v4932_v3  ;;  %v67_v4 = vld [vmem:[%s6186_s26 + $0x8] sm:$0xff]  ;;  %v68_v5 = vld [vmem:[%s6186_s26 + $0x10] sm:$0xff]  ;;  %v214_v7 = vlaneseq  ;;  %v5245_v17 = vmov 0.0   ;;  %vm247_vm8 = vcmask 261120  }
  0x10   :  { %4937 = vmatpush3.bf16.msk.msra.mxu0 %vm4933_vm2, %v4932_v3  ;;  %v69_v6 = vld [vmem:[%s6186_s26 + $0x18] sm:$0xff]  ;;  %s6187_s22 = sld [smem:[#allocation7_spill]]  ;;  %s6188_s2 = sld [smem:[#allocation8_spill]] }
  0x11   :  { %v5389_v8 = vshrl.u32 %v214_v7, 7  ;;  %v5396_v14 = vand.u32 127, %v214_v7  ;;  %s5247_s1 = smov 96   ;;  %s5249_s23 = smov 64  }
  0x12   :  { %s6189_s3 = sld [smem:[#allocation9_spill]]  ;;  %s5255_s21 = smov 120  }
  0x13   :  { %4600 = vmatmul.mubr.msk.f32.vlgmr.msra.gmra.mrb[0].mxu0 %vm79_vm3, %v67_v4  ;;  %v5392_v9 = vmul.u32 2, %v5389_v8  ;;  %v216_v21 = vadd.s32 8, %v5389_v8  ;;  %s5256_s24 = smov 72   ;;  %s5257_s25 = smov 112  }
  0x14   :  { %4602 = vmatprep.mubr.msk.f32.mxu0 %vm79_vm3, %v68_v5  ;;  %s6177_s29 = smov 8   ;;  %s6176_s28 = smov 16  }
  0x15   :  { %v4277_v10 = vadd.s32 4294967294, %v5392_v9  ;;  %v523_v11 = vadd.s32 3, %v5392_v9  ;;  %v5405_v22 = vadd.s32 4294967288, %v216_v21  ;;  %v329_v27 = vadd.s32 1, %v5392_v9  ;;  %s6175_s4 = smov 24  }
  0x16   :  { %v4270_v32 = vld [vmem:[%s6187_s22] ss:$0 sm:$0xff]  ;;  %v622_v55 = vadd.s32 4, %v5392_v9  ;;  %s5248_s22 = smov 32  }
  0x17   :  { %4603 = vmatmul.mubr.msk.f32.gmra.mrb[2].mxu0 %vm79_vm3, %v69_v6  ;;  %vm233_vm4 = vcmp.gt.s32.totalorder %v4277_v10, 0  ;;  %v4287_v13 = vadd.s32 4294967294, %v523_v11  ;;  %v5408_v23 = vmul.u32 2, %v5405_v22  ;;  %v4281_v31 = vadd.s32 4294967294, %v329_v27 }
  0x18   :  { %v234_v12 = vsel %vm233_vm4, %v4277_v10, 0  ;;  %v4291_v63 = vadd.s32 4294967294, %v622_v55 }
  0x19   :  { %vm237_vm5 = vcmp.lt.s32.totalorder %v234_v12, 15  ;;  %vm527_vm6 = vcmp.gt.s32.totalorder %v4287_v13, 0  ;;  %v524_v24 = vadd.s32 3, %v5408_v23  ;;  %v4278_v25 = vadd.s32 4294967294, %v5408_v23 }
  0x1a   :  { %v238_v15 = vsel %vm237_vm5, %v234_v12, 15  ;;  %v528_v16 = vsel %vm527_vm6, %v4287_v13, 0  ;;  %v330_v28 = vadd.s32 1, %v5408_v23  ;;  %vm333_vm15 = vcmp.gt.s32.totalorder %v4281_v31, 0 }
  0x1b   :  { %vm243_vm7 = vcmp.eq.s32.totalorder %v5396_v14, %v238_v15  ;;  %vm531_vm9 = vcmp.lt.s32.totalorder %v528_v16, 15  ;;  %v4288_v26 = vadd.s32 4294967294, %v524_v24  ;;  %vm235_vm11 = vcmp.gt.s32.totalorder %v4278_v25, 0  ;;  %v194_v24 = vld [vmem:[%s6188_s2 + $0x8] sm:$0xff] }
  0x1c   :  { %v245_v18 = vsel %vm243_vm7, 1.0, %v5245_v17  ;;  %v532_v19 = vsel %vm531_vm9, %v528_v16, 15  ;;  %v236_v29 = vsel %vm235_vm11, %v4278_v25, 0  ;;  %v4282_v33 = vadd.s32 4294967294, %v330_v28  ;;  %v195_v25 = vld [vmem:[%s6188_s2 + $0x10] sm:$0xff]  ;;  %v196_v28 = vld [vmem:[%s6188_s2 + $0x18] sm:$0xff] }
  0x1d   :  { %4613 = vmatprep.mubr.msk.f32.mxu1 %vm247_vm8, %v245_v18  ;;  %vm537_vm10 = vcmp.eq.s32.totalorder %v5396_v14, %v532_v19  ;;  %vm529_vm12 = vcmp.gt.s32.totalorder %v4288_v26, 0  ;;  %vm239_vm13 = vcmp.lt.s32.totalorder %v236_v29, 15  ;;  %v334_v41 = vsel %vm333_vm15, %v4281_v31, 0  ;;  %v198_v31 = vld [vmem:[%s6188_s2 + $0x28] sm:$0xff] }
  0x1e   :  { %v539_v20 = vsel %vm537_vm10, 1.0, %v5245_v17  ;;  %v530_v30 = vsel %vm529_vm12, %v4288_v26, 0  ;;  %v240_v38 = vsel %vm239_vm13, %v236_v29, 15  ;;  %vm335_vm1 = vcmp.gt.s32.totalorder %v4282_v33, 0 }
  0x1f   :  { %4646 = vmatprep.mubr.msk.f32.mxu0 %vm247_vm8, %v539_v20  ;;  %vm533_vm14 = vcmp.lt.s32.totalorder %v530_v30, 15  ;;  %v242_v47 = vadd.s32 16, %v240_v38  ;;  %vm337_vm3 = vcmp.lt.s32.totalorder %v334_v41, 15  ;;  %v336_v51 = vsel %vm335_vm1, %v4282_v33, 0  ;;  %v199_v33 = vld [vmem:[%s6188_s2 + $0x30] sm:$0xff] }
  0x20   :  { %v534_v39 = vsel %vm533_vm14, %v530_v30, 15  ;;  %vm428_vm6 = vcmp.gt.s32.totalorder %v5392_v9, 0  ;;  %v338_v57 = vsel %vm337_vm3, %v334_v41, 15  ;;  %vm339_vm7 = vcmp.lt.s32.totalorder %v336_v51, 15  ;;  %v197_v30 = vld [vmem:[%s6188_s2 + $0x20] sm:$0xff] }
  0x21   :  { %v536_v48 = vadd.s32 16, %v534_v39  ;;  %vm244_vm9 = vcmp.eq.s32.totalorder %v5396_v14, %v242_v47  ;;  %v429_v60 = vsel %vm428_vm6, %v5392_v9, 0  ;;  %vm430_vm11 = vcmp.gt.s32.totalorder %v5408_v23, 0  ;;  %v203_v39 = vld [vmem:[%s6188_s2 + $0x50] sm:$0xff] }
  0x22   :  { %v623_v61 = vadd.s32 4, %v5408_v23  ;;  %vm343_vm12 = vcmp.eq.s32.totalorder %v5396_v14, %v338_v57  ;;  %v340_v62 = vsel %vm339_vm7, %v336_v51, 15  ;;  %v246_v0 = vsel %vm244_vm9, 1.0, %v5245_v17  ;;  %v211_v51 = vld [vmem:[%s6188_s2 + $0x90] sm:$0xff] }
  0x23   :  { %vm538_vm10 = vcmp.eq.s32.totalorder %v5396_v14, %v536_v48  ;;  %vm432_vm13 = vcmp.lt.s32.totalorder %v429_v60, 15  ;;  %v431_v2 = vsel %vm430_vm11, %v5408_v23, 0  ;;  %v345_v3 = vsel %vm343_vm12, 1.0, %v5245_v17  ;;  %v193_v23 = vld [vmem:[%s6188_s2] sm:$0xff] }
  0x24   :  { %v540_v1 = vsel %vm538_vm10, 1.0, %v5245_v17  ;;  %v342_v4 = vadd.s32 16, %v340_v62  ;;  %v4292_v5 = vadd.s32 4294967294, %v623_v61  ;;  %vm626_vm14 = vcmp.gt.s32.totalorder %v4291_v63, 0  ;;  %v209_v48 = vld [vmem:[%s6188_s2 + $0x80] sm:$0xff] }
  0x25   :  { %v433_v6 = vsel %vm432_vm13, %v429_v60, 15  ;;  %vm434_vm15 = vcmp.lt.s32.totalorder %v431_v2, 15  ;;  %v627_v7 = vsel %vm626_vm14, %v4291_v63, 0  ;;  %v5246_v26 = vmov 0.0|0.0  }
  0x26   :  { %vm628_vm1 = vcmp.gt.s32.totalorder %v4292_v5, 0  ;;  %v435_v9 = vsel %vm434_vm15, %v431_v2, 15  ;;  %vm630_vm3 = vcmp.lt.s32.totalorder %v627_v7, 15  ;;  %v4979_v27 = vpack.c.bf16 %v194_v24, %v193_v23 }
  0x27   :  { %v629_v11 = vsel %vm628_vm1, %v4292_v5, 0  ;;  %v437_v13 = vadd.s32 16, %v435_v9  ;;  %v631_v15 = vsel %vm630_vm3, %v627_v7, 15  ;;  %v4982_v29 = vpack.c.bf16 %v196_v28, %v195_v25 }
  0x28   :  { %vm636_vm6 = vcmp.eq.s32.totalorder %v5396_v14, %v631_v15  ;;  %vm747_vm9 = vcmask 523264   ;;  %vm750_vm10 = vcmask 785408   ;;  %vm846_vm11 = vcmp.ge.s32.totalorder %v5396_v14, 8 }
  0x29   :  { %v638_v19 = vsel %vm636_vm6, 1.0, %v5245_v17  ;;  %vm852_vm12 = vcmask 130048   ;;  %vm1236_vm6 = vcmp.gt.s32.totalorder %v5389_v8, 0 }
  0xe6   :  { %v4601_v34 = vpop.f32.mrb[0].mxu0 }
  0xe7   :  { %v168_v35 = vadd.f32 %v4601_v34, %v4270_v32  ;;  %v162_v36 = vpop.f32.mrb[1].mxu0  ;;  %v200_v34 = vld [vmem:[%s6188_s2 + $0x38] sm:$0xff] }
  0xe8   :  { %v163_v37 = vadd.f32 %v4270_v32, %v162_v36  ;;  %v201_v36 = vld [vmem:[%s6188_s2 + $0x40] sm:$0xff] }
  0xe9   :  { %vm182_vm0 = vcmp.ge.f32.partialorder %v168_v35, 0.0  ;;  %v186_v40 = vmul.f32 0.2, %v168_v35 }
  0xea   :  { %vm181_vm2 = vcmp.ge.f32.partialorder %v163_v37, 0.0  ;;  %v185_v42 = vmul.f32 0.2, %v163_v37  ;;  %v4604_v43 = vpop.f32.mrb[2].mxu0 }
  0xeb   :  { %v190_v44 = vsel %vm182_vm0, %v168_v35, %v186_v40  ;;  %v178_v45 = vadd.f32 %v4604_v43, %v4270_v32  ;;  %v172_v46 = vpop.f32.mrb[3].mxu0  ;;  %vm344_vm0 = vcmp.eq.s32.totalorder %v5396_v14, %v342_v4  ;;  %v4988_v35 = vpack.c.bf16 %v200_v34, %v199_v33  ;;  %v204_v40 = vld [vmem:[%s6188_s2 + $0x58] sm:$0xff]  ;;  %v206_v43 = vld [vmem:[%s6188_s2 + $0x68] sm:$0xff] }
  0xec   :  { %v189_v49 = vsel %vm181_vm2, %v163_v37, %v185_v42  ;;  %v173_v50 = vadd.f32 %v4270_v32, %v172_v46  ;;  %vm438_vm2 = vcmp.eq.s32.totalorder %v5396_v14, %v433_v6  ;;  %v346_v10 = vsel %vm344_vm0, 1.0, %v5245_v17  ;;  %v202_v37 = vld [vmem:[%s6188_s2 + $0x48] sm:$0xff]  ;;  %v205_v42 = vld [vmem:[%s6188_s2 + $0x60] sm:$0xff]  ;;  %v208_v46 = vld [vmem:[%s6188_s2 + $0x78] sm:$0xff] }
  0xed   :  { %v5417_v52 = vpack.c.bf16 %v190_v44, %v189_v49  ;;  %vm184_vm4 = vcmp.ge.f32.partialorder %v178_v45, 0.0  ;;  %v188_v53 = vmul.f32 0.2, %v178_v45  ;;  %v440_v12 = vsel %vm438_vm2, 1.0, %v5245_v17  ;;  %v210_v49 = vld [vmem:[%s6188_s2 + $0x88] sm:$0xff] }
  0xee   :  { %vm183_vm5 = vcmp.ge.f32.partialorder %v173_v50, 0.0  ;;  %v187_v54 = vmul.f32 0.2, %v173_v50  ;;  %v4985_v32 = vpack.c.bf16 %v198_v31, %v197_v30  ;;  %v4991_v38 = vpack.c.bf16 %v202_v37, %v201_v36 }
  0xef   :  { %v192_v56 = vsel %vm184_vm4, %v178_v45, %v188_v53  ;;  %4939 = vmatprep.subr.bf16.mxu1 %v5417_v52  ;;  %4963 = vmatprep.subr.bf16.mxu0 %v5417_v52  ;;  %vm632_vm4 = vcmp.lt.s32.totalorder %v629_v11, 15  ;;  %v4994_v41 = vpack.c.bf16 %v204_v40, %v203_v39  ;;  %v4997_v44 = vpack.c.bf16 %v206_v43, %v205_v42  ;;  %v207_v45 = vld [vmem:[%s6188_s2 + $0x70] sm:$0xff] }
  0xf0   :  { %v191_v58 = vsel %vm183_vm5, %v173_v50, %v187_v54  ;;  %4941 = vmatpush3.bf16.msra.mxu1 %v5417_v52  ;;  %4965 = vmatpush3.bf16.msra.mxu0 %v5417_v52  ;;  %vm439_vm5 = vcmp.eq.s32.totalorder %v5396_v14, %v437_v13  ;;  %v633_v16 = vsel %vm632_vm4, %v629_v11, 15  ;;  %v5000_v47 = vpack.c.bf16 %v208_v46, %v207_v45 }
  0xf1   :  { %v4942_v59 = vpack.c.bf16 %v192_v56, %v191_v58  ;;  %v441_v18 = vsel %vm439_vm5, 1.0, %v5245_v17  ;;  %v635_v20 = vadd.s32 16, %v633_v16  ;;  %v5003_v50 = vpack.c.bf16 %v210_v49, %v209_v48  ;;  %v4295_v16 = vld [vmem:[%s6189_s3] ss:$0 sm:$0xff] }
  0xf2   :  { %v5250_v13 = vmov 0.125   ;;  %v5558_v31 = vsel %vm846_vm11, 0.125, %v5245_v17  ;;  %v4325_v39 = vadd.s32 4294967294, %v5389_v8  ;;  %v4326_v42 = vadd.s32 4294967294, %v5405_v22 }
  0xf3   :  { %4943 = vmatprep.subr.bf16.mxu1 %v4942_v59  ;;  %4967 = vmatprep.subr.bf16.mxu0 %v4942_v59  ;;  %vm637_vm7 = vcmp.eq.s32.totalorder %v5396_v14, %v635_v20  ;;  %v5546_v15 = vsel %vm846_vm11, 0.0, %v5250_v13  ;;  %v1138_v43 = vadd.s32 1, %v5405_v22  ;;  %vm1238_vm5 = vcmp.gt.s32.totalorder %v5405_v22, 0 }
  0xf4   :  { %4945 = vmatpush3.bf16.msra.mxu1 %v4942_v59  ;;  %4969 = vmatpush3.bf16.msra.mxu0 %v4942_v59  ;;  %v639_v21 = vsel %vm637_vm7, 1.0, %v5245_v17  ;;  %vm1042_vm15 = vcmp.gt.s32.totalorder %v4325_v39, 0  ;;  %vm1044_vm1 = vcmp.gt.s32.totalorder %v4326_v42, 0 }
  0xf5   :  { %4947 = vmatprep.subr.bf16.mxu1 %v5417_v52  ;;  %4978 = vmatprep.subr.bf16.mxu0 %v5246_v26  ;;  %v1043_v40 = vsel %vm1042_vm15, %v4325_v39, 0  ;;  %v4330_v48 = vadd.s32 4294967294, %v1138_v43  ;;  %v4309_v43 = vld [vmem:[%s6188_s2 + $0xc8] sm:$0xff] }
  0xf6   :  { %vm1052_vm0 = vcmp.eq.s32.totalorder %v5396_v14, %v1043_v40  ;;  %v4307_v40 = vld [vmem:[%s6188_s2 + $0xb8] sm:$0xff] }
  0xf7   :  { %4614 = vmatmul.mubr.msk.f32.vlgmr.msra.gmra.mrb[0].mxu1 %vm247_vm8, %v246_v0  ;;  %4647 = vmatmul.mubr.msk.f32.vlgmr.msra.gmra.mrb[4].mxu0 %vm247_vm8, %v540_v1  ;;  %vm1143_vm2 = vcmp.gt.s32.totalorder %v4330_v48, 0 }
  0xf8   :  { %4949 = vmatpush3.bf16.msra.mxu1 %v5417_v52  ;;  %4624 = vmatprep.mubr.msk.f32.mxu1 %vm247_vm8, %v345_v3 }
  0xf9   :  { %4951 = vmatprep.subr.bf16.mxu1 %v4942_v59  ;;  %4980 = vmatpush1.bf16.msra.mxu0 %v4979_v27 }
  0xfa   :  { %4981 = vmatprep.subr.bf16.mxu0 %v5246_v26 }
  0xfc   :  { %4953 = vmatpush3.bf16.msra.mxu1 %v4942_v59 }
  0xfd   :  { %4955 = vmatprep.subr.bf16.mxu1 %v5417_v52  ;;  %4983 = vmatpush1.bf16.msra.mxu0 %v4982_v29 }
  0xfe   :  { %4984 = vmatprep.subr.bf16.mxu0 %v5246_v26 }
  0xff   :  { %4625 = vmatmul.mubr.msk.f32.vlgmr.msra.gmra.mrb[2].mxu1 %vm247_vm8, %v346_v10 }
 0x100   :  { %4957 = vmatpush3.bf16.msra.mxu1 %v5417_v52  ;;  %4635 = vmatprep.mubr.msk.f32.mxu1 %vm247_vm8, %v440_v12 }
 0x101   :  { %4959 = vmatprep.subr.bf16.mxu1 %v4942_v59  ;;  %4986 = vmatpush1.bf16.msra.mxu0 %v4985_v32 }
 0x102   :  { %4987 = vmatprep.subr.bf16.mxu0 %v5246_v26 }
 0x104   :  { %4961 = vmatpush3.bf16.msra.mxu1 %v4942_v59 }
 0x105   :  { %4971 = vmatprep.subr.bf16.mxu1 %v5417_v52  ;;  %4989 = vmatpush1.bf16.msra.mxu0 %v4988_v35 }
 0x106   :  { %4990 = vmatprep.subr.bf16.mxu0 %v5246_v26 }
 0x107   :  { %4636 = vmatmul.mubr.msk.f32.vlgmr.msra.gmra.mrb[4].mxu1 %vm247_vm8, %v441_v18 }
 0x108   :  { %4973 = vmatpush3.bf16.msra.mxu1 %v5417_v52  ;;  %4657 = vmatprep.mubr.msk.f32.mxu1 %vm247_vm8, %v638_v19  ;;  %v212_v52 = vld [vmem:[%s6188_s2 + $0x98] sm:$0xff] }
 0x109   :  { %4975 = vmatprep.subr.bf16.mxu1 %v4942_v59  ;;  %4992 = vmatpush1.bf16.msra.mxu0 %v4991_v38  ;;  %v5006_v55 = vpack.c.bf16 %v212_v52, %v211_v51  ;;  %v1045_v51 = vsel %vm1044_vm1, %v4326_v42, 0  ;;  %v1332_v52 = vadd.s32 3, %v5405_v22  ;;  %v4308_v42 = vld [vmem:[%s6188_s2 + $0xc0] sm:$0xff] }
 0x10a   :  { %4993 = vmatprep.subr.bf16.mxu0 %v5246_v26  ;;  %vm1048_vm4 = vcmp.lt.s32.totalorder %v1045_v51, 7 }
 0x10c   :  { %4977 = vmatpush3.bf16.msra.mxu1 %v4942_v59 }
 0x10d   :  { %4995 = vmatpush1.bf16.msra.mxu0 %v4994_v41  ;;  %v1054_v41 = vsel %vm1052_vm0, 1.0, %v5245_v17 }
 0x10e   :  { %4996 = vmatprep.subr.bf16.mxu0 %v5246_v26 }
 0x10f   :  { %4658 = vmatmul.mubr.msk.f32.vlgmr.msra.gmra.mrb[6].mxu1 %vm247_vm8, %v639_v21 }
 0x110   :  { %4664 = vmatprep.mubr.msk.f32.mxu1 %vm852_vm12, %v5546_v15 }
 0x111   :  { %4998 = vmatpush1.bf16.msra.mxu0 %v4997_v44  ;;  %v1137_v44 = vadd.s32 1, %v5389_v8 }
 0x112   :  { %4999 = vmatprep.subr.bf16.mxu0 %v5246_v26 }
 0x115   :  { %5001 = vmatpush1.bf16.msra.mxu0 %v5000_v47 }
 0x116   :  { %5002 = vmatprep.subr.bf16.mxu0 %v5246_v26 }
 0x119   :  { %5004 = vmatpush1.bf16.msra.mxu0 %v5003_v50  ;;  %v4329_v50 = vadd.s32 4294967294, %v1137_v44  ;;  %v5043_v44 = vpack.c.bf16 %v4309_v43, %v4308_v42 }
 0x11a   :  { %5005 = vmatprep.subr.bf16.mxu0 %v5246_v26 }
 0x11b   :  { %vm1141_vm3 = vcmp.gt.s32.totalorder %v4329_v50, 0 }
 0x11d   :  { %5007 = vmatpush1.bf16.msra.mxu0 %v5006_v55  ;;  %v4336_v55 = vadd.s32 4294967294, %v1332_v52  ;;  %v4315_v52 = vld [vmem:[%s6188_s2 + $0xf8] sm:$0xff] }
 0x1ca   :  { %v4615_v53 = vpop.f32.mrb[0].mxu1  ;;  %v4648_v54 = vpop.f32.mrb[4].mxu0 }
 0x1cb   :  { %v320_v56 = vpop.f32.mrb[1].mxu1  ;;  %v613_v57 = vpop.f32.mrb[5].mxu0 }
 0x1cc   :  { %739 = vrot.lane.b32.xlu1 %v613_v57, %s5247_s1  ;;  %v1049_v57 = vsel %vm1048_vm4, %v1045_v51, 7  ;;  %v4314_v51 = vld [vmem:[%s6188_s2 + $0xf0] sm:$0xff] }
 0x1d2   :  { %v4626_v58 = vpop.f32.mrb[2].mxu1 }
 0x1d3   :  { %725 = vrot.lane.b32.xlu1 %v4626_v58, %s5248_s22  ;;  %v419_v59 = vpop.f32.mrb[3].mxu1  ;;  %v1239_v58 = vsel %vm1238_vm5, %v5405_v22, 0 }
 0x1d4   :  { %723 = vrot.lane.b32.xlu0 %v419_v59, %s5248_s22  ;;  %v1331_v59 = vadd.s32 3, %v5389_v8 }
 0x1d7   :  { %741 = vrot.lane.b32.xlu1 %v4648_v54, %s5247_s1  ;;  %v1142_v54 = vsel %vm1141_vm3, %v4329_v50, 0 }
 0x1d8   :  { %vm1145_vm11 = vcmp.lt.s32.totalorder %v1142_v54, 7 }
 0x1da   :  { %v4637_v60 = vpop.f32.mrb[4].mxu1 }
 0x1db   :  { %v514_v61 = vpop.f32.mrb[5].mxu1 }
 0x1dc   :  { %731 = vrot.lane.b32.xlu0 %v514_v61, %s5249_s23  ;;  %v1051_v61 = vadd.s32 8, %v1049_v57  ;;  %v4318_v57 = vld [vmem:[%s6188_s2 + $0x110] sm:$0xff] }
 0x1de   :  { %vm1053_vm0 = vcmp.eq.s32.totalorder %v5396_v14, %v1051_v61  ;;  %v4321_v61 = vld [vmem:[%s6188_s2 + $0x128] sm:$0xff] }
 0x1e0   :  { %733 = vrot.lane.b32.xlu0 %v4637_v60, %s5249_s23 }
 0x1e2   :  { %v4659_v62 = vpop.f32.mrb[6].mxu1 }
 0x1e3   :  { %v712_v63 = vpop.f32.mrb[7].mxu1 }
 0x1e4   :  { %4296 = vmatprep.mubr.msk.f32.mxu0 %vm247_vm8, %v712_v63 }
 0x23e   :  { %v740_v0 = vpop.permute.xlu1 %739 }
 0x245   :  { %v726_v2 = vpop.permute.xlu1 %725 }
 0x246   :  { %v724_v1 = vpop.permute.xlu0 %723  ;;  %v746_v7 = vsel %vm247_vm8, %v4615_v53, %v726_v2  ;;  %v1144_v53 = vsel %vm1143_vm2, %v4330_v48, 0  ;;  %v4312_v48 = vld [vmem:[%s6188_s2 + $0xe0] sm:$0xff] }
 0x247   :  { %v745_v3 = vsel %vm247_vm8, %v320_v56, %v724_v1  ;;  %v1431_v56 = vadd.s32 4, %v5405_v22  ;;  %vm1147_vm7 = vcmp.lt.s32.totalorder %v1144_v53, 7 }
 0x248   :  { %v1148_v2 = vsel %vm1147_vm7, %v1144_v53, 7  ;;  %v5052_v53 = vpack.c.bf16 %v4315_v52, %v4314_v51 }
 0x249   :  { %v742_v10 = vpop.permute.xlu1 %741  ;;  %v4340_v63 = vadd.s32 4294967294, %v1431_v56 }
 0x24b   :  { %vm1436_vm1 = vcmp.gt.s32.totalorder %v4340_v63, 0 }
 0x24e   :  { %v732_v4 = vpop.permute.xlu0 %731 }
 0x24f   :  { %v748_v5 = vsel %vm747_vm9, %v745_v3, %v732_v4  ;;  %v1146_v4 = vsel %vm1145_vm11, %v1142_v54, 7  ;;  %v4316_v54 = vld [vmem:[%s6188_s2 + $0x100] sm:$0xff] }
 0x250   :  { %v751_v6 = vsel %vm750_vm10, %v748_v5, %v740_v0  ;;  %v4335_v5 = vadd.s32 4294967294, %v1331_v59  ;;  %vm1151_vm2 = vcmp.eq.s32.totalorder %v5396_v14, %v1146_v4 }
 0x251   :  { %830 = vmatmul.mubr.f32.vlgmr.msra.gmra.mrb[6].mxu0 %v751_v6 }
 0x252   :  { %v734_v9 = vpop.permute.xlu0 %733  ;;  %4297 = vmatprep.mubr.msk.f32.mxu0 %vm247_vm8, %v4659_v62  ;;  %v1237_v62 = vsel %vm1236_vm6, %v5389_v8, 0  ;;  %vm1339_vm4 = vcmp.lt.s32.totalorder %v4335_v5, 7 }
 0x253   :  { %v749_v11 = vsel %vm747_vm9, %v746_v7, %v734_v9  ;;  %vm1240_vm15 = vcmp.lt.s32.totalorder %v1237_v62, 7  ;;  %v1430_v7 = vadd.s32 4, %v5389_v8  ;;  %v1150_v9 = vadd.s32 8, %v1148_v2 }
 0x254   :  { %v752_v12 = vsel %vm750_vm10, %v749_v11, %v742_v10  ;;  %v1241_v11 = vsel %vm1240_vm15, %v1237_v62, 7 }
 0x255   :  { %835 = vmatmul.mubr.f32.gmra.mrb[8].mxu0 %v752_v12  ;;  %v1055_v12 = vsel %vm1053_vm0, 1.0, %v5245_v17  ;;  %v4339_v13 = vadd.s32 4294967294, %v1430_v7  ;;  %vm1152_vm5 = vcmp.eq.s32.totalorder %v5396_v14, %v1150_v9  ;;  %vm1246_vm6 = vcmp.eq.s32.totalorder %v5396_v14, %v1241_v11 }
 0x256   :  { %4713 = vmatprep.mubr.msk.f32.mxu0 %vm852_vm12, %v5546_v15 }
 0x257   :  { %vm1438_vm11 = vcmp.lt.s32.totalorder %v4339_v13, 7 }
 0x324   :  { %v831_v18 = vpop.f32.mrb[6].mxu0 }
 0x325   :  { %v832_v19 = vadd.f32 %v4295_v16, %v831_v18  ;;  %v833_v20 = vpop.f32.mrb[7].mxu0  ;;  %v1153_v18 = vsel %vm1151_vm2, 1.0, %v5245_v17 }
 0x327   :  { %v842_v23 = vmul.f32 0.2, %v832_v19  ;;  %vm840_vm13 = vcmp.ge.f32.partialorder %v832_v19, 0.0 }
 0x328   :  { %v836_v21 = vpop.f32.mrb[8].mxu0 }
 0x329   :  { %v837_v24 = vadd.f32 %v4295_v16, %v836_v21  ;;  %v838_v25 = vpop.f32.mrb[9].mxu0  ;;  %v844_v28 = vsel %vm840_vm13, %v832_v19, %v842_v23  ;;  %vm1337_vm13 = vcmp.gt.s32.totalorder %v4336_v55, 0  ;;  %v1437_v16 = vsel %vm1436_vm1, %v4340_v63, 0  ;;  %v4322_v63 = vld [vmem:[%s6188_s2 + $0x130] sm:$0xff] }
 0x32a   :  { %v1338_v6 = vsel %vm1337_vm13, %v4336_v55, 0  ;;  %v1340_v21 = vsel %vm1339_vm4, %v4335_v5, 7  ;;  %vm1440_vm7 = vcmp.lt.s32.totalorder %v1437_v16, 7  ;;  %v1154_v23 = vsel %vm1152_vm5, 1.0, %v5245_v17  ;;  %v4317_v55 = vld [vmem:[%s6188_s2 + $0x108] sm:$0xff] }
 0x32b   :  { %vm841_vm14 = vcmp.ge.f32.partialorder %v837_v24, 0.0  ;;  %v843_v27 = vmul.f32 0.2, %v837_v24  ;;  %vm1341_vm3 = vcmp.lt.s32.totalorder %v1338_v6, 7  ;;  %v5055_v56 = vpack.c.bf16 %v4317_v55, %v4316_v54 }
 0x32c   :  { %v1342_v20 = vsel %vm1341_vm3, %v1338_v6, 7  ;;  %vm1810_vm4 = vcmp.ge.s32.totalorder %v5389_v8, 4  ;;  %vm2055_vm5 = vcmp.ge.s32.totalorder %v5396_v14, 4 }
 0x32d   :  { %v845_v29 = vsel %vm841_vm14, %v837_v24, %v843_v27  ;;  %vm1242_vm14 = vcmp.lt.s32.totalorder %v1239_v58, 7  ;;  %v1248_v24 = vsel %vm1246_vm6, 1.0, %v5245_v17  ;;  %v1344_v25 = vadd.s32 8, %v1342_v20 }
 0x32e   :  { %v5008_v30 = vpack.c.bf16 %v845_v29, %v844_v28  ;;  %v1243_v10 = vsel %vm1242_vm14, %v1239_v58, 7  ;;  %vm1345_vm14 = vcmp.eq.s32.totalorder %v5396_v14, %v1340_v21  ;;  %v1441_v27 = vsel %vm1440_vm7, %v1437_v16, 7  ;;  %v4319_v58 = vld [vmem:[%s6188_s2 + $0x118] sm:$0xff] }
 0x32f   :  { %v1245_v19 = vadd.s32 8, %v1243_v10  ;;  %vm1346_vm15 = vcmp.eq.s32.totalorder %v5396_v14, %v1344_v25  ;;  %v5058_v59 = vpack.c.bf16 %v4319_v58, %v4318_v57 }
 0x330   :  { %5009 = vmatprep.subr.bf16.mxu1 %v5008_v30 }
 0x331   :  { %5011 = vmatpush3.bf16.msra.mxu1 %v5008_v30  ;;  %vm1247_vm13 = vcmp.eq.s32.totalorder %v5396_v14, %v1245_v19  ;;  %v1347_v30 = vsel %vm1345_vm14, 1.0, %v5245_v17  ;;  %vm2824_vm14 = vcmask 195584  }
 0x334   :  { %4665 = vmatmul.mubr.msk.f32.vlgmr.msra.gmra.mrb[8].mxu1 %vm852_vm12, %v5558_v31 }
 0x335   :  { %4671 = vmatprep.mubr.msk.f32.mxu1 %vm852_vm12, %v5546_v15 }
 0x407   :  { %v4666_v32 = vpop.f32.mrb[8].mxu1 }
 0x408   :  { %v935_v33 = vsub.f32 %v845_v29, %v4666_v32  ;;  %v925_v34 = vpop.f32.mrb[9].mxu1  ;;  %v1249_v29 = vsel %vm1247_vm13, 1.0, %v5245_v17  ;;  %v1443_v32 = vadd.s32 8, %v1441_v27  ;;  %vm2145_vm13 = vcmask 64512  }
 0x409   :  { %v934_v35 = vsub.f32 %v844_v28, %v925_v34  ;;  %v1439_v28 = vsel %vm1438_vm11, %v4339_v13, 7 }
 0x40a   :  { %v937_v36 = vmul.f32 %v935_v33, %v935_v33  ;;  %vm1444_vm0 = vcmp.eq.s32.totalorder %v5396_v14, %v1439_v28  ;;  %vm1445_vm1 = vcmp.eq.s32.totalorder %v5396_v14, %v1443_v32 }
 0x40b   :  { %v936_v37 = vmul.f32 %v934_v35, %v934_v35  ;;  %v1446_v34 = vsel %vm1444_vm0, 1.0, %v5245_v17 }
 0x40d   :  { %v5012_v38 = vpack.c.bf16 %v937_v36, %v936_v37  ;;  %v4304_v36 = vld [vmem:[%s6188_s2 + $0xa0] sm:$0xff]  ;;  %v4305_v37 = vld [vmem:[%s6188_s2 + $0xa8] sm:$0xff] }
 0x40e   :  { %v5037_v39 = vpack.c.bf16 %v4305_v37, %v4304_v36 }
 0x40f   :  { %5013 = vmatprep.subr.bf16.mxu1 %v5012_v38 }
 0x410   :  { %5015 = vmatpush3.bf16.msra.mxu1 %v5012_v38  ;;  %v4306_v38 = vld [vmem:[%s6188_s2 + $0xb0] sm:$0xff] }
 0x413   :  { %4672 = vmatmul.mubr.msk.f32.vlgmr.msra.gmra.mrb[10].mxu1 %vm852_vm12, %v5558_v31 }
 0x414   :  { %4678 = vmatprep.mubr.msk.f32.mxu1 %vm852_vm12, %v1054_v41  ;;  %v5040_v41 = vpack.c.bf16 %v4307_v40, %v4306_v38 }
 0x4e6   :  { %v4673_v45 = vpop.f32.mrb[10].mxu1 }
 0x4e7   :  { %v1010_v46 = vadd.f32 1e-05, %v4673_v45  ;;  %v1004_v47 = vpop.f32.mrb[11].mxu1  ;;  %v4310_v45 = vld [vmem:[%s6188_s2 + $0xd0] sm:$0xff] }
 0x4e8   :  { %v1005_v49 = vadd.f32 1e-05, %v1004_v47 }
 0x4e9   :  { %5168 = vrsqrt.f32 %v1010_v46  ;;  %v4311_v46 = vld [vmem:[%s6188_s2 + $0xd8] sm:$0xff] }
 0x4ea   :  { %5170 = vrsqrt.f32 %v1005_v49  ;;  %v5046_v47 = vpack.c.bf16 %v4311_v46, %v4310_v45  ;;  %v4313_v49 = vld [vmem:[%s6188_s2 + $0xe8] sm:$0xff] }
 0x4eb   :  { %v5049_v50 = vpack.c.bf16 %v4313_v49, %v4312_v48 }
 0x4f3   :  { %v5169_v60 = vpop.eup %5168 }
 0x4f4   :  { %v5171_v0 = vpop.eup %5170  ;;  %v1016_v1 = vmul.f32 %v5169_v60, %v935_v33  ;;  %v1348_v33 = vsel %vm1346_vm15, 1.0, %v5245_v17  ;;  %v4320_v60 = vld [vmem:[%s6188_s2 + $0x120] sm:$0xff] }
 0x4f5   :  { %v1015_v3 = vmul.f32 %v5171_v0, %v934_v35  ;;  %v1447_v35 = vsel %vm1445_vm1, 1.0, %v5245_v17  ;;  %v5061_v62 = vpack.c.bf16 %v4321_v61, %v4320_v60  ;;  %v4323_v0 = vld [vmem:[%s6188_s2 + $0x138] sm:$0xff]  ;;  %s5258_s2 = smov 104  }
 0x4f7   :  { %v5016_v22 = vpack.c.bf16 %v1016_v1, %v1015_v3  ;;  %v5064_v1 = vpack.c.bf16 %v4323_v0, %v4322_v63 }
 0x4f9   :  { %5017 = vmatprep.subr.bf16.mxu1 %v5016_v22 }
 0x4fa   :  { %5019 = vmatpush3.bf16.msra.mxu1 %v5016_v22 }
 0x4fb   :  { %5021 = vmatprep.subr.bf16.mxu1 %v5016_v22 }
 0x4fd   :  { %4679 = vmatmul.mubr.msk.f32.vlgmr.msra.gmra.mrb[12].mxu1 %vm852_vm12, %v1055_v12 }
 0x4fe   :  { %5023 = vmatpush3.bf16.msra.mxu1 %v5016_v22  ;;  %4685 = vmatprep.mubr.msk.f32.mxu1 %vm852_vm12, %v1153_v18 }
 0x4ff   :  { %5025 = vmatprep.subr.bf16.mxu1 %v5016_v22 }
 0x501   :  { %4686 = vmatmul.mubr.msk.f32.vlgmr.msra.gmra.mrb[14].mxu1 %vm852_vm12, %v1154_v23 }
 0x502   :  { %5027 = vmatpush3.bf16.msra.mxu1 %v5016_v22  ;;  %4692 = vmatprep.mubr.msk.f32.mxu1 %vm852_vm12, %v1248_v24 }
 0x503   :  { %5029 = vmatprep.subr.bf16.mxu1 %v5016_v22 }
 0x505   :  { %4693 = vmatmul.mubr.msk.f32.vlgmr.msra.gmra.mrb[16].mxu1 %vm852_vm12, %v1249_v29  ;;  %v4343_v29 = vld [vmem:[%s6189_s3 + $0x1] ss:$0 sm:$0xff]  ;;  %s6178_s3 = smov 40  }
 0x506   :  { %5031 = vmatpush3.bf16.msra.mxu1 %v5016_v22  ;;  %4699 = vmatprep.mubr.msk.f32.mxu1 %vm852_vm12, %v1347_v30 }
 0x507   :  { %5033 = vmatprep.subr.bf16.mxu1 %v5016_v22 }
 0x509   :  { %4700 = vmatmul.mubr.msk.f32.vlgmr.msra.gmra.mrb[18].mxu1 %vm852_vm12, %v1348_v33 }
 0x50a   :  { %5035 = vmatpush3.bf16.msra.mxu1 %v5016_v22  ;;  %4706 = vmatprep.mubr.msk.f32.mxu1 %vm852_vm12, %v1446_v34 }
 0x50b   :  { %5036 = vmatprep.subr.bf16.mxu1 %v5246_v26 }
 0x50d   :  { %4707 = vmatmul.mubr.msk.f32.vlgmr.msra.gmra.mrb[20].mxu1 %vm852_vm12, %v1447_v35 }
 0x50e   :  { %5038 = vmatpush1.bf16.msra.mxu1 %v5037_v39 }
 0x50f   :  { %5039 = vmatprep.subr.bf16.mxu1 %v5246_v26 }
 0x512   :  { %5041 = vmatpush1.bf16.msra.mxu1 %v5040_v41 }
 0x513   :  { %5042 = vmatprep.subr.bf16.mxu1 %v5246_v26 }
 0x516   :  { %5044 = vmatpush1.bf16.msra.mxu1 %v5043_v44 }
 0x517   :  { %5045 = vmatprep.subr.bf16.mxu1 %v5246_v26 }
 0x51a   :  { %5047 = vmatpush1.bf16.msra.mxu1 %v5046_v47 }
 0x51b   :  { %5048 = vmatprep.subr.bf16.mxu1 %v5246_v26 }
 0x51e   :  { %5050 = vmatpush1.bf16.msra.mxu1 %v5049_v50 }
 0x51f   :  { %5051 = vmatprep.subr.bf16.mxu1 %v5246_v26 }
 0x522   :  { %5053 = vmatpush1.bf16.msra.mxu1 %v5052_v53 }
 0x523   :  { %5054 = vmatprep.subr.bf16.mxu1 %v5246_v26 }
 0x526   :  { %5056 = vmatpush1.bf16.msra.mxu1 %v5055_v56 }
 0x527   :  { %5057 = vmatprep.subr.bf16.mxu1 %v5246_v26 }
 0x52a   :  { %5059 = vmatpush1.bf16.msra.mxu1 %v5058_v59 }
 0x52b   :  { %5060 = vmatprep.subr.bf16.mxu1 %v5246_v26 }
 0x52e   :  { %5062 = vmatpush1.bf16.msra.mxu1 %v5061_v62 }
 0x52f   :  { %5063 = vmatprep.subr.bf16.mxu1 %v5246_v26 }
 0x532   :  { %5065 = vmatpush1.bf16.msra.mxu1 %v5064_v1 }
 0x533   :  { %4764 = vmatprep.subr.mxu1 %v5245_v17 }
 0x5d0   :  { %v4680_v2 = vpop.f32.mrb[12].mxu1 }
 0x5d1   :  { %v1128_v3 = vpop.f32.mrb[13].mxu1 }
 0x5d4   :  { %v4687_v4 = vpop.f32.mrb[14].mxu1 }
 0x5d5   :  { %v1227_v5 = vpop.f32.mrb[15].mxu1 }
 0x5d6   :  { %1531 = vrot.lane.b32.xlu0 %v1227_v5, %s5248_s22 }
 0x5d8   :  { %v4694_v6 = vpop.f32.mrb[16].mxu1 }
 0x5d9   :  { %v1322_v7 = vpop.f32.mrb[17].mxu1 }
 0x5da   :  { %1539 = vrot.lane.b32.xlu1 %v1322_v7, %s5249_s23 }
 0x5dc   :  { %v4701_v22 = vpop.f32.mrb[18].mxu1 }
 0x5dd   :  { %v1421_v9 = vpop.f32.mrb[19].mxu1 }
 0x5de   :  { %1533 = vrot.lane.b32.xlu1 %v4687_v4, %s5248_s22  ;;  %1547 = vrot.lane.b32.xlu0 %v1421_v9, %s5247_s1  ;;  %s6179_s22 = smov 48  }
 0x5e0   :  { %v4708_v10 = vpop.f32.mrb[20].mxu1 }
 0x5e1   :  { %v1520_v11 = vpop.f32.mrb[21].mxu1 }
 0x5e2   :  { %1549 = vrot.lane.b32.xlu1 %v4701_v22, %s5247_s1  ;;  %1541 = vrot.lane.b32.xlu0 %v4694_v6, %s5249_s23  ;;  %v1972_v6 = vld [vmem:[%s6155_s5 + $0x18] sm:$0xff] }
 0x5e3   :  { %4344 = vmatprep.mubr.msk.f32.mxu1 %vm247_vm8, %v1520_v11  ;;  %v2059_v11 = vld [vmem:[%s6158_s8 + $0x8] sm:$0xff] }
 0x648   :  { %v1532_v12 = vpop.permute.xlu0 %1531 }
 0x649   :  { %v1553_v16 = vsel %vm247_vm8, %v1128_v3, %v1532_v12  ;;  %v1970_v3 = vld [vmem:[%s6155_s5 + $0x8] sm:$0xff] }
 0x64c   :  { %v1540_v13 = vpop.permute.xlu1 %1539 }
 0x64d   :  { %v1555_v18 = vsel %vm747_vm9, %v1553_v16, %v1540_v13 }
 0x650   :  { %v1534_v19 = vpop.permute.xlu1 %1533  ;;  %v1548_v20 = vpop.permute.xlu0 %1547 }
 0x651   :  { %v1557_v21 = vsel %vm750_vm10, %v1555_v18, %v1548_v20  ;;  %v1554_v23 = vsel %vm247_vm8, %v4680_v2, %v1534_v19  ;;  %v2060_v19 = vld [vmem:[%s6158_s8 + $0x10] sm:$0xff]  ;;  %v2061_v20 = vld [vmem:[%s6158_s8 + $0x18] sm:$0xff] }
 0x652   :  { %1636 = vmatmul.mubr.f32.vlgmr.msra.gmra.mrb[22].mxu1 %v1557_v21  ;;  %v5090_v21 = vpack.c.bf16 %v2061_v20, %v2060_v19 }
 0x653   :  { %4345 = vmatprep.mubr.msk.f32.mxu1 %vm247_vm8, %v4708_v10  ;;  %v2058_v10 = vld [vmem:[%s6158_s8] sm:$0xff] }
 0x654   :  { %v1550_v24 = vpop.permute.xlu1 %1549  ;;  %v1542_v25 = vpop.permute.xlu0 %1541  ;;  %v5087_v13 = vpack.c.bf16 %v2059_v11, %v2058_v10 }
 0x655   :  { %v1556_v27 = vsel %vm747_vm9, %v1554_v23, %v1542_v25  ;;  %v4352_v23 = vld [vmem:[%s6156_s6] ss:$0 sm:$0xff]  ;;  %s5253_s6 = smov 88  }
 0x656   :  { %v1558_v28 = vsel %vm750_vm10, %v1556_v27, %v1550_v24  ;;  %vm5251_vm10 = vmmov 0   ;;  %v2053_v25 = vld [vmem:[%s6157_s7] sm:$0xff]  ;;  %s5254_s7 = smov 80  }
 0x657   :  { %1641 = vmatmul.mubr.f32.gmra.mrb[24].mxu1 %v1558_v28 }
 0x658   :  { %4766 = vmatprep.mubr.msk.f32.mxu1 %vm5251_vm10, %v5245_v17 }
 0x725   :  { %v1637_v30 = vpop.f32.mrb[22].mxu1 }
 0x726   :  { %v1639_v32 = vpop.f32.mrb[23].mxu1  ;;  %v1638_v33 = vadd.f32 %v4343_v29, %v1637_v30  ;;  %v4354_v30 = vld [vmem:[%s6159_s9] ss:$0 sm:$0xff] }
 0x728   :  { %v1648_v35 = vmul.f32 0.2, %v1638_v33  ;;  %vm1646_vm2 = vcmp.ge.f32.partialorder %v1638_v33, 0.0 }
 0x72a   :  { %v1642_v34 = vpop.f32.mrb[24].mxu1  ;;  %v1650_v39 = vsel %vm1646_vm2, %v1638_v33, %v1648_v35 }
 0x72b   :  { %v1643_v36 = vadd.f32 %v4343_v29, %v1642_v34  ;;  %v1644_v37 = vpop.f32.mrb[25].mxu1 }
 0x72d   :  { %vm1647_vm3 = vcmp.ge.f32.partialorder %v1643_v36, 0.0  ;;  %v1649_v38 = vmul.f32 0.2, %v1643_v36 }
 0x72f   :  { %v1651_v40 = vsel %vm1647_vm3, %v1643_v36, %v1649_v38 }
 0x730   :  { %v5066_v41 = vpack.c.bf16 %v1651_v40, %v1650_v39 }
 0x732   :  { %5067 = vmatprep.subr.bf16.mxu0 %v5066_v41 }
 0x733   :  { %5069 = vmatpush3.bf16.msra.mxu0 %v5066_v41 }
 0x736   :  { %4714 = vmatmul.mubr.msk.f32.vlgmr.msra.gmra.mrb[10].mxu0 %vm852_vm12, %v5558_v31 }
 0x737   :  { %4720 = vmatprep.mubr.msk.f32.mxu0 %vm852_vm12, %v5546_v15  ;;  %v5252_v15 = vmov 0  }
 0x738   :  { %v1811_v49 = vsel %vm1810_vm4, 1, %v5252_v15  ;;  %v2056_v50 = vsel %vm2055_vm5, 1, %v5252_v15 }
 0x739   :  { %vm5709_vm6 = vcmp.eq.s32.totalorder %v1811_v49, %v2056_v50  ;;  %v1814_v57 = vmul.u32 8, %v1811_v49 }
 0x809   :  { %v4715_v42 = vpop.f32.mrb[10].mxu0 }
 0x80a   :  { %v1728_v43 = vsub.f32 %v1651_v40, %v4715_v42  ;;  %v1718_v44 = vpop.f32.mrb[11].mxu0 }
 0x80b   :  { %v1727_v45 = vsub.f32 %v1650_v39, %v1718_v44 }
 0x80c   :  { %v1730_v46 = vmul.f32 %v1728_v43, %v1728_v43 }
 0x80d   :  { %v1729_v47 = vmul.f32 %v1727_v45, %v1727_v45 }
 0x80f   :  { %v5070_v48 = vpack.c.bf16 %v1730_v46, %v1729_v47 }
 0x811   :  { %5071 = vmatprep.subr.bf16.mxu0 %v5070_v48 }
 0x812   :  { %5073 = vmatpush3.bf16.msra.mxu0 %v5070_v48 }
 0x813   :  { %5074 = vmatprep.subr.bf16.mxu0 %v5246_v26 }
 0x815   :  { %4721 = vmatmul.mubr.msk.f32.vlgmr.msra.gmra.mrb[12].mxu0 %vm852_vm12, %v5558_v31  ;;  %v1812_v31 = vmul.u32 4, %v1811_v49 }
 0x816   :  { %4727 = vmatprep.mubr.msk.f32.mxu0 %vm5251_vm10, %v5245_v17 }
 0x817   :  { %v1813_v56 = vsub.s32 %v5389_v8, %v1812_v31  ;;  %v1969_v8 = vld [vmem:[%s6155_s5] sm:$0xff] }
 0x818   :  { %v5081_v5 = vpack.c.bf16 %v1970_v3, %v1969_v8 }
 0x819   :  { %v1815_v58 = vmul.u32 2, %v1813_v56 }
 0x81b   :  { %v1816_v59 = vadd.s32 %v1815_v58, %v1814_v57 }
 0x81d   :  { %vm1817_vm7 = vcmp.eq.s32.totalorder %v5396_v14, %v1816_v59  ;;  %v1892_v0 = vadd.s32 1, %v1816_v59 }
 0x81e   :  { %v1818_v2 = vsel %vm1817_vm7, 1.0, %v5245_v17 }
 0x81f   :  { %vm1893_vm11 = vcmp.eq.s32.totalorder %v5396_v14, %v1892_v0  ;;  %v1971_v14 = vld [vmem:[%s6155_s5 + $0x10] sm:$0xff]  ;;  %s5259_s5 = smov 56  }
 0x820   :  { %v1894_v4 = vsel %vm1893_vm11, 1.0, %v5245_v17  ;;  %v5084_v7 = vpack.c.bf16 %v1972_v6, %v1971_v14 }
 0x8e8   :  { %v4722_v52 = vpop.f32.mrb[12].mxu0 }
 0x8e9   :  { %v1803_v53 = vadd.f32 1e-05, %v4722_v52  ;;  %v1797_v54 = vpop.f32.mrb[13].mxu0 }
 0x8ea   :  { %v1798_v55 = vadd.f32 1e-05, %v1797_v54 }
 0x8eb   :  { %5172 = vrsqrt.f32 %v1803_v53 }
 0x8ec   :  { %5174 = vrsqrt.f32 %v1798_v55 }
 0x8f5   :  { %v5173_v60 = vpop.eup %5172 }
 0x8f6   :  { %v5175_v61 = vpop.eup %5174  ;;  %v1809_v62 = vmul.f32 %v5173_v60, %v1728_v43 }
 0x8f7   :  { %v1808_v63 = vmul.f32 %v5175_v61, %v1727_v45 }
 0x8f9   :  { %v5075_v1 = vpack.c.bf16 %v1809_v62, %v1808_v63 }
 0x8fb   :  { %5076 = vmatpush3.bf16.msra.mxu0 %v5075_v1 }
 0x8fc   :  { %5077 = vmatprep.subr.bf16.mxu0 %v5246_v26 }
 0x8fe   :  { %4728 = vmatmul.mubr.msk.f32.vlgmr.msra.gmra.mrb[14].mxu0 %vm852_vm12, %v1818_v2 }
 0x8ff   :  { %5079 = vmatpush3.bf16.msra.mxu0 %v5075_v1  ;;  %4734 = vmatprep.mubr.msk.f32.mxu0 %vm5251_vm10, %v5245_v17 }
 0x900   :  { %5080 = vmatprep.subr.bf16.mxu0 %v5246_v26 }
 0x902   :  { %4735 = vmatmul.mubr.msk.f32.vlgmr.msra.gmra.mrb[16].mxu0 %vm852_vm12, %v1894_v4 }
 0x903   :  { %5082 = vmatpush3.bf16.msra.mxu0 %v5081_v5  ;;  %4745 = vmatprep.mubr.msk.f32.mxu0 %vm5251_vm10, %v5245_v17 }
 0x904   :  { %5083 = vmatprep.subr.bf16.mxu0 %v5246_v26 }
 0x907   :  { %5085 = vmatpush3.bf16.msra.mxu0 %v5084_v7 }
 0x908   :  { %5086 = vmatprep.subr.bf16.mxu0 %v5246_v26 }
 0x9d1   :  { %v1888_v22 = vpop.f32.mrb[14].mxu0 }
 0x9d2   :  { %v4729_v9 = vpop.f32.mrb[15].mxu0 }
 0x9d5   :  { %v1964_v12 = vpop.f32.mrb[16].mxu0 }
 0x9d6   :  { %v1968_v16 = vmax.f32 %v1888_v22, %v1964_v12  ;;  %v4736_v18 = vpop.f32.mrb[17].mxu0 }
 0x9d8   :  { %4746 = vmatmul.mubr.msk.f32.vlgmr.msra.gmra.mrb[18].mxu0 %vm247_vm8, %v1968_v16 }
 0x9d9   :  { %5088 = vmatpush3.bf16.msra.mxu0 %v5087_v13  ;;  %4756 = vmatprep.mubr.msk.f32.mxu0 %vm5251_vm10, %v5245_v17 }
 0x9da   :  { %5089 = vmatprep.subr.bf16.mxu0 %v5246_v26 }
 0x9dd   :  { %5091 = vmatpush3.bf16.msra.mxu0 %v5090_v21 }
 0x9de   :  { %4759 = vmatprep.subr.mxu0 %v5245_v17 }
 0xaab   :  { %v2049_v24 = vpop.f32.mrb[18].mxu0 }
 0xaac   :  { %v2050_v27 = vadd.f32 %v4352_v23, %v2049_v24  ;;  %v4747_v28 = vpop.f32.mrb[19].mxu0 }
 0xaae   :  { %v5763_v29 = vadd.f32 %v2053_v25, %v2050_v27 }
 0xab0   :  { %4757 = vmatmul.mubr.msk.f32.vlgmr.msra.gmra.mrb[20].mxu0 %vm247_vm8, %v5763_v29 }
 0xab1   :  { %4761 = vmatprep.mubr.msk.f32.mxu0 %vm5251_vm10, %v5245_v17 }
 0xb83   :  { %v2138_v32 = vpop.f32.mrb[20].mxu0 }
 0xb84   :  { %v5772_v33 = vadd.f32 %v4354_v30, %v2138_v32  ;;  %v4758_v34 = vpop.f32.mrb[21].mxu0 }
 0xb86   :  { %2311 = vrot.lane.b32.xlu1 %v5772_v33, %s5253_s6  ;;  %2143 = vrot.lane.b32.xlu0 %v5772_v33, %s5247_s1 }
 0xb8a   :  { %2478 = vrot.lane.b32.xlu1 %v5772_v33, %s5254_s7  ;;  %2309 = vrot.lane.b32.xlu0 %v5772_v33, %s5255_s21 }
 0xb8e   :  { %2645 = vrot.lane.b32.xlu1 %v5772_v33, %s5256_s24  ;;  %2476 = vrot.lane.b32.xlu0 %v5772_v33, %s5257_s25 }
 0xb92   :  { %2643 = vrot.lane.b32.xlu0 %v5772_v33, %s5258_s2 }
 0xbf8   :  { %v2312_v35 = vpop.permute.xlu1 %2311  ;;  %v2144_v36 = vpop.permute.xlu0 %2143 }
 0xbf9   :  { %4760 = vmatpush3.xpose.msk.msra.mxu0 %vm2145_vm13, %v2144_v36 }
 0xbfa   :  { %4769 = vmatprep.subr.mxu0 %v5245_v17 }
 0xbfc   :  { %4762 = vmatmul.mubr.msk.f32.vlgmr.msra.gmra.mrb[22].mxu0 %vm2145_vm13, %v5772_v33  ;;  %v2310_v37 = vpop.permute.xlu0 %2309  ;;  %v2479_v38 = vpop.permute.xlu1 %2478 }
 0xbfd   :  { %4770 = vmatpush3.xpose.msk.msra.mxu0 %vm2145_vm13, %v2312_v35  ;;  %4771 = vmatprep.mubr.msk.f32.mxu0 %vm5251_vm10, %v5245_v17 }
 0xbfe   :  { %4779 = vmatprep.subr.mxu0 %v5245_v17 }
 0xc00   :  { %4772 = vmatmul.mubr.msk.f32.vlgmr.msra.gmra.mrb[24].mxu0 %vm2145_vm13, %v2310_v37  ;;  %v2477_v39 = vpop.permute.xlu0 %2476  ;;  %v2646_v40 = vpop.permute.xlu1 %2645 }
 0xc01   :  { %4780 = vmatpush3.xpose.msk.msra.mxu0 %vm2145_vm13, %v2479_v38  ;;  %4781 = vmatprep.mubr.msk.f32.mxu0 %vm5251_vm10, %v5245_v17  ;;  %v2826_v38 = vld [vmem:[%s6160_s10] sm:$0xff] }
 0xc02   :  { %4789 = vmatprep.subr.mxu0 %v5245_v17 }
 0xc04   :  { %4782 = vmatmul.mubr.msk.f32.vlgmr.msra.gmra.mrb[26].mxu0 %vm2145_vm13, %v2477_v39  ;;  %v2644_v41 = vpop.permute.xlu0 %2643  ;;  %v2827_v39 = vld [vmem:[%s6160_s10 + $0x8] sm:$0xff] }
 0xc05   :  { %4790 = vmatpush3.xpose.msk.msra.mxu0 %vm2145_vm13, %v2646_v40  ;;  %4791 = vmatprep.mubr.msk.f32.mxu0 %vm5251_vm10, %v5245_v17  ;;  %v5093_v40 = vpack.c.bf16 %v2827_v39, %v2826_v38 }
 0xc06   :  { %5092 = vmatprep.subr.bf16.mxu0 %v5246_v26 }
 0xc08   :  { %4792 = vmatmul.mubr.msk.f32.vlgmr.msra.gmra.mrb[28].mxu0 %vm2145_vm13, %v2644_v41 }
 0xc09   :  { %4807 = vmatprep.mubr.msk.f32.mxu0 %vm5251_vm10, %v5245_v17  ;;  %5094 = vmatpush3.bf16.msra.mxu0 %v5093_v40 }
 0xc0a   :  { %5095 = vmatprep.subr.bf16.mxu0 %v5246_v26 }
 0xccf   :  { %v2216_v42 = vpop.f32.mrb[22].mxu0 }
 0xcd0   :  { %v2220_v43 = vmul.f32 0.35355338, %v2216_v42  ;;  %v4763_v44 = vpop.f32.mrb[23].mxu0 }
 0xcd2   :  { %v2221_v45 = vsel %vm5709_vm6, %v2220_v43, -1e+30 }
 0xcd3   :  { %v2383_v46 = vpop.f32.mrb[24].mxu0  ;;  %v2222_v47 = vsel %vm2145_vm13, %v2221_v45, -inf }
 0xcd4   :  { %v2387_v48 = vmul.f32 0.35355338, %v2383_v46  ;;  %2223 = vmax.xlane.f32.xlu1 %v2222_v47  ;;  %v4773_v15 = vpop.f32.mrb[25].mxu0  ;;  %v2829_v46 = vld [vmem:[%s6160_s10 + $0x18] sm:$0xff] }
 0xcd6   :  { %v2388_v49 = vsel %vm5709_vm6, %v2387_v48, -1e+30 }
 0xcd7   :  { %v2550_v50 = vpop.f32.mrb[26].mxu0  ;;  %v2389_v52 = vsel %vm2145_vm13, %v2388_v49, -inf }
 0xcd8   :  { %v2554_v31 = vmul.f32 0.35355338, %v2550_v50  ;;  %2390 = vmax.xlane.f32.xlu0 %v2389_v52  ;;  %v4783_v53 = vpop.f32.mrb[27].mxu0 }
 0xcda   :  { %v2555_v54 = vsel %vm5709_vm6, %v2554_v31, -1e+30 }
 0xcdb   :  { %v2717_v55 = vpop.f32.mrb[28].mxu0  ;;  %v2556_v56 = vsel %vm2145_vm13, %v2555_v54, -inf }
 0xcdc   :  { %v2721_v57 = vmul.f32 0.35355338, %v2717_v55  ;;  %2557 = vmax.xlane.f32.xlu0 %v2556_v56  ;;  %v4793_v58 = vpop.f32.mrb[29].mxu0 }
 0xcde   :  { %v2722_v59 = vsel %vm5709_vm6, %v2721_v57, -1e+30  ;;  %v4368_v57 = vld [vmem:[%s6161_s11] ss:$0 sm:$0xff] }
 0xcdf   :  { %v2723_v60 = vsel %vm2145_vm13, %v2722_v59, -inf }
 0xce0   :  { %2724 = vmax.xlane.f32.xlu1 %v2723_v60 }
 0xcf1   :  { %2400 = vrot.lane.b32.xlu1 %v5772_v33, %s5259_s5 }
 0xd61   :  { %v2224_v61 = vpop.xlane.xlu1 %2223 }
 0xd62   :  { %v2225_v62 = vsub.f32 %v2221_v45, %v2224_v61  ;;  %v2828_v45 = vld [vmem:[%s6160_s10 + $0x10] sm:$0xff] }
 0xd63   :  { %v5096_v47 = vpack.c.bf16 %v2829_v46, %v2828_v45 }
 0xd64   :  { %v2226_v63 = vmul.f32 1.442695, %v2225_v62 }
 0xd65   :  { %v2391_v0 = vpop.xlane.xlu0 %2390  ;;  %5097 = vmatpush3.bf16.msra.mxu0 %v5096_v47 }
 0xd66   :  { %5176 = vpow2.f32 %v2226_v63  ;;  %v2392_v1 = vsub.f32 %v2388_v49, %v2391_v0  ;;  %5104 = vmatprep.subr.bf16.mxu0 %v5246_v26 }
 0xd68   :  { %v2393_v2 = vmul.f32 1.442695, %v2392_v1 }
 0xd69   :  { %v2558_v10 = vpop.xlane.xlu0 %2557 }
 0xd6a   :  { %5178 = vpow2.f32 %v2393_v2  ;;  %v2559_v11 = vsub.f32 %v2555_v54, %v2558_v10 }
 0xd6c   :  { %v2560_v12 = vmul.f32 1.442695, %v2559_v11  ;;  %v4370_v11 = vld [vmem:[%s6162_s12] ss:$0 sm:$0xff] }
 0xd6d   :  { %v2725_v8 = vpop.xlane.xlu1 %2724 }
 0xd6e   :  { %v2726_v3 = vsub.f32 %v2722_v59, %v2725_v8 }
 0xd70   :  { %v5177_v4 = vpop.eup %5176  ;;  %v2727_v5 = vmul.f32 1.442695, %v2726_v3  ;;  %v2941_v3 = vld [vmem:[%s6164_s14] sm:$0xff] }
 0xd71   :  { %v2228_v14 = vsel %vm2145_vm13, %v5177_v4, 0.0  ;;  %v2401_v18 = vpop.permute.xlu1 %2400 }
 0xd72   :  { %5180 = vpow2.f32 %v2727_v5  ;;  %2229 = vadd.xlane.f32.xlu0 %v2228_v14  ;;  %v2944_v14 = vld [vmem:[%s6164_s14 + $0x18] sm:$0xff] }
 0xd73   :  { %5182 = vpow2.f32 %v2560_v12 }
 0xd74   :  { %v5179_v6 = vpop.eup %5178 }
 0xd75   :  { %v2395_v7 = vsel %vm2145_vm13, %v5179_v6, 0.0 }
 0xd76   :  { %2396 = vadd.xlane.f32.xlu1 %v2395_v7 }
 0xd7c   :  { %v5181_v22 = vpop.eup %5180 }
 0xd7d   :  { %v2729_v9 = vsel %vm2145_vm13, %v5181_v22, 0.0  ;;  %v5183_v13 = vpop.eup %5182 }
 0xd7e   :  { %2730 = vadd.xlane.f32.xlu1 %v2729_v9  ;;  %v2562_v16 = vsel %vm2145_vm13, %v5183_v13, 0.0 }
 0xd88   :  { %2233 = vrot.lane.b32.xlu0 %v5772_v33, %s5249_s23 }
 0xd8f   :  { %2567 = vrot.lane.b32.xlu1 %v5772_v33, %s6179_s22  ;;  %s6195_s22 = smov 16  }
 0xda7   :  { %2563 = vadd.xlane.f32.xlu0 %v2562_v16 }
 0xdbd   :  { %2734 = vrot.lane.b32.xlu0 %v5772_v33, %s6178_s3 }
 0xdff   :  { %v2230_v19 = vpop.xlane.xlu0 %2229 }
 0xe00   :  { %5184 = vrcp.f32 %v2230_v19  ;;  %v3034_v19 = vld [vmem:[%s6166_s16] sm:$0xff] }
 0xe03   :  { %v2234_v20 = vpop.permute.xlu0 %2233  ;;  %v2397_v21 = vpop.xlane.xlu1 %2396 }
 0xe04   :  { %5186 = vrcp.f32 %v2397_v21  ;;  %4765 = vmatpush3.msra.mxu1 %v2234_v20  ;;  %v3035_v20 = vld [vmem:[%s6166_s16 + $0x8] sm:$0xff] }
 0xe05   :  { %4774 = vmatprep.subr.mxu1 %v5245_v17  ;;  %v5105_v21 = vpack.c.bf16 %v3035_v20, %v3034_v19 }
 0xe0a   :  { %v5185_v23 = vpop.eup %5184 }
 0xe0b   :  { %v2232_v24 = vmul.f32 %v5185_v23, %v5177_v4  ;;  %v2731_v25 = vpop.xlane.xlu1 %2730  ;;  %v2942_v4 = vld [vmem:[%s6164_s14 + $0x8] sm:$0xff]  ;;  %v3036_v23 = vld [vmem:[%s6166_s16 + $0x10] sm:$0xff] }
 0xe0c   :  { %v5099_v5 = vpack.c.bf16 %v2942_v4, %v2941_v3  ;;  %v4376_v3 = vld [vmem:[%s6168_s18] ss:$0 sm:$0xff] }
 0xe0d   :  { %4767 = vmatmul.mubr.msk.f32.vlgmr.msra.gmra.mrb[26].mxu1 %vm2145_vm13, %v2232_v24  ;;  %v3037_v24 = vld [vmem:[%s6166_s16 + $0x18] sm:$0xff] }
 0xe0e   :  { %v5187_v27 = vpop.eup %5186  ;;  %4775 = vmatpush3.msra.mxu1 %v2401_v18  ;;  %4776 = vmatprep.mubr.msk.f32.mxu1 %vm5251_vm10, %v5245_v17 }
 0xe0f   :  { %v2399_v28 = vmul.f32 %v5187_v27, %v5179_v6  ;;  %v2568_v30 = vpop.permute.xlu1 %2567  ;;  %4784 = vmatprep.subr.mxu1 %v5245_v17  ;;  %v3038_v27 = vld [vmem:[%s6166_s16 + $0x20] sm:$0xff] }
 0xe11   :  { %4777 = vmatmul.mubr.msk.f32.vlgmr.msra.gmra.mrb[28].mxu1 %vm2145_vm13, %v2399_v28  ;;  %v3039_v28 = vld [vmem:[%s6166_s16 + $0x28] sm:$0xff] }
 0xe12   :  { %4785 = vmatpush3.msra.mxu1 %v2568_v30  ;;  %4786 = vmatprep.mubr.msk.f32.mxu1 %vm5251_vm10, %v5245_v17  ;;  %v5111_v30 = vpack.c.bf16 %v3039_v28, %v3038_v27 }
 0xe13   :  { %4794 = vmatprep.subr.mxu1 %v5245_v17 }
 0xe34   :  { %v2564_v32 = vpop.xlane.xlu0 %2563 }
 0xe35   :  { %5188 = vrcp.f32 %v2564_v32  ;;  %v3040_v32 = vld [vmem:[%s6166_s16 + $0x30] sm:$0xff] }
 0xe36   :  { %5190 = vrcp.f32 %v2731_v25  ;;  %v5108_v25 = vpack.c.bf16 %v3037_v24, %v3036_v23 }
 0xe38   :  { %v2735_v36 = vpop.permute.xlu0 %2734 }
 0xe3f   :  { %v5189_v33 = vpop.eup %5188 }
 0xe40   :  { %v2566_v34 = vmul.f32 %v5189_v33, %v5183_v13  ;;  %v5191_v35 = vpop.eup %5190  ;;  %v4371_v13 = vld [vmem:[%s6163_s13] ss:$0 sm:$0xff]  ;;  %v3041_v33 = vld [vmem:[%s6166_s16 + $0x38] sm:$0xff] }
 0xe41   :  { %v2733_v37 = vmul.f32 %v5191_v35, %v5181_v22  ;;  %v4372_v35 = vld [vmem:[%s6165_s15] ss:$0 sm:$0xff] }
 0xe42   :  { %4787 = vmatmul.mubr.msk.f32.vlgmr.msra.gmra.mrb[30].mxu1 %vm2145_vm13, %v2566_v34  ;;  %v5114_v34 = vpack.c.bf16 %v3041_v33, %v3040_v32 }
 0xe43   :  { %4795 = vmatpush3.msra.mxu1 %v2735_v36  ;;  %4796 = vmatprep.mubr.msk.f32.mxu1 %vm5251_vm10, %v5245_v17 }
 0xe44   :  { %5098 = vmatprep.subr.bf16.mxu1 %v5246_v26 }
 0xe46   :  { %4797 = vmatmul.mubr.msk.f32.vlgmr.msra.gmra.mrb[32].mxu1 %vm2145_vm13, %v2733_v37 }
 0xe47   :  { %4818 = vmatprep.mubr.msk.f32.mxu1 %vm5251_vm10, %v5245_v17  ;;  %5100 = vmatpush3.bf16.msra.mxu1 %v5099_v5  ;;  %v4377_v5 = vld [vmem:[%s6169_s19] ss:$0 sm:$0xff] }
 0xe48   :  { %5101 = vmatprep.subr.bf16.mxu1 %v5246_v26 }
 0xee0   :  { %v2305_v41 = vpop.f32.mrb[26].mxu1 }
 0xee1   :  { %v4768_v42 = vpop.f32.mrb[27].mxu1 }
 0xee4   :  { %v2472_v43 = vpop.f32.mrb[28].mxu1 }
 0xee5   :  { %2811 = vrot.lane.b32.xlu1 %v2472_v43, %s6177_s29  ;;  %v4778_v44 = vpop.f32.mrb[29].mxu1 }
 0xf15   :  { %v2639_v48 = vpop.f32.mrb[30].mxu1 }
 0xf16   :  { %2815 = vrot.lane.b32.xlu0 %v2639_v48, %s6176_s28  ;;  %v4788_v15 = vpop.f32.mrb[31].mxu1  ;;  %v4374_v48 = vld [vmem:[%s6167_s17] ss:$0 sm:$0xff] }
 0xf19   :  { %v2806_v49 = vpop.f32.mrb[32].mxu1 }
 0xf1a   :  { %2819 = vrot.lane.b32.xlu1 %v2806_v49, %s6175_s4  ;;  %v4798_v50 = vpop.f32.mrb[33].mxu1  ;;  %s6196_s4 = smov 24  }
 0xf57   :  { %v2812_v52 = vpop.permute.xlu1 %2811 }
 0xf58   :  { %v2822_v53 = vsel %vm2145_vm13, %v2305_v41, %v2812_v52 }
 0xf88   :  { %v2816_v31 = vpop.permute.xlu0 %2815 }
 0xf89   :  { %v2823_v54 = vsel %vm852_vm12, %v2822_v53, %v2816_v31 }
 0xf8c   :  { %v2820_v55 = vpop.permute.xlu1 %2819 }
 0xf8d   :  { %v2825_v56 = vsel %vm2824_vm14, %v2823_v54, %v2820_v55 }
 0xf8e   :  { %4808 = vmatmul.mubr.msk.f32.vlgmr.msra.gmra.mrb[30].mxu0 %vm247_vm8, %v2825_v56 }
 0xf8f   :  { %4837 = vmatprep.mubr.msk.f32.mxu0 %vm5251_vm10, %v5245_v17  ;;  %5106 = vmatpush3.bf16.msra.mxu0 %v5105_v21 }
 0xf90   :  { %5107 = vmatprep.subr.bf16.mxu0 %v5246_v26 }
 0xf93   :  { %5109 = vmatpush3.bf16.msra.mxu0 %v5108_v25 }
 0xf94   :  { %5110 = vmatprep.subr.bf16.mxu0 %v5246_v26 }
 0xf97   :  { %5112 = vmatpush3.bf16.msra.mxu0 %v5111_v30 }
 0xf98   :  { %5113 = vmatprep.subr.bf16.mxu0 %v5246_v26 }
 0xf9b   :  { %5115 = vmatpush3.bf16.msra.mxu0 %v5114_v34 }
 0xf9c   :  { %4861 = vmatprep.subr.mxu0 %v5245_v17 }
0x1061   :  { %v2906_v58 = vpop.f32.mrb[30].mxu0 }
0x1062   :  { %v2907_v59 = vadd.f32 %v4368_v57, %v2906_v58  ;;  %v4809_v60 = vpop.f32.mrb[31].mxu0  ;;  %v4378_v58 = vld [vmem:[%s6158_s8 + $0x20] sm:$0xff] }
0x1064   :  { %v2910_v61 = vadd.f32 %v2907_v59, %v5763_v29  ;;  %v2943_v29 = vld [vmem:[%s6164_s14 + $0x10] sm:$0xff]  ;;  %v4379_v59 = vld [vmem:[%s6158_s8 + $0x28] sm:$0xff] }
0x1065   :  { %v5102_v6 = vpack.c.bf16 %v2944_v14, %v2943_v29  ;;  %v5117_v60 = vpack.c.bf16 %v4379_v59, %v4378_v58 }
0x1066   :  { %v2913_v62 = vsel %vm247_vm8, %v2910_v61, 0.0 }
0x1067   :  { %2914 = vadd.xlane.f32.xlu0 %v2913_v62  ;;  %5103 = vmatpush3.bf16.msra.mxu1 %v5102_v6  ;;  %v4381_v62 = vld [vmem:[%s6158_s8 + $0x38] sm:$0xff]  ;;  %v4383_v6 = vld [vmem:[%s6159_s9 + $0x1] ss:$0 sm:$0xff]  ;;  %s6192_s9 = smov 48  }
0x1068   :  { %5116 = vmatprep.subr.bf16.mxu1 %v5246_v26 }
0x10f4   :  { %v2915_v63 = vpop.xlane.xlu0 %2914 }
0x10f5   :  { %v2917_v0 = vmul.f32 0.03125, %v2915_v63 }
0x10f7   :  { %v2918_v1 = vsub.f32 %v2910_v61, %v2917_v0  ;;  %v4380_v61 = vld [vmem:[%s6158_s8 + $0x30] sm:$0xff] }
0x10f8   :  { %v5120_v63 = vpack.c.bf16 %v4381_v62, %v4380_v61 }
0x10f9   :  { %v2919_v2 = vmul.f32 %v2918_v1, %v2918_v1 }
0x10fb   :  { %v2920_v8 = vsel %vm247_vm8, %v2919_v2, 0.0 }
0x10fc   :  { %2921 = vadd.xlane.f32.xlu1 %v2920_v8 }
0x1189   :  { %v2922_v7 = vpop.xlane.xlu1 %2921 }
0x118a   :  { %v2923_v22 = vmul.f32 0.03125, %v2922_v7 }
0x118c   :  { %v2924_v9 = vadd.f32 1e-12, %v2923_v22 }
0x118e   :  { %5192 = vrsqrt.f32 %v2924_v9 }
0x1198   :  { %v5193_v10 = vpop.eup %5192 }
0x1199   :  { %v2926_v12 = vmul.f32 %v5193_v10, %v2918_v1 }
0x119b   :  { %v2933_v16 = vmul.f32 %v4370_v11, %v2926_v12 }
0x119d   :  { %v2940_v18 = vadd.f32 %v4371_v13, %v2933_v16 }
0x119f   :  { %4819 = vmatmul.mubr.msk.f32.vlgmr.msra.gmra.mrb[34].mxu1 %vm247_vm8, %v2940_v18 }
0x11a0   :  { %4848 = vmatprep.mubr.msk.f32.mxu1 %vm5251_vm10, %v5245_v17  ;;  %5118 = vmatpush3.bf16.msra.mxu1 %v5117_v60 }
0x11a1   :  { %5119 = vmatprep.subr.bf16.mxu1 %v5246_v26 }
0x11a4   :  { %5121 = vmatpush3.bf16.msra.mxu1 %v5120_v63 }
0x11a5   :  { %4851 = vmatprep.subr.mxu1 %v5245_v17 }
0x1272   :  { %v3021_v36 = vpop.f32.mrb[34].mxu1 }
0x1273   :  { %v3022_v37 = vadd.f32 %v4372_v35, %v3021_v36  ;;  %v4820_v38 = vpop.f32.mrb[35].mxu1 }
0x1275   :  { %v3026_v39 = vmul.f32 0.044715, %v3022_v37  ;;  %v3025_v45 = vmul.f32 0.5, %v3022_v37 }
0x1277   :  { %v3027_v40 = vmul.f32 %v3026_v39, %v3022_v37 }
0x1279   :  { %v3028_v41 = vmul.f32 %v3027_v40, %v3022_v37 }
0x127b   :  { %v3029_v42 = vadd.f32 %v3028_v41, %v3022_v37 }
0x127d   :  { %v3030_v43 = vmul.f32 0.7978846, %v3029_v42 }
0x127f   :  { %5194 = vtanh.f32 %v3030_v43 }
0x1289   :  { %v5195_v44 = vpop.eup %5194 }
0x128a   :  { %v3032_v46 = vadd.f32 1.0, %v5195_v44 }
0x128c   :  { %v3033_v47 = vmul.f32 %v3032_v46, %v3025_v45 }
0x128e   :  { %4838 = vmatmul.mubr.msk.f32.vlgmr.msra.gmra.mrb[32].mxu0 %vm747_vm9, %v3033_v47 }
0x128f   :  { %4863 = vmatprep.mubr.msk.f32.mxu0 %vm5251_vm10, %v5245_v17 }
0x1361   :  { %v3118_v15 = vpop.f32.mrb[32].mxu0 }
0x1362   :  { %v3119_v49 = vadd.f32 %v4374_v48, %v3118_v15  ;;  %v4839_v50 = vpop.f32.mrb[33].mxu0 }
0x1364   :  { %v3122_v52 = vadd.f32 %v3119_v49, %v2940_v18 }
0x1366   :  { %v3125_v31 = vsel %vm247_vm8, %v3122_v52, 0.0 }
0x1367   :  { %3126 = vadd.xlane.f32.xlu0 %v3125_v31 }
0x13f4   :  { %v3127_v53 = vpop.xlane.xlu0 %3126 }
0x13f5   :  { %v3128_v54 = vmul.f32 0.03125, %v3127_v53 }
0x13f7   :  { %v3129_v55 = vsub.f32 %v3122_v52, %v3128_v54 }
0x13f9   :  { %v3130_v56 = vmul.f32 %v3129_v55, %v3129_v55 }
0x13fb   :  { %v3131_v57 = vsel %vm247_vm8, %v3130_v56, 0.0 }
0x13fc   :  { %3132 = vadd.xlane.f32.xlu0 %v3131_v57 }
0x1489   :  { %v3133_v0 = vpop.xlane.xlu0 %3132 }
0x148a   :  { %v3134_v1 = vmul.f32 0.03125, %v3133_v0 }
0x148c   :  { %v3135_v2 = vadd.f32 1e-12, %v3134_v1 }
0x148e   :  { %5196 = vrsqrt.f32 %v3135_v2 }
0x1498   :  { %v5197_v8 = vpop.eup %5196 }
0x1499   :  { %v3137_v4 = vmul.f32 %v5197_v8, %v3129_v55 }
0x149b   :  { %v3144_v29 = vmul.f32 %v4376_v3, %v3137_v4 }
0x149d   :  { %v5960_v14 = vadd.f32 %v4377_v5, %v3144_v29 }
0x149f   :  { %4849 = vmatmul.mubr.msk.f32.vlgmr.msra.gmra.mrb[36].mxu1 %vm247_vm8, %v5960_v14 }
0x14a0   :  { %4853 = vmatprep.mubr.msk.f32.mxu1 %vm5251_vm10, %v5245_v17 }
0x1572   :  { %v3234_v7 = vpop.f32.mrb[36].mxu1 }
0x1573   :  { %v5969_v22 = vadd.f32 %v4383_v6, %v3234_v7  ;;  %v4850_v9 = vpop.f32.mrb[37].mxu1 }
0x1575   :  { %3406 = vrot.lane.b32.xlu0 %v5969_v22, %s5253_s6  ;;  %3239 = vrot.lane.b32.xlu1 %v5969_v22, %s5247_s1  ;;  %s6193_s1 = smov 40  }
0x1579   :  { %3571 = vrot.lane.b32.xlu0 %v5969_v22, %s5257_s25  ;;  %3404 = vrot.lane.b32.xlu1 %v5969_v22, %s5255_s21 }
0x157d   :  { %3738 = vrot.lane.b32.xlu0 %v5969_v22, %s5258_s2  ;;  %3573 = vrot.lane.b32.xlu1 %v5969_v22, %s5254_s7 }
0x1581   :  { %3740 = vrot.lane.b32.xlu1 %v5969_v22, %s5256_s24  ;;  %s6194_s24 = smov 8  }
0x15e7   :  { %v3407_v10 = vpop.permute.xlu0 %3406  ;;  %v3240_v11 = vpop.permute.xlu1 %3239 }
0x15e8   :  { %4852 = vmatpush3.xpose.msk.msra.mxu1 %vm2145_vm13, %v3240_v11  ;;  %4862 = vmatpush3.xpose.msk.msra.mxu0 %vm2145_vm13, %v3407_v10 }
0x15e9   :  { %4871 = vmatprep.subr.mxu0 %v5245_v17  ;;  %4856 = vmatprep.subr.mxu1 %v5245_v17 }
0x15eb   :  { %4854 = vmatmul.mubr.msk.f32.vlgmr.msra.gmra.mrb[38].mxu1 %vm2145_vm13, %v5969_v22  ;;  %v3405_v12 = vpop.permute.xlu1 %3404  ;;  %v3572_v16 = vpop.permute.xlu0 %3571 }
0x15ec   :  { %4864 = vmatmul.mubr.msk.f32.vlgmr.msra.gmra.mrb[34].mxu0 %vm2145_vm13, %v3405_v12  ;;  %4858 = vmatprep.mubr.msk.f32.mxu1 %vm5251_vm10, %v5245_v17  ;;  %v4397_v12 = vld [vmem:[%s6160_s10 + $0x20] sm:$0xff] }
0x15ed   :  { %4873 = vmatprep.mubr.msk.f32.mxu0 %vm5251_vm10, %v5245_v17 }
0x15ef   :  { %v3574_v13 = vpop.permute.xlu1 %3573  ;;  %v3739_v19 = vpop.permute.xlu0 %3738 }
0x15f0   :  { %4872 = vmatpush3.xpose.msk.msra.mxu0 %vm2145_vm13, %v3574_v13  ;;  %v4398_v13 = vld [vmem:[%s6160_s10 + $0x28] sm:$0xff] }
0x15f1   :  { %4881 = vmatprep.subr.mxu0 %v5245_v17 }
0x15f3   :  { %4874 = vmatmul.mubr.msk.f32.vlgmr.msra.gmra.mrb[36].mxu0 %vm2145_vm13, %v3572_v16  ;;  %v3741_v18 = vpop.permute.xlu1 %3740  ;;  %v5123_v16 = vpack.c.bf16 %v4398_v13, %v4397_v12 }
0x15f4   :  { %4882 = vmatpush3.xpose.msk.msra.mxu0 %vm2145_vm13, %v3741_v18  ;;  %4883 = vmatprep.mubr.msk.f32.mxu0 %vm5251_vm10, %v5245_v17 }
0x15f5   :  { %5122 = vmatprep.subr.bf16.mxu0 %v5246_v26 }
0x15f7   :  { %4884 = vmatmul.mubr.msk.f32.vlgmr.msra.gmra.mrb[38].mxu0 %vm2145_vm13, %v3739_v19 }
0x15f8   :  { %4899 = vmatprep.mubr.msk.f32.mxu0 %vm5251_vm10, %v5245_v17  ;;  %5124 = vmatpush3.bf16.msra.mxu0 %v5123_v16 }
0x15f9   :  { %5125 = vmatprep.subr.bf16.mxu0 %v5246_v26 }
0x16be   :  { %v3311_v20 = vpop.f32.mrb[38].mxu1 }
0x16bf   :  { %v3315_v21 = vmul.f32 0.35355338, %v3311_v20  ;;  %v4855_v23 = vpop.f32.mrb[39].mxu1  ;;  %v3478_v24 = vpop.f32.mrb[34].mxu0 }
0x16c0   :  { %v3482_v25 = vmul.f32 0.35355338, %v3478_v24  ;;  %v4865_v27 = vpop.f32.mrb[35].mxu0  ;;  %v4399_v23 = vld [vmem:[%s6160_s10 + $0x30] sm:$0xff]  ;;  %v4400_v24 = vld [vmem:[%s6160_s10 + $0x38] sm:$0xff] }
0x16c1   :  { %v3316_v28 = vsel %vm5709_vm6, %v3315_v21, -1e+30 }
0x16c2   :  { %v3317_v30 = vsel %vm2145_vm13, %v3316_v28, -inf  ;;  %v3483_v32 = vsel %vm5709_vm6, %v3482_v25, -1e+30  ;;  %v5126_v25 = vpack.c.bf16 %v4400_v24, %v4399_v23 }
0x16c3   :  { %3318 = vmax.xlane.f32.xlu1 %v3317_v30  ;;  %v3484_v33 = vsel %vm2145_vm13, %v3483_v32, -inf }
0x16c4   :  { %3485 = vmax.xlane.f32.xlu0 %v3484_v33  ;;  %5127 = vmatpush3.bf16.msra.mxu0 %v5126_v25 }
0x16c5   :  { %5134 = vmatprep.subr.bf16.mxu0 %v5246_v26 }
0x16c6   :  { %v3645_v34 = vpop.f32.mrb[36].mxu0 }
0x16c7   :  { %v3649_v35 = vmul.f32 0.35355338, %v3645_v34  ;;  %v4875_v36 = vpop.f32.mrb[37].mxu0 }
0x16c9   :  { %v3650_v37 = vsel %vm5709_vm6, %v3649_v35, -1e+30 }
0x16ca   :  { %v3812_v38 = vpop.f32.mrb[38].mxu0  ;;  %v3651_v39 = vsel %vm2145_vm13, %v3650_v37, -inf }
0x16cb   :  { %v3816_v40 = vmul.f32 0.35355338, %v3812_v38  ;;  %3652 = vmax.xlane.f32.xlu0 %v3651_v39  ;;  %v4885_v41 = vpop.f32.mrb[39].mxu0  ;;  %v4402_v39 = vld [vmem:[%s6161_s11 + $0x1] ss:$0 sm:$0xff] }
0x16cd   :  { %v3817_v42 = vsel %vm5709_vm6, %v3816_v40, -1e+30 }
0x16ce   :  { %v3818_v43 = vsel %vm2145_vm13, %v3817_v42, -inf }
0x16cf   :  { %3819 = vmax.xlane.f32.xlu1 %v3818_v43 }
0x16e0   :  { %3495 = vrot.lane.b32.xlu1 %v5969_v22, %s5259_s5 }
0x1750   :  { %v3319_v44 = vpop.xlane.xlu1 %3318 }
0x1751   :  { %v3320_v45 = vsub.f32 %v3316_v28, %v3319_v44  ;;  %v3486_v46 = vpop.xlane.xlu0 %3485 }
0x1752   :  { %v3487_v47 = vsub.f32 %v3483_v32, %v3486_v46 }
0x1753   :  { %v3321_v48 = vmul.f32 1.442695, %v3320_v45 }
0x1754   :  { %v3488_v15 = vmul.f32 1.442695, %v3487_v47 }
0x1755   :  { %5198 = vpow2.f32 %v3321_v48 }
0x1756   :  { %5200 = vpow2.f32 %v3488_v15 }
0x1758   :  { %v3653_v57 = vpop.xlane.xlu0 %3652 }
0x1759   :  { %v3654_v58 = vsub.f32 %v3650_v37, %v3653_v57 }
0x175b   :  { %v3655_v59 = vmul.f32 1.442695, %v3654_v58  ;;  %v4407_v58 = vld [vmem:[%s6163_s13 + $0x1] ss:$0 sm:$0xff] }
0x175c   :  { %v3820_v49 = vpop.xlane.xlu1 %3819 }
0x175d   :  { %v3821_v50 = vsub.f32 %v3817_v42, %v3820_v49  ;;  %v4409_v49 = vld [vmem:[%s6164_s14 + $0x28] sm:$0xff] }
0x175f   :  { %v5199_v52 = vpop.eup %5198  ;;  %v3822_v31 = vmul.f32 1.442695, %v3821_v50 }
0x1760   :  { %v5201_v51 = vpop.eup %5200  ;;  %v3323_v53 = vsel %vm2145_vm13, %v5199_v52, 0.0  ;;  %v3496_v62 = vpop.permute.xlu1 %3495 }
0x1761   :  { %5202 = vpow2.f32 %v3822_v31  ;;  %3324 = vadd.xlane.f32.xlu0 %v3323_v53  ;;  %v3490_v54 = vsel %vm2145_vm13, %v5201_v51, 0.0 }
0x1762   :  { %3491 = vadd.xlane.f32.xlu1 %v3490_v54  ;;  %5204 = vpow2.f32 %v3655_v59 }
0x176b   :  { %v5203_v55 = vpop.eup %5202 }
0x176c   :  { %v3824_v56 = vsel %vm2145_vm13, %v5203_v55, 0.0  ;;  %v5205_v60 = vpop.eup %5204 }
0x176d   :  { %3825 = vadd.xlane.f32.xlu1 %v3824_v56  ;;  %v3657_v61 = vsel %vm2145_vm13, %v5205_v60, 0.0  ;;  %v4406_v56 = vld [vmem:[%s6162_s12 + $0x1] ss:$0 sm:$0xff] }
0x1777   :  { %3328 = vrot.lane.b32.xlu0 %v5969_v22, %s5249_s23 }
0x177e   :  { %3662 = vrot.lane.b32.xlu1 %v5969_v22, %s6192_s9 }
0x1796   :  { %3658 = vadd.xlane.f32.xlu0 %v3657_v61  ;;  %v4415_v61 = vld [vmem:[%s6166_s16 + $0x40] sm:$0xff] }
0x17ac   :  { %3829 = vrot.lane.b32.xlu0 %v5969_v22, %s6193_s1  ;;  %s5265_s1 = smov [#allocation2]  }
0x17ad   :  { %s4262_s23 = sshll.u32 %s5265_s1, 4  ;;  %s4263_s23 = int_to_ptr.vmem [resolvable:$true] %s4262_s23 }
0x17ae   :  { %s5220_s6 = scalar_lea.vmem %s4263_s23, 128  ;;  %p5225_p1 = scmp.lt.s32.totalorder %s4263_s23, %s4263_s23 }
0x17af   :  { %p5221_p0 = scmp.ne.s32.totalorder %s4263_s23, %s5220_s6  ;;  %p5226_p2 = scmp.lt.s32.totalorder %s5220_s6, %s5220_s6 }
0x17b1   :  { %p5227_p3 = por %p5226_p2, %p5225_p1 }
0x17b3   :  { %p5228_p4 = pnand %p5227_p3, %p5221_p0 }
0x17ee   :  { %v3325_v63 = vpop.xlane.xlu0 %3324 }
0x17ef   :  { %5206 = vrcp.f32 %v3325_v63  ;;  %v3492_v0 = vpop.xlane.xlu1 %3491 }
0x17f0   :  { %5208 = vrcp.f32 %v3492_v0  ;;  %v4417_v0 = vld [vmem:[%s6166_s16 + $0x50] sm:$0xff] }
0x17f2   :  { %v3329_v1 = vpop.permute.xlu0 %3328 }
0x17f3   :  { %4857 = vmatpush3.msra.mxu1 %v3329_v1  ;;  %v4418_v1 = vld [vmem:[%s6166_s16 + $0x58] sm:$0xff] }
0x17f4   :  { %4866 = vmatprep.subr.mxu1 %v5245_v17 }
0x17f9   :  { %v5207_v2 = vpop.eup %5206 }
0x17fa   :  { %v3327_v8 = vmul.f32 %v5207_v2, %v5199_v52  ;;  %v3826_v3 = vpop.xlane.xlu1 %3825  ;;  %v5209_v4 = vpop.eup %5208  ;;  %v4411_v52 = vld [vmem:[%s6164_s14 + $0x38] sm:$0xff]  ;;  %v5138_v2 = vpack.c.bf16 %v4418_v1, %v4417_v0 }
0x17fb   :  { %v3494_v5 = vmul.f32 %v5209_v4, %v5201_v51 }
0x17fc   :  { %4859 = vmatmul.mubr.msk.f32.vlgmr.msra.gmra.mrb[40].mxu1 %vm2145_vm13, %v3327_v8  ;;  %v4419_v8 = vld [vmem:[%s6166_s16 + $0x60] sm:$0xff] }
0x17fd   :  { %4867 = vmatpush3.msra.mxu1 %v3496_v62  ;;  %4868 = vmatprep.mubr.msk.f32.mxu1 %vm5251_vm10, %v5245_v17  ;;  %v4416_v62 = vld [vmem:[%s6166_s16 + $0x48] sm:$0xff] }
0x17fe   :  { %v3663_v29 = vpop.permute.xlu1 %3662  ;;  %4876 = vmatprep.subr.mxu1 %v5245_v17  ;;  %v5135_v63 = vpack.c.bf16 %v4416_v62, %v4415_v61 }
0x1800   :  { %4869 = vmatmul.mubr.msk.f32.vlgmr.msra.gmra.mrb[42].mxu1 %vm2145_vm13, %v3494_v5  ;;  %v4421_v5 = vld [vmem:[%s6166_s16 + $0x70] sm:$0xff] }
0x1801   :  { %4877 = vmatpush3.msra.mxu1 %v3663_v29  ;;  %4878 = vmatprep.mubr.msk.f32.mxu1 %vm5251_vm10, %v5245_v17  ;;  %v4422_v29 = vld [vmem:[%s6166_s16 + $0x78] sm:$0xff] }
0x1802   :  { %4886 = vmatprep.subr.mxu1 %v5245_v17 }
0x1823   :  { %v3659_v6 = vpop.xlane.xlu0 %3658 }
0x1824   :  { %5210 = vrcp.f32 %v3659_v6  ;;  %v5144_v6 = vpack.c.bf16 %v4422_v29, %v4421_v5 }
0x1825   :  { %5212 = vrcp.f32 %v3826_v3  ;;  %v4420_v3 = vld [vmem:[%s6166_s16 + $0x68] sm:$0xff] }
0x1826   :  { %v5141_v4 = vpack.c.bf16 %v4420_v3, %v4419_v8 }
0x1827   :  { %v3830_v10 = vpop.permute.xlu0 %3829 }
0x182e   :  { %v5211_v7 = vpop.eup %5210 }
0x182f   :  { %v3661_v22 = vmul.f32 %v5211_v7, %v5205_v60  ;;  %v5213_v9 = vpop.eup %5212  ;;  %v4413_v7 = vld [vmem:[%s6165_s15 + $0x1] ss:$0 sm:$0xff] }
0x1830   :  { %v3828_v11 = vmul.f32 %v5213_v9, %v5203_v55 }
0x1831   :  { %4879 = vmatmul.mubr.msk.f32.vlgmr.msra.gmra.mrb[44].mxu1 %vm2145_vm13, %v3661_v22 }
0x1832   :  { %4887 = vmatpush3.msra.mxu1 %v3830_v10  ;;  %4888 = vmatprep.mubr.msk.f32.mxu1 %vm5251_vm10, %v5245_v17 }
0x1833   :  { %5128 = vmatprep.subr.bf16.mxu1 %v5246_v26 }
0x1835   :  { %4889 = vmatmul.mubr.msk.f32.vlgmr.msra.gmra.mrb[46].mxu1 %vm2145_vm13, %v3828_v11 }
0x1836   :  { %4910 = vmatprep.mubr.msk.f32.mxu1 %vm5251_vm10, %v5245_v17 }
0x18cf   :  { %v3400_v18 = vpop.f32.mrb[40].mxu1 }
0x18d0   :  { %v4860_v19 = vpop.f32.mrb[41].mxu1 }
0x18d3   :  { %v3567_v20 = vpop.f32.mrb[42].mxu1 }
0x18d4   :  { %3906 = vrot.lane.b32.xlu1 %v3567_v20, %s6194_s24  ;;  %v4870_v21 = vpop.f32.mrb[43].mxu1 }
0x1904   :  { %v3734_v27 = vpop.f32.mrb[44].mxu1 }
0x1905   :  { %3910 = vrot.lane.b32.xlu0 %v3734_v27, %s6195_s22  ;;  %v4880_v28 = vpop.f32.mrb[45].mxu1 }
0x1908   :  { %v3901_v30 = vpop.f32.mrb[46].mxu1 }
0x1909   :  { %3914 = vrot.lane.b32.xlu1 %v3901_v30, %s6196_s4  ;;  %v4890_v32 = vpop.f32.mrb[47].mxu1 }
0x1946   :  { %v3907_v33 = vpop.permute.xlu1 %3906 }
0x1947   :  { %v3917_v35 = vsel %vm2145_vm13, %v3400_v18, %v3907_v33 }
0x1977   :  { %v3911_v34 = vpop.permute.xlu0 %3910 }
0x1978   :  { %v3918_v36 = vsel %vm852_vm12, %v3917_v35, %v3911_v34 }
0x197b   :  { %v3915_v37 = vpop.permute.xlu1 %3914 }
0x197c   :  { %v3919_v38 = vsel %vm2824_vm14, %v3918_v36, %v3915_v37 }
0x197d   :  { %4900 = vmatmul.mubr.msk.f32.vlgmr.msra.gmra.mrb[40].mxu0 %vm247_vm8, %v3919_v38 }
0x197e   :  { %4929 = vmatprep.mubr.msk.f32.mxu0 %vm5251_vm10, %v5245_v17  ;;  %v4408_v17 = vld [vmem:[%s6164_s14 + $0x20] sm:$0xff]  ;;  %5136 = vmatpush3.bf16.msra.mxu0 %v5135_v63 }
0x197f   :  { %v5129_v50 = vpack.c.bf16 %v4409_v49, %v4408_v17  ;;  %5137 = vmatprep.subr.bf16.mxu0 %v5246_v26 }
0x1981   :  { %5130 = vmatpush3.bf16.msra.mxu1 %v5129_v50 }
0x1982   :  { %5131 = vmatprep.subr.bf16.mxu1 %v5246_v26  ;;  %5139 = vmatpush3.bf16.msra.mxu0 %v5138_v2 }
0x1983   :  { %5140 = vmatprep.subr.bf16.mxu0 %v5246_v26 }
0x1986   :  { %5142 = vmatpush3.bf16.msra.mxu0 %v5141_v4 }
0x1987   :  { %5143 = vmatprep.subr.bf16.mxu0 %v5246_v26  ;;  %v4424_v26 = vld [vmem:[%s6167_s17 + $0x1] ss:$0 sm:$0xff] }
0x198a   :  { %5145 = vmatpush3.bf16.msra.mxu0 %v5144_v6 }
0x1a50   :  { %v4002_v40 = vpop.f32.mrb[40].mxu0 }
0x1a51   :  { %v4003_v41 = vadd.f32 %v4402_v39, %v4002_v40  ;;  %v4901_v42 = vpop.f32.mrb[41].mxu0 }
0x1a53   :  { %v4006_v43 = vadd.f32 %v4003_v41, %v5960_v14  ;;  %v4410_v14 = vld [vmem:[%s6164_s14 + $0x30] sm:$0xff]  ;;  %v4428_v41 = vld [vmem:[%s6168_s18 + $0x1] ss:$0 sm:$0xff] }
0x1a54   :  { %v5132_v31 = vpack.c.bf16 %v4411_v52, %v4410_v14 }
0x1a55   :  { %v4011_v44 = vsel %vm247_vm8, %v4006_v43, 0.0 }
0x1a56   :  { %4012 = vadd.xlane.f32.xlu0 %v4011_v44  ;;  %5133 = vmatpush3.bf16.msra.mxu1 %v5132_v31 }
0x1ae3   :  { %v4013_v45 = vpop.xlane.xlu0 %4012 }
0x1ae4   :  { %v4014_v46 = vmul.f32 0.03125, %v4013_v45 }
0x1ae6   :  { %v4015_v47 = vsub.f32 %v4006_v43, %v4014_v46  ;;  %v4429_v43 = vld [vmem:[%s6169_s19 + $0x1] ss:$0 sm:$0xff] }
0x1ae8   :  { %v4016_v48 = vmul.f32 %v4015_v47, %v4015_v47 }
0x1aea   :  { %v4017_v15 = vsel %vm247_vm8, %v4016_v48, 0.0 }
0x1aeb   :  { %4018 = vadd.xlane.f32.xlu1 %v4017_v15 }
0x1b78   :  { %v4019_v51 = vpop.xlane.xlu1 %4018 }
0x1b79   :  { %v4020_v53 = vmul.f32 0.03125, %v4019_v51 }
0x1b7b   :  { %v4021_v54 = vadd.f32 1e-12, %v4020_v53 }
0x1b7d   :  { %5214 = vrsqrt.f32 %v4021_v54 }
0x1b87   :  { %v5215_v55 = vpop.eup %5214 }
0x1b88   :  { %v4023_v57 = vmul.f32 %v5215_v55, %v4015_v47 }
0x1b8a   :  { %v4030_v59 = vmul.f32 %v4406_v56, %v4023_v57 }
0x1b8c   :  { %v4037_v60 = vadd.f32 %v4407_v58, %v4030_v59 }
0x1b8e   :  { %4911 = vmatmul.mubr.msk.f32.vlgmr.msra.gmra.mrb[48].mxu1 %vm247_vm8, %v4037_v60 }
0x1c61   :  { %v4120_v22 = vpop.f32.mrb[48].mxu1 }
0x1c62   :  { %v4121_v9 = vadd.f32 %v4413_v7, %v4120_v22  ;;  %v4912_v10 = vpop.f32.mrb[49].mxu1 }
0x1c64   :  { %v4125_v11 = vmul.f32 0.044715, %v4121_v9  ;;  %v4124_v20 = vmul.f32 0.5, %v4121_v9 }
0x1c66   :  { %v4126_v12 = vmul.f32 %v4125_v11, %v4121_v9 }
0x1c68   :  { %v4127_v13 = vmul.f32 %v4126_v12, %v4121_v9 }
0x1c6a   :  { %v4128_v16 = vadd.f32 %v4127_v13, %v4121_v9 }
0x1c6c   :  { %v4129_v18 = vmul.f32 0.7978846, %v4128_v16 }
0x1c6e   :  { %5216 = vtanh.f32 %v4129_v18 }
0x1c78   :  { %v5217_v19 = vpop.eup %5216 }
0x1c79   :  { %v4131_v21 = vadd.f32 1.0, %v5217_v19 }
0x1c7b   :  { %v4132_v23 = vmul.f32 %v4131_v21, %v4124_v20 }
0x1c7d   :  { %4930 = vmatmul.mubr.msk.f32.vlgmr.msra.gmra.mrb[42].mxu0 %vm747_vm9, %v4132_v23 }
0x1d50   :  { %v4219_v24 = vpop.f32.mrb[42].mxu0 }
0x1d51   :  { %v4220_v25 = vadd.f32 %v4424_v26, %v4219_v24  ;;  %v4931_v27 = vpop.f32.mrb[43].mxu0 }
0x1d53   :  { %v4223_v28 = vadd.f32 %v4220_v25, %v4037_v60 }
0x1d55   :  { %v4228_v30 = vsel %vm247_vm8, %v4223_v28, 0.0 }
0x1d56   :  { %4229 = vadd.xlane.f32.xlu0 %v4228_v30 }
0x1de3   :  { %v4230_v32 = vpop.xlane.xlu0 %4229 }
0x1de4   :  { %v4231_v33 = vmul.f32 0.03125, %v4230_v32 }
0x1de6   :  { %v4232_v34 = vsub.f32 %v4223_v28, %v4231_v33 }
0x1de8   :  { %v4233_v35 = vmul.f32 %v4232_v34, %v4232_v34 }
0x1dea   :  { %v4234_v36 = vsel %vm247_vm8, %v4233_v35, 0.0 }
0x1deb   :  { %4235 = vadd.xlane.f32.xlu0 %v4234_v36 }
0x1e78   :  { %v4236_v37 = vpop.xlane.xlu0 %4235 }
0x1e79   :  { %v4237_v38 = vmul.f32 0.03125, %v4236_v37 }
0x1e7b   :  { %v4238_v39 = vadd.f32 1e-12, %v4237_v38 }
0x1e7d   :  { %5218 = vrsqrt.f32 %v4238_v39 }
0x1e87   :  { %v5219_v40 = vpop.eup %5218 }
0x1e88   :  { %v4240_v42 = vmul.f32 %v5219_v40, %v4232_v34 }
0x1e8a   :  { %v4247_v44 = vmul.f32 %v4428_v41, %v4240_v42 }
0x1e8c   :  { %v4254_v45 = vadd.f32 %v4429_v43, %v4247_v44 }
0x1e8e   :  { %4255 = vst.msk [vmem:[#allocation2] sm:$0xff] %vm247_vm8, %v4254_v45 }
0x1e8f   :  { %5231 = shalt.err (!%p5228_p4)
}
0x1e90   :  { %s5232_s14 = scalar_lea.hbm %s6170_s20, 128 }
0x1e91   :  { %p5233_p5 = scmp.ne.s32.totalorder %s6170_s20, %s5232_s14  ;;  %p5236_p6 = scmp.lt.u32.totalorder %s5232_s14, %s6170_s20 }
0x1e93   :  { %p5238_p7 = pnand %p5236_p6, %p5233_p5 }
0x1e95   :  { %5241 = shalt.err (!%p5238_p7)
}
0x1e96   :  { %4265 = dma.vmem_to_hbm [thread:$0]  %s4263_s23, 128, %s6170_s20, [#allocation3]  }
0x1e97   :  { %5242 = dma.done.wait [#allocation3], 128  }
0x1e98   :  { %5243 = vsyncadd [#allocation3], 4294967168 }
0x1e99   :  { %4269 = vsyncpa [#allocation3], 1 }

</bundles_post_ra>
